<compile_context>
chip_gen: v7x
topology: tpu7x:2x2x1
jax: 0.10.0
libtpu: 0.0.40
codegen_flags: <defaults>
</compile_context>

<pallas_src>
import jax
import jax.numpy as jnp
from jax import lax
from jax.experimental import pallas as pl
from jax.experimental.pallas import tpu as pltpu

# ----------------------------- hyper-params -----------------------------
BATCH = 8          # fills all 8 vreg sublanes (perf-review item)
SEQ_LEN = 8
INPUT_SIZE = 4
LATENT_SIZE = 8    # == proj_size of the LSTM (must be < hidden_size)
HIDDEN_SIZE = 32
NUM_LAYERS = 2
DIRECTIONS = 1     # ordinary (unidirectional) LSTM


# ------------------------------- kernel ---------------------------------
def lstm_encoder_kernel(
    y_ref,                                  # (T, B, I)   sequence-major input
    wx0_ref, wh0_ref, b0_ref, whr0_ref,     # layer 0: (4,I,H) (4,P,H) (4,1,H) (H,P)
    wx1_ref, wh1_ref, b1_ref, whr1_ref,     # layer 1: (4,P,H) (4,P,H) (4,1,H) (H,P)
    z_ref,                                  # (B, P)      output
):
    T, B, _ = y_ref.shape
    H = wh0_ref.shape[-1]       # hidden size
    P = whr0_ref.shape[-1]      # proj / latent size

    def cell(x, h, c, wx_ref, wh_ref, b_ref, whr_ref):
        # Per-gate matmuls with pre-transposed weights: each gate result is a
        # clean (B, H) tile; no slicing of a 4H-wide vector at 32-lane offsets.
        def gate(g):
            return (jnp.dot(x, wx_ref[g], preferred_element_type=jnp.float32)
                    + jnp.dot(h, wh_ref[g], preferred_element_type=jnp.float32)
                    + b_ref[g])
        i_g = jax.nn.sigmoid(gate(0))          # input gate
        f_g = jax.nn.sigmoid(gate(1))          # forget gate
        g_g = jnp.tanh(gate(2))                # cell candidate
        o_g = jax.nn.sigmoid(gate(3))          # output gate
        c_new = f_g * c + i_g * g_g            # (B, H)
        h_full = o_g * jnp.tanh(c_new)         # (B, H)
        # LSTM projection (proj_size): h = h_full @ W_hr^T (pre-transposed)
        h_new = jnp.dot(h_full, whr_ref[...],
                        preferred_element_type=jnp.float32)   # (B, P)
        return h_new, c_new

    # zero initial states (PyTorch get_initial)
    h0 = jnp.zeros((B, P), jnp.float32)
    c0 = jnp.zeros((B, H), jnp.float32)
    h1 = jnp.zeros((B, P), jnp.float32)
    c1 = jnp.zeros((B, H), jnp.float32)

    # Whole recurrence inside a single invocation: static (fully unrolled)
    # time loop; the LLO scheduler sees all 2*T cell steps at once.
    for t in range(T):
        x_t = y_ref[t]                               # (B, I)
        h0, c0 = cell(x_t, h0, c0, wx0_ref, wh0_ref, b0_ref, whr0_ref)
        h1, c1 = cell(h0, h1, c1, wx1_ref, wh1_ref, b1_ref, whr1_ref)

    # z = mean over layers of the final hidden state: single store.
    z_ref[...] = ((h0 + h1) * (1.0 / NUM_LAYERS)).astype(z_ref.dtype)


# ------------------------------- wrapper ---------------------------------
def _per_gate(w_ih, w_hh, b_ih, b_hh, w_hr):
    """PyTorch-format LSTM params -> kernel format (per-gate, pre-transposed)."""
    H = HIDDEN_SIZE
    in_dim = w_ih.shape[1]
    P = w_hh.shape[1]
    wx = jnp.transpose(w_ih.reshape(4, H, in_dim), (0, 2, 1))   # (4, in, H)
    wh = jnp.transpose(w_hh.reshape(4, H, P), (0, 2, 1))        # (4, P, H)
    b = (b_ih + b_hh).reshape(4, 1, H)                          # (4, 1, H)
    whr = w_hr.T                                                # (H, P)
    return wx, wh, b, whr


def lstm_encoder_forward(Y, params):
    B, T, _ = Y.shape
    P = LATENT_SIZE

    (w_ih0, w_hh0, b_ih0, b_hh0, w_hr0,
     w_ih1, w_hh1, b_ih1, b_hh1, w_hr1) = params

    wx0, wh0, b0, whr0 = _per_gate(w_ih0, w_hh0, b_ih0, b_hh0, w_hr0)
    wx1, wh1, b1, whr1 = _per_gate(w_ih1, w_hh1, b_ih1, b_hh1, w_hr1)

    # Y.permute(1, 0, 2) -> sequence-major (T, B, I); free layout plumbing.
    y_seq = jnp.transpose(Y, (1, 0, 2)).astype(jnp.float32)

    full = lambda a: pl.BlockSpec(a.shape, lambda i: (0,) * a.ndim)

    z = pl.pallas_call(
        lstm_encoder_kernel,
        out_shape=jax.ShapeDtypeStruct((B, P), jnp.float32),
        grid_spec=pltpu.PrefetchScalarGridSpec(
            num_scalar_prefetch=0,
            grid=(1,),      # single invocation: whole recurrence in-kernel
            in_specs=[
                full(y_seq),
                full(wx0), full(wh0), full(b0), full(whr0),
                full(wx1), full(wh1), full(b1), full(whr1),
            ],
            out_specs=pl.BlockSpec((B, P), lambda i: (0, 0)),
        ),
        compiler_params=pltpu.CompilerParams(
            dimension_semantics=("arbitrary",)),
    )(y_seq, wx0, wh0, b0, whr0, wx1, wh1, b1, whr1)
    return z


# ---------------------------- pure-JAX reference -------------------------
def lstm_encoder_reference(Y, params):
    (w_ih0, w_hh0, b_ih0, b_hh0, w_hr0,
     w_ih1, w_hh1, b_ih1, b_hh1, w_hr1) = params
    B = Y.shape[0]
    H, P = HIDDEN_SIZE, LATENT_SIZE
    x_seq = jnp.transpose(Y, (1, 0, 2)).astype(jnp.float32)   # (T, B, I)

    def run_layer(x_seq, w_ih, w_hh, b_ih, b_hh, w_hr):
        def step(carry, x):
            h, c = carry
            gates = (jnp.dot(x, w_ih.T, precision=lax.Precision.HIGHEST) + b_ih
                     + jnp.dot(h, w_hh.T, precision=lax.Precision.HIGHEST) + b_hh)
            i = jax.nn.sigmoid(gates[:, 0 * H:1 * H])
            f = jax.nn.sigmoid(gates[:, 1 * H:2 * H])
            g = jnp.tanh(gates[:, 2 * H:3 * H])
            o = jax.nn.sigmoid(gates[:, 3 * H:4 * H])
            c_new = f * c + i * g
            h_new = jnp.dot(o * jnp.tanh(c_new), w_hr.T,
                            precision=lax.Precision.HIGHEST)
            return (h_new, c_new), h_new
        init = (jnp.zeros((B, P), jnp.float32), jnp.zeros((B, H), jnp.float32))
        (h_fin, _), ys = lax.scan(step, init, x_seq)
        return h_fin, ys

    h_fin0, seq0 = run_layer(x_seq, w_ih0, w_hh0, b_ih0, b_hh0, w_hr0)
    h_fin1, _ = run_layer(seq0, w_ih1, w_hh1, b_ih1, b_hh1, w_hr1)
    h = jnp.stack([h_fin0, h_fin1], axis=0)          # (num_layers*dirs, B, P)
    return jnp.mean(h, axis=0)                       # (B, P)


# ------------------------------- params ----------------------------------
def init_params(key):
    """PyTorch-format LSTM(proj_size) params, uniform(-1/sqrt(H), 1/sqrt(H))."""
    H, P, I = HIDDEN_SIZE, LATENT_SIZE, INPUT_SIZE
    k = 1.0 / jnp.sqrt(jnp.float32(H))
    shapes = [
        (4 * H, I), (4 * H, P), (4 * H,), (4 * H,), (P, H),   # layer 0
        (4 * H, P), (4 * H, P), (4 * H,), (4 * H,), (P, H),   # layer 1
    ]
    keys = jax.random.split(key, len(shapes))
    return tuple(
        jax.random.uniform(kk, s, jnp.float32, minval=-k, maxval=k)
        for kk, s in zip(keys, shapes)
    )


# --------------------------------- main -----------------------------------
if __name__ == "__main__":
    key = jax.random.PRNGKey(0)
    pkey, xkey = jax.random.split(key)
    params = init_params(pkey)
    Y = jax.random.normal(xkey, (BATCH, SEQ_LEN, INPUT_SIZE), jnp.float32)

    fwd = jax.jit(lstm_encoder_forward)
    z = jax.block_until_ready(fwd(Y, params))

    ref = lstm_encoder_reference(Y, params)
    assert z.shape == (BATCH, LATENT_SIZE), z.shape
    assert jnp.allclose(z, ref, atol=2e-3, rtol=2e-3), (
        float(jnp.max(jnp.abs(z - ref))))

    print("KERNEL_OK")
</pallas_src>

<mosaic_0001>
module attributes {stable_mosaic.version = 11 : i64} {
  func.func @lstm_encoder_kernel(%arg0: i32, %arg1: memref<8x8x4xf32, #tpu.memory_space<vmem>>, %arg2: memref<4x4x32xf32, #tpu.memory_space<vmem>>, %arg3: memref<4x8x32xf32, #tpu.memory_space<vmem>>, %arg4: memref<4x1x32xf32, #tpu.memory_space<vmem>>, %arg5: memref<32x8xf32, #tpu.memory_space<vmem>>, %arg6: memref<4x8x32xf32, #tpu.memory_space<vmem>>, %arg7: memref<4x8x32xf32, #tpu.memory_space<vmem>>, %arg8: memref<4x1x32xf32, #tpu.memory_space<vmem>>, %arg9: memref<32x8xf32, #tpu.memory_space<vmem>>, %arg10: memref<8x8xf32, #tpu.memory_space<vmem>>) attributes {dimension_semantics = [#tpu.dimension_semantics<arbitrary>], iteration_bounds = array<i64: 1>, scalar_prefetch = 0 : i64, scratch_operands = 0 : i64, tpu.core_type = #tpu.core_type<tc>, window_params = [{pipeline_mode = #tpu.pipeline_mode<synchronous>, transform_indices = @transform_0, window_bounds = array<i64: 8, 8, 4>}, {pipeline_mode = #tpu.pipeline_mode<synchronous>, transform_indices = @transform_1, window_bounds = array<i64: 4, 4, 32>}, {pipeline_mode = #tpu.pipeline_mode<synchronous>, transform_indices = @transform_2, window_bounds = array<i64: 4, 8, 32>}, {pipeline_mode = #tpu.pipeline_mode<synchronous>, transform_indices = @transform_3, window_bounds = array<i64: 4, 1, 32>}, {pipeline_mode = #tpu.pipeline_mode<synchronous>, transform_indices = @transform_4, window_bounds = array<i64: 32, 8>}, {pipeline_mode = #tpu.pipeline_mode<synchronous>, transform_indices = @transform_5, window_bounds = array<i64: 4, 8, 32>}, {pipeline_mode = #tpu.pipeline_mode<synchronous>, transform_indices = @transform_6, window_bounds = array<i64: 4, 8, 32>}, {pipeline_mode = #tpu.pipeline_mode<synchronous>, transform_indices = @transform_7, window_bounds = array<i64: 4, 1, 32>}, {pipeline_mode = #tpu.pipeline_mode<synchronous>, transform_indices = @transform_8, window_bounds = array<i64: 32, 8>}, {pipeline_mode = #tpu.pipeline_mode<synchronous>, transform_indices = @transform_9, window_bounds = array<i64: 8, 8>}]} {
    %cst = arith.constant 0.000000e+00 : f32
    %0 = vector.broadcast %cst : f32 to vector<8x8xf32>
    %cst_0 = arith.constant 0.000000e+00 : f32
    %1 = vector.broadcast %cst_0 : f32 to vector<8x32xf32>
    %cst_1 = arith.constant 0.000000e+00 : f32
    %2 = vector.broadcast %cst_1 : f32 to vector<8x8xf32>
    %cst_2 = arith.constant 0.000000e+00 : f32
    %3 = vector.broadcast %cst_2 : f32 to vector<8x32xf32>
    %c0 = arith.constant 0 : index
    %c0_3 = arith.constant 0 : index
    %c0_4 = arith.constant 0 : index
    %4 = vector.load %arg1[%c0, %c0_3, %c0_4] : memref<8x8x4xf32, #tpu.memory_space<vmem>>, vector<1x8x4xf32>
    %5 = vector.shape_cast %4 : vector<1x8x4xf32> to vector<8x4xf32>
    %c0_5 = arith.constant 0 : index
    %c0_6 = arith.constant 0 : index
    %c0_7 = arith.constant 0 : index
    %6 = vector.load %arg2[%c0_5, %c0_6, %c0_7] : memref<4x4x32xf32, #tpu.memory_space<vmem>>, vector<1x4x32xf32>
    %7 = vector.shape_cast %6 : vector<1x4x32xf32> to vector<4x32xf32>
    %cst_8 = arith.constant dense<0.000000e+00> : vector<8x32xf32>
    %8 = tpu.matmul %5, %7, %cst_8 {dimension_numbers = #tpu.dot_dimension_numbers<[1], [0], [0], [1], [0, 0, 1, 1], [], []>} : vector<8x4xf32>, vector<4x32xf32>, vector<8x32xf32> -> vector<8x32xf32>
    %c0_9 = arith.constant 0 : index
    %c0_10 = arith.constant 0 : index
    %c0_11 = arith.constant 0 : index
    %9 = vector.load %arg3[%c0_9, %c0_10, %c0_11] : memref<4x8x32xf32, #tpu.memory_space<vmem>>, vector<1x8x32xf32>
    %10 = vector.shape_cast %9 : vector<1x8x32xf32> to vector<8x32xf32>
    %cst_12 = arith.constant dense<0.000000e+00> : vector<8x32xf32>
    %11 = tpu.matmul %0, %10, %cst_12 {dimension_numbers = #tpu.dot_dimension_numbers<[1], [0], [0], [1], [0, 0, 1, 1], [], []>} : vector<8x8xf32>, vector<8x32xf32>, vector<8x32xf32> -> vector<8x32xf32>
    %12 = arith.addf %8, %11 : vector<8x32xf32>
    %c0_13 = arith.constant 0 : index
    %c0_14 = arith.constant 0 : index
    %c0_15 = arith.constant 0 : index
    %13 = vector.load %arg4[%c0_13, %c0_14, %c0_15] : memref<4x1x32xf32, #tpu.memory_space<vmem>>, vector<1x1x32xf32>
    %14 = vector.shape_cast %13 : vector<1x1x32xf32> to vector<1x32xf32>
    %15 = vector.broadcast %14 : vector<1x32xf32> to vector<8x32xf32>
    %16 = arith.addf %12, %15 : vector<8x32xf32>
    %17 = arith.negf %16 : vector<8x32xf32>
    %18 = math.exp %17 : vector<8x32xf32>
    %cst_16 = arith.constant 1.000000e+00 : f32
    %19 = vector.broadcast %cst_16 : f32 to vector<8x32xf32>
    %20 = arith.addf %19, %18 : vector<8x32xf32>
    %21 = arith.divf %19, %20 : vector<8x32xf32>
    %c1 = arith.constant 1 : index
    %c0_17 = arith.constant 0 : index
    %c0_18 = arith.constant 0 : index
    %22 = vector.load %arg2[%c1, %c0_17, %c0_18] : memref<4x4x32xf32, #tpu.memory_space<vmem>>, vector<1x4x32xf32>
    %23 = vector.shape_cast %22 : vector<1x4x32xf32> to vector<4x32xf32>
    %cst_19 = arith.constant dense<0.000000e+00> : vector<8x32xf32>
    %24 = tpu.matmul %5, %23, %cst_19 {dimension_numbers = #tpu.dot_dimension_numbers<[1], [0], [0], [1], [0, 0, 1, 1], [], []>} : vector<8x4xf32>, vector<4x32xf32>, vector<8x32xf32> -> vector<8x32xf32>
    %c1_20 = arith.constant 1 : index
    %c0_21 = arith.constant 0 : index
    %c0_22 = arith.constant 0 : index
    %25 = vector.load %arg3[%c1_20, %c0_21, %c0_22] : memref<4x8x32xf32, #tpu.memory_space<vmem>>, vector<1x8x32xf32>
    %26 = vector.shape_cast %25 : vector<1x8x32xf32> to vector<8x32xf32>
    %cst_23 = arith.constant dense<0.000000e+00> : vector<8x32xf32>
    %27 = tpu.matmul %0, %26, %cst_23 {dimension_numbers = #tpu.dot_dimension_numbers<[1], [0], [0], [1], [0, 0, 1, 1], [], []>} : vector<8x8xf32>, vector<8x32xf32>, vector<8x32xf32> -> vector<8x32xf32>
    %28 = arith.addf %24, %27 : vector<8x32xf32>
    %c1_24 = arith.constant 1 : index
    %c0_25 = arith.constant 0 : index
    %c0_26 = arith.constant 0 : index
    %29 = vector.load %arg4[%c1_24, %c0_25, %c0_26] : memref<4x1x32xf32, #tpu.memory_space<vmem>>, vector<1x1x32xf32>
    %30 = vector.shape_cast %29 : vector<1x1x32xf32> to vector<1x32xf32>
    %31 = vector.broadcast %30 : vector<1x32xf32> to vector<8x32xf32>
    %32 = arith.addf %28, %31 : vector<8x32xf32>
    %33 = arith.negf %32 : vector<8x32xf32>
    %34 = math.exp %33 : vector<8x32xf32>
    %cst_27 = arith.constant 1.000000e+00 : f32
    %35 = vector.broadcast %cst_27 : f32 to vector<8x32xf32>
    %36 = arith.addf %35, %34 : vector<8x32xf32>
    %37 = arith.divf %35, %36 : vector<8x32xf32>
    %c2 = arith.constant 2 : index
    %c0_28 = arith.constant 0 : index
    %c0_29 = arith.constant 0 : index
    %38 = vector.load %arg2[%c2, %c0_28, %c0_29] : memref<4x4x32xf32, #tpu.memory_space<vmem>>, vector<1x4x32xf32>
    %39 = vector.shape_cast %38 : vector<1x4x32xf32> to vector<4x32xf32>
    %cst_30 = arith.constant dense<0.000000e+00> : vector<8x32xf32>
    %40 = tpu.matmul %5, %39, %cst_30 {dimension_numbers = #tpu.dot_dimension_numbers<[1], [0], [0], [1], [0, 0, 1, 1], [], []>} : vector<8x4xf32>, vector<4x32xf32>, vector<8x32xf32> -> vector<8x32xf32>
    %c2_31 = arith.constant 2 : index
    %c0_32 = arith.constant 0 : index
    %c0_33 = arith.constant 0 : index
    %41 = vector.load %arg3[%c2_31, %c0_32, %c0_33] : memref<4x8x32xf32, #tpu.memory_space<vmem>>, vector<1x8x32xf32>
    %42 = vector.shape_cast %41 : vector<1x8x32xf32> to vector<8x32xf32>
    %cst_34 = arith.constant dense<0.000000e+00> : vector<8x32xf32>
    %43 = tpu.matmul %0, %42, %cst_34 {dimension_numbers = #tpu.dot_dimension_numbers<[1], [0], [0], [1], [0, 0, 1, 1], [], []>} : vector<8x8xf32>, vector<8x32xf32>, vector<8x32xf32> -> vector<8x32xf32>
    %44 = arith.addf %40, %43 : vector<8x32xf32>
    %c2_35 = arith.constant 2 : index
    %c0_36 = arith.constant 0 : index
    %c0_37 = arith.constant 0 : index
    %45 = vector.load %arg4[%c2_35, %c0_36, %c0_37] : memref<4x1x32xf32, #tpu.memory_space<vmem>>, vector<1x1x32xf32>
    %46 = vector.shape_cast %45 : vector<1x1x32xf32> to vector<1x32xf32>
    %47 = vector.broadcast %46 : vector<1x32xf32> to vector<8x32xf32>
    %48 = arith.addf %44, %47 : vector<8x32xf32>
    %49 = math.tanh %48 : vector<8x32xf32>
    %c3 = arith.constant 3 : index
    %c0_38 = arith.constant 0 : index
    %c0_39 = arith.constant 0 : index
    %50 = vector.load %arg2[%c3, %c0_38, %c0_39] : memref<4x4x32xf32, #tpu.memory_space<vmem>>, vector<1x4x32xf32>
    %51 = vector.shape_cast %50 : vector<1x4x32xf32> to vector<4x32xf32>
    %cst_40 = arith.constant dense<0.000000e+00> : vector<8x32xf32>
    %52 = tpu.matmul %5, %51, %cst_40 {dimension_numbers = #tpu.dot_dimension_numbers<[1], [0], [0], [1], [0, 0, 1, 1], [], []>} : vector<8x4xf32>, vector<4x32xf32>, vector<8x32xf32> -> vector<8x32xf32>
    %c3_41 = arith.constant 3 : index
    %c0_42 = arith.constant 0 : index
    %c0_43 = arith.constant 0 : index
    %53 = vector.load %arg3[%c3_41, %c0_42, %c0_43] : memref<4x8x32xf32, #tpu.memory_space<vmem>>, vector<1x8x32xf32>
    %54 = vector.shape_cast %53 : vector<1x8x32xf32> to vector<8x32xf32>
    %cst_44 = arith.constant dense<0.000000e+00> : vector<8x32xf32>
    %55 = tpu.matmul %0, %54, %cst_44 {dimension_numbers = #tpu.dot_dimension_numbers<[1], [0], [0], [1], [0, 0, 1, 1], [], []>} : vector<8x8xf32>, vector<8x32xf32>, vector<8x32xf32> -> vector<8x32xf32>
    %56 = arith.addf %52, %55 : vector<8x32xf32>
    %c3_45 = arith.constant 3 : index
    %c0_46 = arith.constant 0 : index
    %c0_47 = arith.constant 0 : index
    %57 = vector.load %arg4[%c3_45, %c0_46, %c0_47] : memref<4x1x32xf32, #tpu.memory_space<vmem>>, vector<1x1x32xf32>
    %58 = vector.shape_cast %57 : vector<1x1x32xf32> to vector<1x32xf32>
    %59 = vector.broadcast %58 : vector<1x32xf32> to vector<8x32xf32>
    %60 = arith.addf %56, %59 : vector<8x32xf32>
    %61 = arith.negf %60 : vector<8x32xf32>
    %62 = math.exp %61 : vector<8x32xf32>
    %cst_48 = arith.constant 1.000000e+00 : f32
    %63 = vector.broadcast %cst_48 : f32 to vector<8x32xf32>
    %64 = arith.addf %63, %62 : vector<8x32xf32>
    %65 = arith.divf %63, %64 : vector<8x32xf32>
    %66 = arith.mulf %37, %1 : vector<8x32xf32>
    %67 = arith.mulf %21, %49 : vector<8x32xf32>
    %68 = arith.addf %66, %67 : vector<8x32xf32>
    %69 = math.tanh %68 : vector<8x32xf32>
    %70 = arith.mulf %65, %69 : vector<8x32xf32>
    %c0_49 = arith.constant 0 : index
    %c0_50 = arith.constant 0 : index
    %71 = vector.load %arg5[%c0_49, %c0_50] : memref<32x8xf32, #tpu.memory_space<vmem>>, vector<32x8xf32>
    %cst_51 = arith.constant dense<0.000000e+00> : vector<8x8xf32>
    %72 = tpu.matmul %70, %71, %cst_51 {dimension_numbers = #tpu.dot_dimension_numbers<[1], [0], [0], [1], [0, 0, 1, 1], [], []>} : vector<8x32xf32>, vector<32x8xf32>, vector<8x8xf32> -> vector<8x8xf32>
    %c0_52 = arith.constant 0 : index
    %c0_53 = arith.constant 0 : index
    %c0_54 = arith.constant 0 : index
    %73 = vector.load %arg6[%c0_52, %c0_53, %c0_54] : memref<4x8x32xf32, #tpu.memory_space<vmem>>, vector<1x8x32xf32>
    %74 = vector.shape_cast %73 : vector<1x8x32xf32> to vector<8x32xf32>
    %cst_55 = arith.constant dense<0.000000e+00> : vector<8x32xf32>
    %75 = tpu.matmul %72, %74, %cst_55 {dimension_numbers = #tpu.dot_dimension_numbers<[1], [0], [0], [1], [0, 0, 1, 1], [], []>} : vector<8x8xf32>, vector<8x32xf32>, vector<8x32xf32> -> vector<8x32xf32>
    %c0_56 = arith.constant 0 : index
    %c0_57 = arith.constant 0 : index
    %c0_58 = arith.constant 0 : index
    %76 = vector.load %arg7[%c0_56, %c0_57, %c0_58] : memref<4x8x32xf32, #tpu.memory_space<vmem>>, vector<1x8x32xf32>
    %77 = vector.shape_cast %76 : vector<1x8x32xf32> to vector<8x32xf32>
    %cst_59 = arith.constant dense<0.000000e+00> : vector<8x32xf32>
    %78 = tpu.matmul %2, %77, %cst_59 {dimension_numbers = #tpu.dot_dimension_numbers<[1], [0], [0], [1], [0, 0, 1, 1], [], []>} : vector<8x8xf32>, vector<8x32xf32>, vector<8x32xf32> -> vector<8x32xf32>
    %79 = arith.addf %75, %78 : vector<8x32xf32>
    %c0_60 = arith.constant 0 : index
    %c0_61 = arith.constant 0 : index
    %c0_62 = arith.constant 0 : index
    %80 = vector.load %arg8[%c0_60, %c0_61, %c0_62] : memref<4x1x32xf32, #tpu.memory_space<vmem>>, vector<1x1x32xf32>
    %81 = vector.shape_cast %80 : vector<1x1x32xf32> to vector<1x32xf32>
    %82 = vector.broadcast %81 : vector<1x32xf32> to vector<8x32xf32>
    %83 = arith.addf %79, %82 : vector<8x32xf32>
    %84 = arith.negf %83 : vector<8x32xf32>
    %85 = math.exp %84 : vector<8x32xf32>
    %cst_63 = arith.constant 1.000000e+00 : f32
    %86 = vector.broadcast %cst_63 : f32 to vector<8x32xf32>
    %87 = arith.addf %86, %85 : vector<8x32xf32>
    %88 = arith.divf %86, %87 : vector<8x32xf32>
    %c1_64 = arith.constant 1 : index
    %c0_65 = arith.constant 0 : index
    %c0_66 = arith.constant 0 : index
    %89 = vector.load %arg6[%c1_64, %c0_65, %c0_66] : memref<4x8x32xf32, #tpu.memory_space<vmem>>, vector<1x8x32xf32>
    %90 = vector.shape_cast %89 : vector<1x8x32xf32> to vector<8x32xf32>
    %cst_67 = arith.constant dense<0.000000e+00> : vector<8x32xf32>
    %91 = tpu.matmul %72, %90, %cst_67 {dimension_numbers = #tpu.dot_dimension_numbers<[1], [0], [0], [1], [0, 0, 1, 1], [], []>} : vector<8x8xf32>, vector<8x32xf32>, vector<8x32xf32> -> vector<8x32xf32>
    %c1_68 = arith.constant 1 : index
    %c0_69 = arith.constant 0 : index
    %c0_70 = arith.constant 0 : index
    %92 = vector.load %arg7[%c1_68, %c0_69, %c0_70] : memref<4x8x32xf32, #tpu.memory_space<vmem>>, vector<1x8x32xf32>
    %93 = vector.shape_cast %92 : vector<1x8x32xf32> to vector<8x32xf32>
    %cst_71 = arith.constant dense<0.000000e+00> : vector<8x32xf32>
    %94 = tpu.matmul %2, %93, %cst_71 {dimension_numbers = #tpu.dot_dimension_numbers<[1], [0], [0], [1], [0, 0, 1, 1], [], []>} : vector<8x8xf32>, vector<8x32xf32>, vector<8x32xf32> -> vector<8x32xf32>
    %95 = arith.addf %91, %94 : vector<8x32xf32>
    %c1_72 = arith.constant 1 : index
    %c0_73 = arith.constant 0 : index
    %c0_74 = arith.constant 0 : index
    %96 = vector.load %arg8[%c1_72, %c0_73, %c0_74] : memref<4x1x32xf32, #tpu.memory_space<vmem>>, vector<1x1x32xf32>
    %97 = vector.shape_cast %96 : vector<1x1x32xf32> to vector<1x32xf32>
    %98 = vector.broadcast %97 : vector<1x32xf32> to vector<8x32xf32>
    %99 = arith.addf %95, %98 : vector<8x32xf32>
    %100 = arith.negf %99 : vector<8x32xf32>
    %101 = math.exp %100 : vector<8x32xf32>
    %cst_75 = arith.constant 1.000000e+00 : f32
    %102 = vector.broadcast %cst_75 : f32 to vector<8x32xf32>
    %103 = arith.addf %102, %101 : vector<8x32xf32>
    %104 = arith.divf %102, %103 : vector<8x32xf32>
    %c2_76 = arith.constant 2 : index
    %c0_77 = arith.constant 0 : index
    %c0_78 = arith.constant 0 : index
    %105 = vector.load %arg6[%c2_76, %c0_77, %c0_78] : memref<4x8x32xf32, #tpu.memory_space<vmem>>, vector<1x8x32xf32>
    %106 = vector.shape_cast %105 : vector<1x8x32xf32> to vector<8x32xf32>
    %cst_79 = arith.constant dense<0.000000e+00> : vector<8x32xf32>
    %107 = tpu.matmul %72, %106, %cst_79 {dimension_numbers = #tpu.dot_dimension_numbers<[1], [0], [0], [1], [0, 0, 1, 1], [], []>} : vector<8x8xf32>, vector<8x32xf32>, vector<8x32xf32> -> vector<8x32xf32>
    %c2_80 = arith.constant 2 : index
    %c0_81 = arith.constant 0 : index
    %c0_82 = arith.constant 0 : index
    %108 = vector.load %arg7[%c2_80, %c0_81, %c0_82] : memref<4x8x32xf32, #tpu.memory_space<vmem>>, vector<1x8x32xf32>
    %109 = vector.shape_cast %108 : vector<1x8x32xf32> to vector<8x32xf32>
    %cst_83 = arith.constant dense<0.000000e+00> : vector<8x32xf32>
    %110 = tpu.matmul %2, %109, %cst_83 {dimension_numbers = #tpu.dot_dimension_numbers<[1], [0], [0], [1], [0, 0, 1, 1], [], []>} : vector<8x8xf32>, vector<8x32xf32>, vector<8x32xf32> -> vector<8x32xf32>
    %111 = arith.addf %107, %110 : vector<8x32xf32>
    %c2_84 = arith.constant 2 : index
    %c0_85 = arith.constant 0 : index
    %c0_86 = arith.constant 0 : index
    %112 = vector.load %arg8[%c2_84, %c0_85, %c0_86] : memref<4x1x32xf32, #tpu.memory_space<vmem>>, vector<1x1x32xf32>
    %113 = vector.shape_cast %112 : vector<1x1x32xf32> to vector<1x32xf32>
    %114 = vector.broadcast %113 : vector<1x32xf32> to vector<8x32xf32>
    %115 = arith.addf %111, %114 : vector<8x32xf32>
    %116 = math.tanh %115 : vector<8x32xf32>
    %c3_87 = arith.constant 3 : index
    %c0_88 = arith.constant 0 : index
    %c0_89 = arith.constant 0 : index
    %117 = vector.load %arg6[%c3_87, %c0_88, %c0_89] : memref<4x8x32xf32, #tpu.memory_space<vmem>>, vector<1x8x32xf32>
    %118 = vector.shape_cast %117 : vector<1x8x32xf32> to vector<8x32xf32>
    %cst_90 = arith.constant dense<0.000000e+00> : vector<8x32xf32>
    %119 = tpu.matmul %72, %118, %cst_90 {dimension_numbers = #tpu.dot_dimension_numbers<[1], [0], [0], [1], [0, 0, 1, 1], [], []>} : vector<8x8xf32>, vector<8x32xf32>, vector<8x32xf32> -> vector<8x32xf32>
    %c3_91 = arith.constant 3 : index
    %c0_92 = arith.constant 0 : index
    %c0_93 = arith.constant 0 : index
    %120 = vector.load %arg7[%c3_91, %c0_92, %c0_93] : memref<4x8x32xf32, #tpu.memory_space<vmem>>, vector<1x8x32xf32>
    %121 = vector.shape_cast %120 : vector<1x8x32xf32> to vector<8x32xf32>
    %cst_94 = arith.constant dense<0.000000e+00> : vector<8x32xf32>
    %122 = tpu.matmul %2, %121, %cst_94 {dimension_numbers = #tpu.dot_dimension_numbers<[1], [0], [0], [1], [0, 0, 1, 1], [], []>} : vector<8x8xf32>, vector<8x32xf32>, vector<8x32xf32> -> vector<8x32xf32>
    %123 = arith.addf %119, %122 : vector<8x32xf32>
    %c3_95 = arith.constant 3 : index
    %c0_96 = arith.constant 0 : index
    %c0_97 = arith.constant 0 : index
    %124 = vector.load %arg8[%c3_95, %c0_96, %c0_97] : memref<4x1x32xf32, #tpu.memory_space<vmem>>, vector<1x1x32xf32>
    %125 = vector.shape_cast %124 : vector<1x1x32xf32> to vector<1x32xf32>
    %126 = vector.broadcast %125 : vector<1x32xf32> to vector<8x32xf32>
    %127 = arith.addf %123, %126 : vector<8x32xf32>
    %128 = arith.negf %127 : vector<8x32xf32>
    %129 = math.exp %128 : vector<8x32xf32>
    %cst_98 = arith.constant 1.000000e+00 : f32
    %130 = vector.broadcast %cst_98 : f32 to vector<8x32xf32>
    %131 = arith.addf %130, %129 : vector<8x32xf32>
    %132 = arith.divf %130, %131 : vector<8x32xf32>
    %133 = arith.mulf %104, %3 : vector<8x32xf32>
    %134 = arith.mulf %88, %116 : vector<8x32xf32>
    %135 = arith.addf %133, %134 : vector<8x32xf32>
    %136 = math.tanh %135 : vector<8x32xf32>
    %137 = arith.mulf %132, %136 : vector<8x32xf32>
    %c0_99 = arith.constant 0 : index
    %c0_100 = arith.constant 0 : index
    %138 = vector.load %arg9[%c0_99, %c0_100] : memref<32x8xf32, #tpu.memory_space<vmem>>, vector<32x8xf32>
    %cst_101 = arith.constant dense<0.000000e+00> : vector<8x8xf32>
    %139 = tpu.matmul %137, %138, %cst_101 {dimension_numbers = #tpu.dot_dimension_numbers<[1], [0], [0], [1], [0, 0, 1, 1], [], []>} : vector<8x32xf32>, vector<32x8xf32>, vector<8x8xf32> -> vector<8x8xf32>
    %c1_102 = arith.constant 1 : index
    %c0_103 = arith.constant 0 : index
    %c0_104 = arith.constant 0 : index
    %140 = vector.load %arg1[%c1_102, %c0_103, %c0_104] : memref<8x8x4xf32, #tpu.memory_space<vmem>>, vector<1x8x4xf32>
    %141 = vector.shape_cast %140 : vector<1x8x4xf32> to vector<8x4xf32>
    %c0_105 = arith.constant 0 : index
    %c0_106 = arith.constant 0 : index
    %c0_107 = arith.constant 0 : index
    %142 = vector.load %arg2[%c0_105, %c0_106, %c0_107] : memref<4x4x32xf32, #tpu.memory_space<vmem>>, vector<1x4x32xf32>
    %143 = vector.shape_cast %142 : vector<1x4x32xf32> to vector<4x32xf32>
    %cst_108 = arith.constant dense<0.000000e+00> : vector<8x32xf32>
    %144 = tpu.matmul %141, %143, %cst_108 {dimension_numbers = #tpu.dot_dimension_numbers<[1], [0], [0], [1], [0, 0, 1, 1], [], []>} : vector<8x4xf32>, vector<4x32xf32>, vector<8x32xf32> -> vector<8x32xf32>
    %c0_109 = arith.constant 0 : index
    %c0_110 = arith.constant 0 : index
    %c0_111 = arith.constant 0 : index
    %145 = vector.load %arg3[%c0_109, %c0_110, %c0_111] : memref<4x8x32xf32, #tpu.memory_space<vmem>>, vector<1x8x32xf32>
    %146 = vector.shape_cast %145 : vector<1x8x32xf32> to vector<8x32xf32>
    %cst_112 = arith.constant dense<0.000000e+00> : vector<8x32xf32>
    %147 = tpu.matmul %72, %146, %cst_112 {dimension_numbers = #tpu.dot_dimension_numbers<[1], [0], [0], [1], [0, 0, 1, 1], [], []>} : vector<8x8xf32>, vector<8x32xf32>, vector<8x32xf32> -> vector<8x32xf32>
    %148 = arith.addf %144, %147 : vector<8x32xf32>
    %c0_113 = arith.constant 0 : index
    %c0_114 = arith.constant 0 : index
    %c0_115 = arith.constant 0 : index
    %149 = vector.load %arg4[%c0_113, %c0_114, %c0_115] : memref<4x1x32xf32, #tpu.memory_space<vmem>>, vector<1x1x32xf32>
    %150 = vector.shape_cast %149 : vector<1x1x32xf32> to vector<1x32xf32>
    %151 = vector.broadcast %150 : vector<1x32xf32> to vector<8x32xf32>
    %152 = arith.addf %148, %151 : vector<8x32xf32>
    %153 = arith.negf %152 : vector<8x32xf32>
    %154 = math.exp %153 : vector<8x32xf32>
    %cst_116 = arith.constant 1.000000e+00 : f32
    %155 = vector.broadcast %cst_116 : f32 to vector<8x32xf32>
    %156 = arith.addf %155, %154 : vector<8x32xf32>
    %157 = arith.divf %155, %156 : vector<8x32xf32>
    %c1_117 = arith.constant 1 : index
    %c0_118 = arith.constant 0 : index
    %c0_119 = arith.constant 0 : index
    %158 = vector.load %arg2[%c1_117, %c0_118, %c0_119] : memref<4x4x32xf32, #tpu.memory_space<vmem>>, vector<1x4x32xf32>
    %159 = vector.shape_cast %158 : vector<1x4x32xf32> to vector<4x32xf32>
    %cst_120 = arith.constant dense<0.000000e+00> : vector<8x32xf32>
    %160 = tpu.matmul %141, %159, %cst_120 {dimension_numbers = #tpu.dot_dimension_numbers<[1], [0], [0], [1], [0, 0, 1, 1], [], []>} : vector<8x4xf32>, vector<4x32xf32>, vector<8x32xf32> -> vector<8x32xf32>
    %c1_121 = arith.constant 1 : index
    %c0_122 = arith.constant 0 : index
    %c0_123 = arith.constant 0 : index
    %161 = vector.load %arg3[%c1_121, %c0_122, %c0_123] : memref<4x8x32xf32, #tpu.memory_space<vmem>>, vector<1x8x32xf32>
    %162 = vector.shape_cast %161 : vector<1x8x32xf32> to vector<8x32xf32>
    %cst_124 = arith.constant dense<0.000000e+00> : vector<8x32xf32>
    %163 = tpu.matmul %72, %162, %cst_124 {dimension_numbers = #tpu.dot_dimension_numbers<[1], [0], [0], [1], [0, 0, 1, 1], [], []>} : vector<8x8xf32>, vector<8x32xf32>, vector<8x32xf32> -> vector<8x32xf32>
    %164 = arith.addf %160, %163 : vector<8x32xf32>
    %c1_125 = arith.constant 1 : index
    %c0_126 = arith.constant 0 : index
    %c0_127 = arith.constant 0 : index
    %165 = vector.load %arg4[%c1_125, %c0_126, %c0_127] : memref<4x1x32xf32, #tpu.memory_space<vmem>>, vector<1x1x32xf32>
    %166 = vector.shape_cast %165 : vector<1x1x32xf32> to vector<1x32xf32>
    %167 = vector.broadcast %166 : vector<1x32xf32> to vector<8x32xf32>
    %168 = arith.addf %164, %167 : vector<8x32xf32>
    %169 = arith.negf %168 : vector<8x32xf32>
    %170 = math.exp %169 : vector<8x32xf32>
    %cst_128 = arith.constant 1.000000e+00 : f32
    %171 = vector.broadcast %cst_128 : f32 to vector<8x32xf32>
    %172 = arith.addf %171, %170 : vector<8x32xf32>
    %173 = arith.divf %171, %172 : vector<8x32xf32>
    %c2_129 = arith.constant 2 : index
    %c0_130 = arith.constant 0 : index
    %c0_131 = arith.constant 0 : index
    %174 = vector.load %arg2[%c2_129, %c0_130, %c0_131] : memref<4x4x32xf32, #tpu.memory_space<vmem>>, vector<1x4x32xf32>
    %175 = vector.shape_cast %174 : vector<1x4x32xf32> to vector<4x32xf32>
    %cst_132 = arith.constant dense<0.000000e+00> : vector<8x32xf32>
    %176 = tpu.matmul %141, %175, %cst_132 {dimension_numbers = #tpu.dot_dimension_numbers<[1], [0], [0], [1], [0, 0, 1, 1], [], []>} : vector<8x4xf32>, vector<4x32xf32>, vector<8x32xf32> -> vector<8x32xf32>
    %c2_133 = arith.constant 2 : index
    %c0_134 = arith.constant 0 : index
    %c0_135 = arith.constant 0 : index
    %177 = vector.load %arg3[%c2_133, %c0_134, %c0_135] : memref<4x8x32xf32, #tpu.memory_space<vmem>>, vector<1x8x32xf32>
    %178 = vector.shape_cast %177 : vector<1x8x32xf32> to vector<8x32xf32>
    %cst_136 = arith.constant dense<0.000000e+00> : vector<8x32xf32>
    %179 = tpu.matmul %72, %178, %cst_136 {dimension_numbers = #tpu.dot_dimension_numbers<[1], [0], [0], [1], [0, 0, 1, 1], [], []>} : vector<8x8xf32>, vector<8x32xf32>, vector<8x32xf32> -> vector<8x32xf32>
    %180 = arith.addf %176, %179 : vector<8x32xf32>
    %c2_137 = arith.constant 2 : index
    %c0_138 = arith.constant 0 : index
    %c0_139 = arith.constant 0 : index
    %181 = vector.load %arg4[%c2_137, %c0_138, %c0_139] : memref<4x1x32xf32, #tpu.memory_space<vmem>>, vector<1x1x32xf32>
    %182 = vector.shape_cast %181 : vector<1x1x32xf32> to vector<1x32xf32>
    %183 = vector.broadcast %182 : vector<1x32xf32> to vector<8x32xf32>
    %184 = arith.addf %180, %183 : vector<8x32xf32>
    %185 = math.tanh %184 : vector<8x32xf32>
    %c3_140 = arith.constant 3 : index
    %c0_141 = arith.constant 0 : index
    %c0_142 = arith.constant 0 : index
    %186 = vector.load %arg2[%c3_140, %c0_141, %c0_142] : memref<4x4x32xf32, #tpu.memory_space<vmem>>, vector<1x4x32xf32>
    %187 = vector.shape_cast %186 : vector<1x4x32xf32> to vector<4x32xf32>
    %cst_143 = arith.constant dense<0.000000e+00> : vector<8x32xf32>
    %188 = tpu.matmul %141, %187, %cst_143 {dimension_numbers = #tpu.dot_dimension_numbers<[1], [0], [0], [1], [0, 0, 1, 1], [], []>} : vector<8x4xf32>, vector<4x32xf32>, vector<8x32xf32> -> vector<8x32xf32>
    %c3_144 = arith.constant 3 : index
    %c0_145 = arith.constant 0 : index
    %c0_146 = arith.constant 0 : index
    %189 = vector.load %arg3[%c3_144, %c0_145, %c0_146] : memref<4x8x32xf32, #tpu.memory_space<vmem>>, vector<1x8x32xf32>
    %190 = vector.shape_cast %189 : vector<1x8x32xf32> to vector<8x32xf32>
    %cst_147 = arith.constant dense<0.000000e+00> : vector<8x32xf32>
    %191 = tpu.matmul %72, %190, %cst_147 {dimension_numbers = #tpu.dot_dimension_numbers<[1], [0], [0], [1], [0, 0, 1, 1], [], []>} : vector<8x8xf32>, vector<8x32xf32>, vector<8x32xf32> -> vector<8x32xf32>
    %192 = arith.addf %188, %191 : vector<8x32xf32>
    %c3_148 = arith.constant 3 : index
    %c0_149 = arith.constant 0 : index
    %c0_150 = arith.constant 0 : index
    %193 = vector.load %arg4[%c3_148, %c0_149, %c0_150] : memref<4x1x32xf32, #tpu.memory_space<vmem>>, vector<1x1x32xf32>
    %194 = vector.shape_cast %193 : vector<1x1x32xf32> to vector<1x32xf32>
    %195 = vector.broadcast %194 : vector<1x32xf32> to vector<8x32xf32>
    %196 = arith.addf %192, %195 : vector<8x32xf32>
    %197 = arith.negf %196 : vector<8x32xf32>
    %198 = math.exp %197 : vector<8x32xf32>
    %cst_151 = arith.constant 1.000000e+00 : f32
    %199 = vector.broadcast %cst_151 : f32 to vector<8x32xf32>
    %200 = arith.addf %199, %198 : vector<8x32xf32>
    %201 = arith.divf %199, %200 : vector<8x32xf32>
    %202 = arith.mulf %173, %68 : vector<8x32xf32>
    %203 = arith.mulf %157, %185 : vector<8x32xf32>
    %204 = arith.addf %202, %203 : vector<8x32xf32>
    %205 = math.tanh %204 : vector<8x32xf32>
    %206 = arith.mulf %201, %205 : vector<8x32xf32>
    %c0_152 = arith.constant 0 : index
    %c0_153 = arith.constant 0 : index
    %207 = vector.load %arg5[%c0_152, %c0_153] : memref<32x8xf32, #tpu.memory_space<vmem>>, vector<32x8xf32>
    %cst_154 = arith.constant dense<0.000000e+00> : vector<8x8xf32>
    %208 = tpu.matmul %206, %207, %cst_154 {dimension_numbers = #tpu.dot_dimension_numbers<[1], [0], [0], [1], [0, 0, 1, 1], [], []>} : vector<8x32xf32>, vector<32x8xf32>, vector<8x8xf32> -> vector<8x8xf32>
    %c0_155 = arith.constant 0 : index
    %c0_156 = arith.constant 0 : index
    %c0_157 = arith.constant 0 : index
    %209 = vector.load %arg6[%c0_155, %c0_156, %c0_157] : memref<4x8x32xf32, #tpu.memory_space<vmem>>, vector<1x8x32xf32>
    %210 = vector.shape_cast %209 : vector<1x8x32xf32> to vector<8x32xf32>
    %cst_158 = arith.constant dense<0.000000e+00> : vector<8x32xf32>
    %211 = tpu.matmul %208, %210, %cst_158 {dimension_numbers = #tpu.dot_dimension_numbers<[1], [0], [0], [1], [0, 0, 1, 1], [], []>} : vector<8x8xf32>, vector<8x32xf32>, vector<8x32xf32> -> vector<8x32xf32>
    %c0_159 = arith.constant 0 : index
    %c0_160 = arith.constant 0 : index
    %c0_161 = arith.constant 0 : index
    %212 = vector.load %arg7[%c0_159, %c0_160, %c0_161] : memref<4x8x32xf32, #tpu.memory_space<vmem>>, vector<1x8x32xf32>
    %213 = vector.shape_cast %212 : vector<1x8x32xf32> to vector<8x32xf32>
    %cst_162 = arith.constant dense<0.000000e+00> : vector<8x32xf32>
    %214 = tpu.matmul %139, %213, %cst_162 {dimension_numbers = #tpu.dot_dimension_numbers<[1], [0], [0], [1], [0, 0, 1, 1], [], []>} : vector<8x8xf32>, vector<8x32xf32>, vector<8x32xf32> -> vector<8x32xf32>
    %215 = arith.addf %211, %214 : vector<8x32xf32>
    %c0_163 = arith.constant 0 : index
    %c0_164 = arith.constant 0 : index
    %c0_165 = arith.constant 0 : index
    %216 = vector.load %arg8[%c0_163, %c0_164, %c0_165] : memref<4x1x32xf32, #tpu.memory_space<vmem>>, vector<1x1x32xf32>
    %217 = vector.shape_cast %216 : vector<1x1x32xf32> to vector<1x32xf32>
    %218 = vector.broadcast %217 : vector<1x32xf32> to vector<8x32xf32>
    %219 = arith.addf %215, %218 : vector<8x32xf32>
    %220 = arith.negf %219 : vector<8x32xf32>
    %221 = math.exp %220 : vector<8x32xf32>
    %cst_166 = arith.constant 1.000000e+00 : f32
    %222 = vector.broadcast %cst_166 : f32 to vector<8x32xf32>
    %223 = arith.addf %222, %221 : vector<8x32xf32>
    %224 = arith.divf %222, %223 : vector<8x32xf32>
    %c1_167 = arith.constant 1 : index
    %c0_168 = arith.constant 0 : index
    %c0_169 = arith.constant 0 : index
    %225 = vector.load %arg6[%c1_167, %c0_168, %c0_169] : memref<4x8x32xf32, #tpu.memory_space<vmem>>, vector<1x8x32xf32>
    %226 = vector.shape_cast %225 : vector<1x8x32xf32> to vector<8x32xf32>
    %cst_170 = arith.constant dense<0.000000e+00> : vector<8x32xf32>
    %227 = tpu.matmul %208, %226, %cst_170 {dimension_numbers = #tpu.dot_dimension_numbers<[1], [0], [0], [1], [0, 0, 1, 1], [], []>} : vector<8x8xf32>, vector<8x32xf32>, vector<8x32xf32> -> vector<8x32xf32>
    %c1_171 = arith.constant 1 : index
    %c0_172 = arith.constant 0 : index
    %c0_173 = arith.constant 0 : index
    %228 = vector.load %arg7[%c1_171, %c0_172, %c0_173] : memref<4x8x32xf32, #tpu.memory_space<vmem>>, vector<1x8x32xf32>
    %229 = vector.shape_cast %228 : vector<1x8x32xf32> to vector<8x32xf32>
    %cst_174 = arith.constant dense<0.000000e+00> : vector<8x32xf32>
    %230 = tpu.matmul %139, %229, %cst_174 {dimension_numbers = #tpu.dot_dimension_numbers<[1], [0], [0], [1], [0, 0, 1, 1], [], []>} : vector<8x8xf32>, vector<8x32xf32>, vector<8x32xf32> -> vector<8x32xf32>
    %231 = arith.addf %227, %230 : vector<8x32xf32>
    %c1_175 = arith.constant 1 : index
    %c0_176 = arith.constant 0 : index
    %c0_177 = arith.constant 0 : index
    %232 = vector.load %arg8[%c1_175, %c0_176, %c0_177] : memref<4x1x32xf32, #tpu.memory_space<vmem>>, vector<1x1x32xf32>
    %233 = vector.shape_cast %232 : vector<1x1x32xf32> to vector<1x32xf32>
    %234 = vector.broadcast %233 : vector<1x32xf32> to vector<8x32xf32>
    %235 = arith.addf %231, %234 : vector<8x32xf32>
    %236 = arith.negf %235 : vector<8x32xf32>
    %237 = math.exp %236 : vector<8x32xf32>
    %cst_178 = arith.constant 1.000000e+00 : f32
    %238 = vector.broadcast %cst_178 : f32 to vector<8x32xf32>
    %239 = arith.addf %238, %237 : vector<8x32xf32>
    %240 = arith.divf %238, %239 : vector<8x32xf32>
    %c2_179 = arith.constant 2 : index
    %c0_180 = arith.constant 0 : index
    %c0_181 = arith.constant 0 : index
    %241 = vector.load %arg6[%c2_179, %c0_180, %c0_181] : memref<4x8x32xf32, #tpu.memory_space<vmem>>, vector<1x8x32xf32>
    %242 = vector.shape_cast %241 : vector<1x8x32xf32> to vector<8x32xf32>
    %cst_182 = arith.constant dense<0.000000e+00> : vector<8x32xf32>
    %243 = tpu.matmul %208, %242, %cst_182 {dimension_numbers = #tpu.dot_dimension_numbers<[1], [0], [0], [1], [0, 0, 1, 1], [], []>} : vector<8x8xf32>, vector<8x32xf32>, vector<8x32xf32> -> vector<8x32xf32>
    %c2_183 = arith.constant 2 : index
    %c0_184 = arith.constant 0 : index
    %c0_185 = arith.constant 0 : index
    %244 = vector.load %arg7[%c2_183, %c0_184, %c0_185] : memref<4x8x32xf32, #tpu.memory_space<vmem>>, vector<1x8x32xf32>
    %245 = vector.shape_cast %244 : vector<1x8x32xf32> to vector<8x32xf32>
    %cst_186 = arith.constant dense<0.000000e+00> : vector<8x32xf32>
    %246 = tpu.matmul %139, %245, %cst_186 {dimension_numbers = #tpu.dot_dimension_numbers<[1], [0], [0], [1], [0, 0, 1, 1], [], []>} : vector<8x8xf32>, vector<8x32xf32>, vector<8x32xf32> -> vector<8x32xf32>
    %247 = arith.addf %243, %246 : vector<8x32xf32>
    %c2_187 = arith.constant 2 : index
    %c0_188 = arith.constant 0 : index
    %c0_189 = arith.constant 0 : index
    %248 = vector.load %arg8[%c2_187, %c0_188, %c0_189] : memref<4x1x32xf32, #tpu.memory_space<vmem>>, vector<1x1x32xf32>
    %249 = vector.shape_cast %248 : vector<1x1x32xf32> to vector<1x32xf32>
    %250 = vector.broadcast %249 : vector<1x32xf32> to vector<8x32xf32>
    %251 = arith.addf %247, %250 : vector<8x32xf32>
    %252 = math.tanh %251 : vector<8x32xf32>
    %c3_190 = arith.constant 3 : index
    %c0_191 = arith.constant 0 : index
    %c0_192 = arith.constant 0 : index
    %253 = vector.load %arg6[%c3_190, %c0_191, %c0_192] : memref<4x8x32xf32, #tpu.memory_space<vmem>>, vector<1x8x32xf32>
    %254 = vector.shape_cast %253 : vector<1x8x32xf32> to vector<8x32xf32>
    %cst_193 = arith.constant dense<0.000000e+00> : vector<8x32xf32>
    %255 = tpu.matmul %208, %254, %cst_193 {dimension_numbers = #tpu.dot_dimension_numbers<[1], [0], [0], [1], [0, 0, 1, 1], [], []>} : vector<8x8xf32>, vector<8x32xf32>, vector<8x32xf32> -> vector<8x32xf32>
    %c3_194 = arith.constant 3 : index
    %c0_195 = arith.constant 0 : index
    %c0_196 = arith.constant 0 : index
    %256 = vector.load %arg7[%c3_194, %c0_195, %c0_196] : memref<4x8x32xf32, #tpu.memory_space<vmem>>, vector<1x8x32xf32>
    %257 = vector.shape_cast %256 : vector<1x8x32xf32> to vector<8x32xf32>
    %cst_197 = arith.constant dense<0.000000e+00> : vector<8x32xf32>
    %258 = tpu.matmul %139, %257, %cst_197 {dimension_numbers = #tpu.dot_dimension_numbers<[1], [0], [0], [1], [0, 0, 1, 1], [], []>} : vector<8x8xf32>, vector<8x32xf32>, vector<8x32xf32> -> vector<8x32xf32>
    %259 = arith.addf %255, %258 : vector<8x32xf32>
    %c3_198 = arith.constant 3 : index
    %c0_199 = arith.constant 0 : index
    %c0_200 = arith.constant 0 : index
    %260 = vector.load %arg8[%c3_198, %c0_199, %c0_200] : memref<4x1x32xf32, #tpu.memory_space<vmem>>, vector<1x1x32xf32>
    %261 = vector.shape_cast %260 : vector<1x1x32xf32> to vector<1x32xf32>
    %262 = vector.broadcast %261 : vector<1x32xf32> to vector<8x32xf32>
    %263 = arith.addf %259, %262 : vector<8x32xf32>
    %264 = arith.negf %263 : vector<8x32xf32>
    %265 = math.exp %264 : vector<8x32xf32>
    %cst_201 = arith.constant 1.000000e+00 : f32
    %266 = vector.broadcast %cst_201 : f32 to vector<8x32xf32>
    %267 = arith.addf %266, %265 : vector<8x32xf32>
    %268 = arith.divf %266, %267 : vector<8x32xf32>
    %269 = arith.mulf %240, %135 : vector<8x32xf32>
    %270 = arith.mulf %224, %252 : vector<8x32xf32>
    %271 = arith.addf %269, %270 : vector<8x32xf32>
    %272 = math.tanh %271 : vector<8x32xf32>
    %273 = arith.mulf %268, %272 : vector<8x32xf32>
    %c0_202 = arith.constant 0 : index
    %c0_203 = arith.constant 0 : index
    %274 = vector.load %arg9[%c0_202, %c0_203] : memref<32x8xf32, #tpu.memory_space<vmem>>, vector<32x8xf32>
    %cst_204 = arith.constant dense<0.000000e+00> : vector<8x8xf32>
    %275 = tpu.matmul %273, %274, %cst_204 {dimension_numbers = #tpu.dot_dimension_numbers<[1], [0], [0], [1], [0, 0, 1, 1], [], []>} : vector<8x32xf32>, vector<32x8xf32>, vector<8x8xf32> -> vector<8x8xf32>
    %c2_205 = arith.constant 2 : index
    %c0_206 = arith.constant 0 : index
    %c0_207 = arith.constant 0 : index
    %276 = vector.load %arg1[%c2_205, %c0_206, %c0_207] : memref<8x8x4xf32, #tpu.memory_space<vmem>>, vector<1x8x4xf32>
    %277 = vector.shape_cast %276 : vector<1x8x4xf32> to vector<8x4xf32>
    %c0_208 = arith.constant 0 : index
    %c0_209 = arith.constant 0 : index
    %c0_210 = arith.constant 0 : index
    %278 = vector.load %arg2[%c0_208, %c0_209, %c0_210] : memref<4x4x32xf32, #tpu.memory_space<vmem>>, vector<1x4x32xf32>
    %279 = vector.shape_cast %278 : vector<1x4x32xf32> to vector<4x32xf32>
    %cst_211 = arith.constant dense<0.000000e+00> : vector<8x32xf32>
    %280 = tpu.matmul %277, %279, %cst_211 {dimension_numbers = #tpu.dot_dimension_numbers<[1], [0], [0], [1], [0, 0, 1, 1], [], []>} : vector<8x4xf32>, vector<4x32xf32>, vector<8x32xf32> -> vector<8x32xf32>
    %c0_212 = arith.constant 0 : index
    %c0_213 = arith.constant 0 : index
    %c0_214 = arith.constant 0 : index
    %281 = vector.load %arg3[%c0_212, %c0_213, %c0_214] : memref<4x8x32xf32, #tpu.memory_space<vmem>>, vector<1x8x32xf32>
    %282 = vector.shape_cast %281 : vector<1x8x32xf32> to vector<8x32xf32>
    %cst_215 = arith.constant dense<0.000000e+00> : vector<8x32xf32>
    %283 = tpu.matmul %208, %282, %cst_215 {dimension_numbers = #tpu.dot_dimension_numbers<[1], [0], [0], [1], [0, 0, 1, 1], [], []>} : vector<8x8xf32>, vector<8x32xf32>, vector<8x32xf32> -> vector<8x32xf32>
    %284 = arith.addf %280, %283 : vector<8x32xf32>
    %c0_216 = arith.constant 0 : index
    %c0_217 = arith.constant 0 : index
    %c0_218 = arith.constant 0 : index
    %285 = vector.load %arg4[%c0_216, %c0_217, %c0_218] : memref<4x1x32xf32, #tpu.memory_space<vmem>>, vector<1x1x32xf32>
    %286 = vector.shape_cast %285 : vector<1x1x32xf32> to vector<1x32xf32>
    %287 = vector.broadcast %286 : vector<1x32xf32> to vector<8x32xf32>
    %288 = arith.addf %284, %287 : vector<8x32xf32>
    %289 = arith.negf %288 : vector<8x32xf32>
    %290 = math.exp %289 : vector<8x32xf32>
    %cst_219 = arith.constant 1.000000e+00 : f32
    %291 = vector.broadcast %cst_219 : f32 to vector<8x32xf32>
    %292 = arith.addf %291, %290 : vector<8x32xf32>
    %293 = arith.divf %291, %292 : vector<8x32xf32>
    %c1_220 = arith.constant 1 : index
    %c0_221 = arith.constant 0 : index
    %c0_222 = arith.constant 0 : index
    %294 = vector.load %arg2[%c1_220, %c0_221, %c0_222] : memref<4x4x32xf32, #tpu.memory_space<vmem>>, vector<1x4x32xf32>
    %295 = vector.shape_cast %294 : vector<1x4x32xf32> to vector<4x32xf32>
    %cst_223 = arith.constant dense<0.000000e+00> : vector<8x32xf32>
    %296 = tpu.matmul %277, %295, %cst_223 {dimension_numbers = #tpu.dot_dimension_numbers<[1], [0], [0], [1], [0, 0, 1, 1], [], []>} : vector<8x4xf32>, vector<4x32xf32>, vector<8x32xf32> -> vector<8x32xf32>
    %c1_224 = arith.constant 1 : index
    %c0_225 = arith.constant 0 : index
    %c0_226 = arith.constant 0 : index
    %297 = vector.load %arg3[%c1_224, %c0_225, %c0_226] : memref<4x8x32xf32, #tpu.memory_space<vmem>>, vector<1x8x32xf32>
    %298 = vector.shape_cast %297 : vector<1x8x32xf32> to vector<8x32xf32>
    %cst_227 = arith.constant dense<0.000000e+00> : vector<8x32xf32>
    %299 = tpu.matmul %208, %298, %cst_227 {dimension_numbers = #tpu.dot_dimension_numbers<[1], [0], [0], [1], [0, 0, 1, 1], [], []>} : vector<8x8xf32>, vector<8x32xf32>, vector<8x32xf32> -> vector<8x32xf32>
    %300 = arith.addf %296, %299 : vector<8x32xf32>
    %c1_228 = arith.constant 1 : index
    %c0_229 = arith.constant 0 : index
    %c0_230 = arith.constant 0 : index
    %301 = vector.load %arg4[%c1_228, %c0_229, %c0_230] : memref<4x1x32xf32, #tpu.memory_space<vmem>>, vector<1x1x32xf32>
    %302 = vector.shape_cast %301 : vector<1x1x32xf32> to vector<1x32xf32>
    %303 = vector.broadcast %302 : vector<1x32xf32> to vector<8x32xf32>
    %304 = arith.addf %300, %303 : vector<8x32xf32>
    %305 = arith.negf %304 : vector<8x32xf32>
    %306 = math.exp %305 : vector<8x32xf32>
    %cst_231 = arith.constant 1.000000e+00 : f32
    %307 = vector.broadcast %cst_231 : f32 to vector<8x32xf32>
    %308 = arith.addf %307, %306 : vector<8x32xf32>
    %309 = arith.divf %307, %308 : vector<8x32xf32>
    %c2_232 = arith.constant 2 : index
    %c0_233 = arith.constant 0 : index
    %c0_234 = arith.constant 0 : index
    %310 = vector.load %arg2[%c2_232, %c0_233, %c0_234] : memref<4x4x32xf32, #tpu.memory_space<vmem>>, vector<1x4x32xf32>
    %311 = vector.shape_cast %310 : vector<1x4x32xf32> to vector<4x32xf32>
    %cst_235 = arith.constant dense<0.000000e+00> : vector<8x32xf32>
    %312 = tpu.matmul %277, %311, %cst_235 {dimension_numbers = #tpu.dot_dimension_numbers<[1], [0], [0], [1], [0, 0, 1, 1], [], []>} : vector<8x4xf32>, vector<4x32xf32>, vector<8x32xf32> -> vector<8x32xf32>
    %c2_236 = arith.constant 2 : index
    %c0_237 = arith.constant 0 : index
    %c0_238 = arith.constant 0 : index
    %313 = vector.load %arg3[%c2_236, %c0_237, %c0_238] : memref<4x8x32xf32, #tpu.memory_space<vmem>>, vector<1x8x32xf32>
    %314 = vector.shape_cast %313 : vector<1x8x32xf32> to vector<8x32xf32>
    %cst_239 = arith.constant dense<0.000000e+00> : vector<8x32xf32>
    %315 = tpu.matmul %208, %314, %cst_239 {dimension_numbers = #tpu.dot_dimension_numbers<[1], [0], [0], [1], [0, 0, 1, 1], [], []>} : vector<8x8xf32>, vector<8x32xf32>, vector<8x32xf32> -> vector<8x32xf32>
    %316 = arith.addf %312, %315 : vector<8x32xf32>
    %c2_240 = arith.constant 2 : index
    %c0_241 = arith.constant 0 : index
    %c0_242 = arith.constant 0 : index
    %317 = vector.load %arg4[%c2_240, %c0_241, %c0_242] : memref<4x1x32xf32, #tpu.memory_space<vmem>>, vector<1x1x32xf32>
    %318 = vector.shape_cast %317 : vector<1x1x32xf32> to vector<1x32xf32>
    %319 = vector.broadcast %318 : vector<1x32xf32> to vector<8x32xf32>
    %320 = arith.addf %316, %319 : vector<8x32xf32>
    %321 = math.tanh %320 : vector<8x32xf32>
    %c3_243 = arith.constant 3 : index
    %c0_244 = arith.constant 0 : index
    %c0_245 = arith.constant 0 : index
    %322 = vector.load %arg2[%c3_243, %c0_244, %c0_245] : memref<4x4x32xf32, #tpu.memory_space<vmem>>, vector<1x4x32xf32>
    %323 = vector.shape_cast %322 : vector<1x4x32xf32> to vector<4x32xf32>
    %cst_246 = arith.constant dense<0.000000e+00> : vector<8x32xf32>
    %324 = tpu.matmul %277, %323, %cst_246 {dimension_numbers = #tpu.dot_dimension_numbers<[1], [0], [0], [1], [0, 0, 1, 1], [], []>} : vector<8x4xf32>, vector<4x32xf32>, vector<8x32xf32> -> vector<8x32xf32>
    %c3_247 = arith.constant 3 : index
    %c0_248 = arith.constant 0 : index
    %c0_249 = arith.constant 0 : index
    %325 = vector.load %arg3[%c3_247, %c0_248, %c0_249] : memref<4x8x32xf32, #tpu.memory_space<vmem>>, vector<1x8x32xf32>
    %326 = vector.shape_cast %325 : vector<1x8x32xf32> to vector<8x32xf32>
    %cst_250 = arith.constant dense<0.000000e+00> : vector<8x32xf32>
    %327 = tpu.matmul %208, %326, %cst_250 {dimension_numbers = #tpu.dot_dimension_numbers<[1], [0], [0], [1], [0, 0, 1, 1], [], []>} : vector<8x8xf32>, vector<8x32xf32>, vector<8x32xf32> -> vector<8x32xf32>
    %328 = arith.addf %324, %327 : vector<8x32xf32>
    %c3_251 = arith.constant 3 : index
    %c0_252 = arith.constant 0 : index
    %c0_253 = arith.constant 0 : index
    %329 = vector.load %arg4[%c3_251, %c0_252, %c0_253] : memref<4x1x32xf32, #tpu.memory_space<vmem>>, vector<1x1x32xf32>
    %330 = vector.shape_cast %329 : vector<1x1x32xf32> to vector<1x32xf32>
    %331 = vector.broadcast %330 : vector<1x32xf32> to vector<8x32xf32>
    %332 = arith.addf %328, %331 : vector<8x32xf32>
    %333 = arith.negf %332 : vector<8x32xf32>
    %334 = math.exp %333 : vector<8x32xf32>
    %cst_254 = arith.constant 1.000000e+00 : f32
    %335 = vector.broadcast %cst_254 : f32 to vector<8x32xf32>
    %336 = arith.addf %335, %334 : vector<8x32xf32>
    %337 = arith.divf %335, %336 : vector<8x32xf32>
    %338 = arith.mulf %309, %204 : vector<8x32xf32>
    %339 = arith.mulf %293, %321 : vector<8x32xf32>
    %340 = arith.addf %338, %339 : vector<8x32xf32>
    %341 = math.tanh %340 : vector<8x32xf32>
    %342 = arith.mulf %337, %341 : vector<8x32xf32>
    %c0_255 = arith.constant 0 : index
    %c0_256 = arith.constant 0 : index
    %343 = vector.load %arg5[%c0_255, %c0_256] : memref<32x8xf32, #tpu.memory_space<vmem>>, vector<32x8xf32>
    %cst_257 = arith.constant dense<0.000000e+00> : vector<8x8xf32>
    %344 = tpu.matmul %342, %343, %cst_257 {dimension_numbers = #tpu.dot_dimension_numbers<[1], [0], [0], [1], [0, 0, 1, 1], [], []>} : vector<8x32xf32>, vector<32x8xf32>, vector<8x8xf32> -> vector<8x8xf32>
    %c0_258 = arith.constant 0 : index
    %c0_259 = arith.constant 0 : index
    %c0_260 = arith.constant 0 : index
    %345 = vector.load %arg6[%c0_258, %c0_259, %c0_260] : memref<4x8x32xf32, #tpu.memory_space<vmem>>, vector<1x8x32xf32>
    %346 = vector.shape_cast %345 : vector<1x8x32xf32> to vector<8x32xf32>
    %cst_261 = arith.constant dense<0.000000e+00> : vector<8x32xf32>
    %347 = tpu.matmul %344, %346, %cst_261 {dimension_numbers = #tpu.dot_dimension_numbers<[1], [0], [0], [1], [0, 0, 1, 1], [], []>} : vector<8x8xf32>, vector<8x32xf32>, vector<8x32xf32> -> vector<8x32xf32>
    %c0_262 = arith.constant 0 : index
    %c0_263 = arith.constant 0 : index
    %c0_264 = arith.constant 0 : index
    %348 = vector.load %arg7[%c0_262, %c0_263, %c0_264] : memref<4x8x32xf32, #tpu.memory_space<vmem>>, vector<1x8x32xf32>
    %349 = vector.shape_cast %348 : vector<1x8x32xf32> to vector<8x32xf32>
    %cst_265 = arith.constant dense<0.000000e+00> : vector<8x32xf32>
    %350 = tpu.matmul %275, %349, %cst_265 {dimension_numbers = #tpu.dot_dimension_numbers<[1], [0], [0], [1], [0, 0, 1, 1], [], []>} : vector<8x8xf32>, vector<8x32xf32>, vector<8x32xf32> -> vector<8x32xf32>
    %351 = arith.addf %347, %350 : vector<8x32xf32>
    %c0_266 = arith.constant 0 : index
    %c0_267 = arith.constant 0 : index
    %c0_268 = arith.constant 0 : index
    %352 = vector.load %arg8[%c0_266, %c0_267, %c0_268] : memref<4x1x32xf32, #tpu.memory_space<vmem>>, vector<1x1x32xf32>
    %353 = vector.shape_cast %352 : vector<1x1x32xf32> to vector<1x32xf32>
    %354 = vector.broadcast %353 : vector<1x32xf32> to vector<8x32xf32>
    %355 = arith.addf %351, %354 : vector<8x32xf32>
    %356 = arith.negf %355 : vector<8x32xf32>
    %357 = math.exp %356 : vector<8x32xf32>
    %cst_269 = arith.constant 1.000000e+00 : f32
    %358 = vector.broadcast %cst_269 : f32 to vector<8x32xf32>
    %359 = arith.addf %358, %357 : vector<8x32xf32>
    %360 = arith.divf %358, %359 : vector<8x32xf32>
    %c1_270 = arith.constant 1 : index
    %c0_271 = arith.constant 0 : index
    %c0_272 = arith.constant 0 : index
    %361 = vector.load %arg6[%c1_270, %c0_271, %c0_272] : memref<4x8x32xf32, #tpu.memory_space<vmem>>, vector<1x8x32xf32>
    %362 = vector.shape_cast %361 : vector<1x8x32xf32> to vector<8x32xf32>
    %cst_273 = arith.constant dense<0.000000e+00> : vector<8x32xf32>
    %363 = tpu.matmul %344, %362, %cst_273 {dimension_numbers = #tpu.dot_dimension_numbers<[1], [0], [0], [1], [0, 0, 1, 1], [], []>} : vector<8x8xf32>, vector<8x32xf32>, vector<8x32xf32> -> vector<8x32xf32>
    %c1_274 = arith.constant 1 : index
    %c0_275 = arith.constant 0 : index
    %c0_276 = arith.constant 0 : index
    %364 = vector.load %arg7[%c1_274, %c0_275, %c0_276] : memref<4x8x32xf32, #tpu.memory_space<vmem>>, vector<1x8x32xf32>
    %365 = vector.shape_cast %364 : vector<1x8x32xf32> to vector<8x32xf32>
    %cst_277 = arith.constant dense<0.000000e+00> : vector<8x32xf32>
    %366 = tpu.matmul %275, %365, %cst_277 {dimension_numbers = #tpu.dot_dimension_numbers<[1], [0], [0], [1], [0, 0, 1, 1], [], []>} : vector<8x8xf32>, vector<8x32xf32>, vector<8x32xf32> -> vector<8x32xf32>
    %367 = arith.addf %363, %366 : vector<8x32xf32>
    %c1_278 = arith.constant 1 : index
    %c0_279 = arith.constant 0 : index
    %c0_280 = arith.constant 0 : index
    %368 = vector.load %arg8[%c1_278, %c0_279, %c0_280] : memref<4x1x32xf32, #tpu.memory_space<vmem>>, vector<1x1x32xf32>
    %369 = vector.shape_cast %368 : vector<1x1x32xf32> to vector<1x32xf32>
    %370 = vector.broadcast %369 : vector<1x32xf32> to vector<8x32xf32>
    %371 = arith.addf %367, %370 : vector<8x32xf32>
    %372 = arith.negf %371 : vector<8x32xf32>
    %373 = math.exp %372 : vector<8x32xf32>
    %cst_281 = arith.constant 1.000000e+00 : f32
    %374 = vector.broadcast %cst_281 : f32 to vector<8x32xf32>
    %375 = arith.addf %374, %373 : vector<8x32xf32>
    %376 = arith.divf %374, %375 : vector<8x32xf32>
    %c2_282 = arith.constant 2 : index
    %c0_283 = arith.constant 0 : index
    %c0_284 = arith.constant 0 : index
    %377 = vector.load %arg6[%c2_282, %c0_283, %c0_284] : memref<4x8x32xf32, #tpu.memory_space<vmem>>, vector<1x8x32xf32>
    %378 = vector.shape_cast %377 : vector<1x8x32xf32> to vector<8x32xf32>
    %cst_285 = arith.constant dense<0.000000e+00> : vector<8x32xf32>
    %379 = tpu.matmul %344, %378, %cst_285 {dimension_numbers = #tpu.dot_dimension_numbers<[1], [0], [0], [1], [0, 0, 1, 1], [], []>} : vector<8x8xf32>, vector<8x32xf32>, vector<8x32xf32> -> vector<8x32xf32>
    %c2_286 = arith.constant 2 : index
    %c0_287 = arith.constant 0 : index
    %c0_288 = arith.constant 0 : index
    %380 = vector.load %arg7[%c2_286, %c0_287, %c0_288] : memref<4x8x32xf32, #tpu.memory_space<vmem>>, vector<1x8x32xf32>
    %381 = vector.shape_cast %380 : vector<1x8x32xf32> to vector<8x32xf32>
    %cst_289 = arith.constant dense<0.000000e+00> : vector<8x32xf32>
    %382 = tpu.matmul %275, %381, %cst_289 {dimension_numbers = #tpu.dot_dimension_numbers<[1], [0], [0], [1], [0, 0, 1, 1], [], []>} : vector<8x8xf32>, vector<8x32xf32>, vector<8x32xf32> -> vector<8x32xf32>
    %383 = arith.addf %379, %382 : vector<8x32xf32>
    %c2_290 = arith.constant 2 : index
    %c0_291 = arith.constant 0 : index
    %c0_292 = arith.constant 0 : index
    %384 = vector.load %arg8[%c2_290, %c0_291, %c0_292] : memref<4x1x32xf32, #tpu.memory_space<vmem>>, vector<1x1x32xf32>
    %385 = vector.shape_cast %384 : vector<1x1x32xf32> to vector<1x32xf32>
    %386 = vector.broadcast %385 : vector<1x32xf32> to vector<8x32xf32>
    %387 = arith.addf %383, %386 : vector<8x32xf32>
    %388 = math.tanh %387 : vector<8x32xf32>
    %c3_293 = arith.constant 3 : index
    %c0_294 = arith.constant 0 : index
    %c0_295 = arith.constant 0 : index
    %389 = vector.load %arg6[%c3_293, %c0_294, %c0_295] : memref<4x8x32xf32, #tpu.memory_space<vmem>>, vector<1x8x32xf32>
    %390 = vector.shape_cast %389 : vector<1x8x32xf32> to vector<8x32xf32>
    %cst_296 = arith.constant dense<0.000000e+00> : vector<8x32xf32>
    %391 = tpu.matmul %344, %390, %cst_296 {dimension_numbers = #tpu.dot_dimension_numbers<[1], [0], [0], [1], [0, 0, 1, 1], [], []>} : vector<8x8xf32>, vector<8x32xf32>, vector<8x32xf32> -> vector<8x32xf32>
    %c3_297 = arith.constant 3 : index
    %c0_298 = arith.constant 0 : index
    %c0_299 = arith.constant 0 : index
    %392 = vector.load %arg7[%c3_297, %c0_298, %c0_299] : memref<4x8x32xf32, #tpu.memory_space<vmem>>, vector<1x8x32xf32>
    %393 = vector.shape_cast %392 : vector<1x8x32xf32> to vector<8x32xf32>
    %cst_300 = arith.constant dense<0.000000e+00> : vector<8x32xf32>
    %394 = tpu.matmul %275, %393, %cst_300 {dimension_numbers = #tpu.dot_dimension_numbers<[1], [0], [0], [1], [0, 0, 1, 1], [], []>} : vector<8x8xf32>, vector<8x32xf32>, vector<8x32xf32> -> vector<8x32xf32>
    %395 = arith.addf %391, %394 : vector<8x32xf32>
    %c3_301 = arith.constant 3 : index
    %c0_302 = arith.constant 0 : index
    %c0_303 = arith.constant 0 : index
    %396 = vector.load %arg8[%c3_301, %c0_302, %c0_303] : memref<4x1x32xf32, #tpu.memory_space<vmem>>, vector<1x1x32xf32>
    %397 = vector.shape_cast %396 : vector<1x1x32xf32> to vector<1x32xf32>
    %398 = vector.broadcast %397 : vector<1x32xf32> to vector<8x32xf32>
    %399 = arith.addf %395, %398 : vector<8x32xf32>
    %400 = arith.negf %399 : vector<8x32xf32>
    %401 = math.exp %400 : vector<8x32xf32>
    %cst_304 = arith.constant 1.000000e+00 : f32
    %402 = vector.broadcast %cst_304 : f32 to vector<8x32xf32>
    %403 = arith.addf %402, %401 : vector<8x32xf32>
    %404 = arith.divf %402, %403 : vector<8x32xf32>
    %405 = arith.mulf %376, %271 : vector<8x32xf32>
    %406 = arith.mulf %360, %388 : vector<8x32xf32>
    %407 = arith.addf %405, %406 : vector<8x32xf32>
    %408 = math.tanh %407 : vector<8x32xf32>
    %409 = arith.mulf %404, %408 : vector<8x32xf32>
    %c0_305 = arith.constant 0 : index
    %c0_306 = arith.constant 0 : index
    %410 = vector.load %arg9[%c0_305, %c0_306] : memref<32x8xf32, #tpu.memory_space<vmem>>, vector<32x8xf32>
    %cst_307 = arith.constant dense<0.000000e+00> : vector<8x8xf32>
    %411 = tpu.matmul %409, %410, %cst_307 {dimension_numbers = #tpu.dot_dimension_numbers<[1], [0], [0], [1], [0, 0, 1, 1], [], []>} : vector<8x32xf32>, vector<32x8xf32>, vector<8x8xf32> -> vector<8x8xf32>
    %c3_308 = arith.constant 3 : index
    %c0_309 = arith.constant 0 : index
    %c0_310 = arith.constant 0 : index
    %412 = vector.load %arg1[%c3_308, %c0_309, %c0_310] : memref<8x8x4xf32, #tpu.memory_space<vmem>>, vector<1x8x4xf32>
    %413 = vector.shape_cast %412 : vector<1x8x4xf32> to vector<8x4xf32>
    %c0_311 = arith.constant 0 : index
    %c0_312 = arith.constant 0 : index
    %c0_313 = arith.constant 0 : index
    %414 = vector.load %arg2[%c0_311, %c0_312, %c0_313] : memref<4x4x32xf32, #tpu.memory_space<vmem>>, vector<1x4x32xf32>
    %415 = vector.shape_cast %414 : vector<1x4x32xf32> to vector<4x32xf32>
    %cst_314 = arith.constant dense<0.000000e+00> : vector<8x32xf32>
    %416 = tpu.matmul %413, %415, %cst_314 {dimension_numbers = #tpu.dot_dimension_numbers<[1], [0], [0], [1], [0, 0, 1, 1], [], []>} : vector<8x4xf32>, vector<4x32xf32>, vector<8x32xf32> -> vector<8x32xf32>
    %c0_315 = arith.constant 0 : index
    %c0_316 = arith.constant 0 : index
    %c0_317 = arith.constant 0 : index
    %417 = vector.load %arg3[%c0_315, %c0_316, %c0_317] : memref<4x8x32xf32, #tpu.memory_space<vmem>>, vector<1x8x32xf32>
    %418 = vector.shape_cast %417 : vector<1x8x32xf32> to vector<8x32xf32>
    %cst_318 = arith.constant dense<0.000000e+00> : vector<8x32xf32>
    %419 = tpu.matmul %344, %418, %cst_318 {dimension_numbers = #tpu.dot_dimension_numbers<[1], [0], [0], [1], [0, 0, 1, 1], [], []>} : vector<8x8xf32>, vector<8x32xf32>, vector<8x32xf32> -> vector<8x32xf32>
    %420 = arith.addf %416, %419 : vector<8x32xf32>
    %c0_319 = arith.constant 0 : index
    %c0_320 = arith.constant 0 : index
    %c0_321 = arith.constant 0 : index
    %421 = vector.load %arg4[%c0_319, %c0_320, %c0_321] : memref<4x1x32xf32, #tpu.memory_space<vmem>>, vector<1x1x32xf32>
    %422 = vector.shape_cast %421 : vector<1x1x32xf32> to vector<1x32xf32>
    %423 = vector.broadcast %422 : vector<1x32xf32> to vector<8x32xf32>
    %424 = arith.addf %420, %423 : vector<8x32xf32>
    %425 = arith.negf %424 : vector<8x32xf32>
    %426 = math.exp %425 : vector<8x32xf32>
    %cst_322 = arith.constant 1.000000e+00 : f32
    %427 = vector.broadcast %cst_322 : f32 to vector<8x32xf32>
    %428 = arith.addf %427, %426 : vector<8x32xf32>
    %429 = arith.divf %427, %428 : vector<8x32xf32>
    %c1_323 = arith.constant 1 : index
    %c0_324 = arith.constant 0 : index
    %c0_325 = arith.constant 0 : index
    %430 = vector.load %arg2[%c1_323, %c0_324, %c0_325] : memref<4x4x32xf32, #tpu.memory_space<vmem>>, vector<1x4x32xf32>
    %431 = vector.shape_cast %430 : vector<1x4x32xf32> to vector<4x32xf32>
    %cst_326 = arith.constant dense<0.000000e+00> : vector<8x32xf32>
    %432 = tpu.matmul %413, %431, %cst_326 {dimension_numbers = #tpu.dot_dimension_numbers<[1], [0], [0], [1], [0, 0, 1, 1], [], []>} : vector<8x4xf32>, vector<4x32xf32>, vector<8x32xf32> -> vector<8x32xf32>
    %c1_327 = arith.constant 1 : index
    %c0_328 = arith.constant 0 : index
    %c0_329 = arith.constant 0 : index
    %433 = vector.load %arg3[%c1_327, %c0_328, %c0_329] : memref<4x8x32xf32, #tpu.memory_space<vmem>>, vector<1x8x32xf32>
    %434 = vector.shape_cast %433 : vector<1x8x32xf32> to vector<8x32xf32>
    %cst_330 = arith.constant dense<0.000000e+00> : vector<8x32xf32>
    %435 = tpu.matmul %344, %434, %cst_330 {dimension_numbers = #tpu.dot_dimension_numbers<[1], [0], [0], [1], [0, 0, 1, 1], [], []>} : vector<8x8xf32>, vector<8x32xf32>, vector<8x32xf32> -> vector<8x32xf32>
    %436 = arith.addf %432, %435 : vector<8x32xf32>
    %c1_331 = arith.constant 1 : index
    %c0_332 = arith.constant 0 : index
    %c0_333 = arith.constant 0 : index
    %437 = vector.load %arg4[%c1_331, %c0_332, %c0_333] : memref<4x1x32xf32, #tpu.memory_space<vmem>>, vector<1x1x32xf32>
    %438 = vector.shape_cast %437 : vector<1x1x32xf32> to vector<1x32xf32>
    %439 = vector.broadcast %438 : vector<1x32xf32> to vector<8x32xf32>
    %440 = arith.addf %436, %439 : vector<8x32xf32>
    %441 = arith.negf %440 : vector<8x32xf32>
    %442 = math.exp %441 : vector<8x32xf32>
    %cst_334 = arith.constant 1.000000e+00 : f32
    %443 = vector.broadcast %cst_334 : f32 to vector<8x32xf32>
    %444 = arith.addf %443, %442 : vector<8x32xf32>
    %445 = arith.divf %443, %444 : vector<8x32xf32>
    %c2_335 = arith.constant 2 : index
    %c0_336 = arith.constant 0 : index
    %c0_337 = arith.constant 0 : index
    %446 = vector.load %arg2[%c2_335, %c0_336, %c0_337] : memref<4x4x32xf32, #tpu.memory_space<vmem>>, vector<1x4x32xf32>
    %447 = vector.shape_cast %446 : vector<1x4x32xf32> to vector<4x32xf32>
    %cst_338 = arith.constant dense<0.000000e+00> : vector<8x32xf32>
    %448 = tpu.matmul %413, %447, %cst_338 {dimension_numbers = #tpu.dot_dimension_numbers<[1], [0], [0], [1], [0, 0, 1, 1], [], []>} : vector<8x4xf32>, vector<4x32xf32>, vector<8x32xf32> -> vector<8x32xf32>
    %c2_339 = arith.constant 2 : index
    %c0_340 = arith.constant 0 : index
    %c0_341 = arith.constant 0 : index
    %449 = vector.load %arg3[%c2_339, %c0_340, %c0_341] : memref<4x8x32xf32, #tpu.memory_space<vmem>>, vector<1x8x32xf32>
    %450 = vector.shape_cast %449 : vector<1x8x32xf32> to vector<8x32xf32>
    %cst_342 = arith.constant dense<0.000000e+00> : vector<8x32xf32>
    %451 = tpu.matmul %344, %450, %cst_342 {dimension_numbers = #tpu.dot_dimension_numbers<[1], [0], [0], [1], [0, 0, 1, 1], [], []>} : vector<8x8xf32>, vector<8x32xf32>, vector<8x32xf32> -> vector<8x32xf32>
    %452 = arith.addf %448, %451 : vector<8x32xf32>
    %c2_343 = arith.constant 2 : index
    %c0_344 = arith.constant 0 : index
    %c0_345 = arith.constant 0 : index
    %453 = vector.load %arg4[%c2_343, %c0_344, %c0_345] : memref<4x1x32xf32, #tpu.memory_space<vmem>>, vector<1x1x32xf32>
    %454 = vector.shape_cast %453 : vector<1x1x32xf32> to vector<1x32xf32>
    %455 = vector.broadcast %454 : vector<1x32xf32> to vector<8x32xf32>
    %456 = arith.addf %452, %455 : vector<8x32xf32>
    %457 = math.tanh %456 : vector<8x32xf32>
    %c3_346 = arith.constant 3 : index
    %c0_347 = arith.constant 0 : index
    %c0_348 = arith.constant 0 : index
    %458 = vector.load %arg2[%c3_346, %c0_347, %c0_348] : memref<4x4x32xf32, #tpu.memory_space<vmem>>, vector<1x4x32xf32>
    %459 = vector.shape_cast %458 : vector<1x4x32xf32> to vector<4x32xf32>
    %cst_349 = arith.constant dense<0.000000e+00> : vector<8x32xf32>
    %460 = tpu.matmul %413, %459, %cst_349 {dimension_numbers = #tpu.dot_dimension_numbers<[1], [0], [0], [1], [0, 0, 1, 1], [], []>} : vector<8x4xf32>, vector<4x32xf32>, vector<8x32xf32> -> vector<8x32xf32>
    %c3_350 = arith.constant 3 : index
    %c0_351 = arith.constant 0 : index
    %c0_352 = arith.constant 0 : index
    %461 = vector.load %arg3[%c3_350, %c0_351, %c0_352] : memref<4x8x32xf32, #tpu.memory_space<vmem>>, vector<1x8x32xf32>
    %462 = vector.shape_cast %461 : vector<1x8x32xf32> to vector<8x32xf32>
    %cst_353 = arith.constant dense<0.000000e+00> : vector<8x32xf32>
    %463 = tpu.matmul %344, %462, %cst_353 {dimension_numbers = #tpu.dot_dimension_numbers<[1], [0], [0], [1], [0, 0, 1, 1], [], []>} : vector<8x8xf32>, vector<8x32xf32>, vector<8x32xf32> -> vector<8x32xf32>
    %464 = arith.addf %460, %463 : vector<8x32xf32>
    %c3_354 = arith.constant 3 : index
    %c0_355 = arith.constant 0 : index
    %c0_356 = arith.constant 0 : index
    %465 = vector.load %arg4[%c3_354, %c0_355, %c0_356] : memref<4x1x32xf32, #tpu.memory_space<vmem>>, vector<1x1x32xf32>
    %466 = vector.shape_cast %465 : vector<1x1x32xf32> to vector<1x32xf32>
    %467 = vector.broadcast %466 : vector<1x32xf32> to vector<8x32xf32>
    %468 = arith.addf %464, %467 : vector<8x32xf32>
    %469 = arith.negf %468 : vector<8x32xf32>
    %470 = math.exp %469 : vector<8x32xf32>
    %cst_357 = arith.constant 1.000000e+00 : f32
    %471 = vector.broadcast %cst_357 : f32 to vector<8x32xf32>
    %472 = arith.addf %471, %470 : vector<8x32xf32>
    %473 = arith.divf %471, %472 : vector<8x32xf32>
    %474 = arith.mulf %445, %340 : vector<8x32xf32>
    %475 = arith.mulf %429, %457 : vector<8x32xf32>
    %476 = arith.addf %474, %475 : vector<8x32xf32>
    %477 = math.tanh %476 : vector<8x32xf32>
    %478 = arith.mulf %473, %477 : vector<8x32xf32>
    %c0_358 = arith.constant 0 : index
    %c0_359 = arith.constant 0 : index
    %479 = vector.load %arg5[%c0_358, %c0_359] : memref<32x8xf32, #tpu.memory_space<vmem>>, vector<32x8xf32>
    %cst_360 = arith.constant dense<0.000000e+00> : vector<8x8xf32>
    %480 = tpu.matmul %478, %479, %cst_360 {dimension_numbers = #tpu.dot_dimension_numbers<[1], [0], [0], [1], [0, 0, 1, 1], [], []>} : vector<8x32xf32>, vector<32x8xf32>, vector<8x8xf32> -> vector<8x8xf32>
    %c0_361 = arith.constant 0 : index
    %c0_362 = arith.constant 0 : index
    %c0_363 = arith.constant 0 : index
    %481 = vector.load %arg6[%c0_361, %c0_362, %c0_363] : memref<4x8x32xf32, #tpu.memory_space<vmem>>, vector<1x8x32xf32>
    %482 = vector.shape_cast %481 : vector<1x8x32xf32> to vector<8x32xf32>
    %cst_364 = arith.constant dense<0.000000e+00> : vector<8x32xf32>
    %483 = tpu.matmul %480, %482, %cst_364 {dimension_numbers = #tpu.dot_dimension_numbers<[1], [0], [0], [1], [0, 0, 1, 1], [], []>} : vector<8x8xf32>, vector<8x32xf32>, vector<8x32xf32> -> vector<8x32xf32>
    %c0_365 = arith.constant 0 : index
    %c0_366 = arith.constant 0 : index
    %c0_367 = arith.constant 0 : index
    %484 = vector.load %arg7[%c0_365, %c0_366, %c0_367] : memref<4x8x32xf32, #tpu.memory_space<vmem>>, vector<1x8x32xf32>
    %485 = vector.shape_cast %484 : vector<1x8x32xf32> to vector<8x32xf32>
    %cst_368 = arith.constant dense<0.000000e+00> : vector<8x32xf32>
    %486 = tpu.matmul %411, %485, %cst_368 {dimension_numbers = #tpu.dot_dimension_numbers<[1], [0], [0], [1], [0, 0, 1, 1], [], []>} : vector<8x8xf32>, vector<8x32xf32>, vector<8x32xf32> -> vector<8x32xf32>
    %487 = arith.addf %483, %486 : vector<8x32xf32>
    %c0_369 = arith.constant 0 : index
    %c0_370 = arith.constant 0 : index
    %c0_371 = arith.constant 0 : index
    %488 = vector.load %arg8[%c0_369, %c0_370, %c0_371] : memref<4x1x32xf32, #tpu.memory_space<vmem>>, vector<1x1x32xf32>
    %489 = vector.shape_cast %488 : vector<1x1x32xf32> to vector<1x32xf32>
    %490 = vector.broadcast %489 : vector<1x32xf32> to vector<8x32xf32>
    %491 = arith.addf %487, %490 : vector<8x32xf32>
    %492 = arith.negf %491 : vector<8x32xf32>
    %493 = math.exp %492 : vector<8x32xf32>
    %cst_372 = arith.constant 1.000000e+00 : f32
    %494 = vector.broadcast %cst_372 : f32 to vector<8x32xf32>
    %495 = arith.addf %494, %493 : vector<8x32xf32>
    %496 = arith.divf %494, %495 : vector<8x32xf32>
    %c1_373 = arith.constant 1 : index
    %c0_374 = arith.constant 0 : index
    %c0_375 = arith.constant 0 : index
    %497 = vector.load %arg6[%c1_373, %c0_374, %c0_375] : memref<4x8x32xf32, #tpu.memory_space<vmem>>, vector<1x8x32xf32>
    %498 = vector.shape_cast %497 : vector<1x8x32xf32> to vector<8x32xf32>
    %cst_376 = arith.constant dense<0.000000e+00> : vector<8x32xf32>
    %499 = tpu.matmul %480, %498, %cst_376 {dimension_numbers = #tpu.dot_dimension_numbers<[1], [0], [0], [1], [0, 0, 1, 1], [], []>} : vector<8x8xf32>, vector<8x32xf32>, vector<8x32xf32> -> vector<8x32xf32>
    %c1_377 = arith.constant 1 : index
    %c0_378 = arith.constant 0 : index
    %c0_379 = arith.constant 0 : index
    %500 = vector.load %arg7[%c1_377, %c0_378, %c0_379] : memref<4x8x32xf32, #tpu.memory_space<vmem>>, vector<1x8x32xf32>
    %501 = vector.shape_cast %500 : vector<1x8x32xf32> to vector<8x32xf32>
    %cst_380 = arith.constant dense<0.000000e+00> : vector<8x32xf32>
    %502 = tpu.matmul %411, %501, %cst_380 {dimension_numbers = #tpu.dot_dimension_numbers<[1], [0], [0], [1], [0, 0, 1, 1], [], []>} : vector<8x8xf32>, vector<8x32xf32>, vector<8x32xf32> -> vector<8x32xf32>
    %503 = arith.addf %499, %502 : vector<8x32xf32>
    %c1_381 = arith.constant 1 : index
    %c0_382 = arith.constant 0 : index
    %c0_383 = arith.constant 0 : index
    %504 = vector.load %arg8[%c1_381, %c0_382, %c0_383] : memref<4x1x32xf32, #tpu.memory_space<vmem>>, vector<1x1x32xf32>
    %505 = vector.shape_cast %504 : vector<1x1x32xf32> to vector<1x32xf32>
    %506 = vector.broadcast %505 : vector<1x32xf32> to vector<8x32xf32>
    %507 = arith.addf %503, %506 : vector<8x32xf32>
    %508 = arith.negf %507 : vector<8x32xf32>
    %509 = math.exp %508 : vector<8x32xf32>
    %cst_384 = arith.constant 1.000000e+00 : f32
    %510 = vector.broadcast %cst_384 : f32 to vector<8x32xf32>
    %511 = arith.addf %510, %509 : vector<8x32xf32>
    %512 = arith.divf %510, %511 : vector<8x32xf32>
    %c2_385 = arith.constant 2 : index
    %c0_386 = arith.constant 0 : index
    %c0_387 = arith.constant 0 : index
    %513 = vector.load %arg6[%c2_385, %c0_386, %c0_387] : memref<4x8x32xf32, #tpu.memory_space<vmem>>, vector<1x8x32xf32>
    %514 = vector.shape_cast %513 : vector<1x8x32xf32> to vector<8x32xf32>
    %cst_388 = arith.constant dense<0.000000e+00> : vector<8x32xf32>
    %515 = tpu.matmul %480, %514, %cst_388 {dimension_numbers = #tpu.dot_dimension_numbers<[1], [0], [0], [1], [0, 0, 1, 1], [], []>} : vector<8x8xf32>, vector<8x32xf32>, vector<8x32xf32> -> vector<8x32xf32>
    %c2_389 = arith.constant 2 : index
    %c0_390 = arith.constant 0 : index
    %c0_391 = arith.constant 0 : index
    %516 = vector.load %arg7[%c2_389, %c0_390, %c0_391] : memref<4x8x32xf32, #tpu.memory_space<vmem>>, vector<1x8x32xf32>
    %517 = vector.shape_cast %516 : vector<1x8x32xf32> to vector<8x32xf32>
    %cst_392 = arith.constant dense<0.000000e+00> : vector<8x32xf32>
    %518 = tpu.matmul %411, %517, %cst_392 {dimension_numbers = #tpu.dot_dimension_numbers<[1], [0], [0], [1], [0, 0, 1, 1], [], []>} : vector<8x8xf32>, vector<8x32xf32>, vector<8x32xf32> -> vector<8x32xf32>
    %519 = arith.addf %515, %518 : vector<8x32xf32>
    %c2_393 = arith.constant 2 : index
    %c0_394 = arith.constant 0 : index
    %c0_395 = arith.constant 0 : index
    %520 = vector.load %arg8[%c2_393, %c0_394, %c0_395] : memref<4x1x32xf32, #tpu.memory_space<vmem>>, vector<1x1x32xf32>
    %521 = vector.shape_cast %520 : vector<1x1x32xf32> to vector<1x32xf32>
    %522 = vector.broadcast %521 : vector<1x32xf32> to vector<8x32xf32>
    %523 = arith.addf %519, %522 : vector<8x32xf32>
    %524 = math.tanh %523 : vector<8x32xf32>
    %c3_396 = arith.constant 3 : index
    %c0_397 = arith.constant 0 : index
    %c0_398 = arith.constant 0 : index
    %525 = vector.load %arg6[%c3_396, %c0_397, %c0_398] : memref<4x8x32xf32, #tpu.memory_space<vmem>>, vector<1x8x32xf32>
    %526 = vector.shape_cast %525 : vector<1x8x32xf32> to vector<8x32xf32>
    %cst_399 = arith.constant dense<0.000000e+00> : vector<8x32xf32>
    %527 = tpu.matmul %480, %526, %cst_399 {dimension_numbers = #tpu.dot_dimension_numbers<[1], [0], [0], [1], [0, 0, 1, 1], [], []>} : vector<8x8xf32>, vector<8x32xf32>, vector<8x32xf32> -> vector<8x32xf32>
    %c3_400 = arith.constant 3 : index
    %c0_401 = arith.constant 0 : index
    %c0_402 = arith.constant 0 : index
    %528 = vector.load %arg7[%c3_400, %c0_401, %c0_402] : memref<4x8x32xf32, #tpu.memory_space<vmem>>, vector<1x8x32xf32>
    %529 = vector.shape_cast %528 : vector<1x8x32xf32> to vector<8x32xf32>
    %cst_403 = arith.constant dense<0.000000e+00> : vector<8x32xf32>
    %530 = tpu.matmul %411, %529, %cst_403 {dimension_numbers = #tpu.dot_dimension_numbers<[1], [0], [0], [1], [0, 0, 1, 1], [], []>} : vector<8x8xf32>, vector<8x32xf32>, vector<8x32xf32> -> vector<8x32xf32>
    %531 = arith.addf %527, %530 : vector<8x32xf32>
    %c3_404 = arith.constant 3 : index
    %c0_405 = arith.constant 0 : index
    %c0_406 = arith.constant 0 : index
    %532 = vector.load %arg8[%c3_404, %c0_405, %c0_406] : memref<4x1x32xf32, #tpu.memory_space<vmem>>, vector<1x1x32xf32>
    %533 = vector.shape_cast %532 : vector<1x1x32xf32> to vector<1x32xf32>
    %534 = vector.broadcast %533 : vector<1x32xf32> to vector<8x32xf32>
    %535 = arith.addf %531, %534 : vector<8x32xf32>
    %536 = arith.negf %535 : vector<8x32xf32>
    %537 = math.exp %536 : vector<8x32xf32>
    %cst_407 = arith.constant 1.000000e+00 : f32
    %538 = vector.broadcast %cst_407 : f32 to vector<8x32xf32>
    %539 = arith.addf %538, %537 : vector<8x32xf32>
    %540 = arith.divf %538, %539 : vector<8x32xf32>
    %541 = arith.mulf %512, %407 : vector<8x32xf32>
    %542 = arith.mulf %496, %524 : vector<8x32xf32>
    %543 = arith.addf %541, %542 : vector<8x32xf32>
    %544 = math.tanh %543 : vector<8x32xf32>
    %545 = arith.mulf %540, %544 : vector<8x32xf32>
    %c0_408 = arith.constant 0 : index
    %c0_409 = arith.constant 0 : index
    %546 = vector.load %arg9[%c0_408, %c0_409] : memref<32x8xf32, #tpu.memory_space<vmem>>, vector<32x8xf32>
    %cst_410 = arith.constant dense<0.000000e+00> : vector<8x8xf32>
    %547 = tpu.matmul %545, %546, %cst_410 {dimension_numbers = #tpu.dot_dimension_numbers<[1], [0], [0], [1], [0, 0, 1, 1], [], []>} : vector<8x32xf32>, vector<32x8xf32>, vector<8x8xf32> -> vector<8x8xf32>
    %c4 = arith.constant 4 : index
    %c0_411 = arith.constant 0 : index
    %c0_412 = arith.constant 0 : index
    %548 = vector.load %arg1[%c4, %c0_411, %c0_412] : memref<8x8x4xf32, #tpu.memory_space<vmem>>, vector<1x8x4xf32>
    %549 = vector.shape_cast %548 : vector<1x8x4xf32> to vector<8x4xf32>
    %c0_413 = arith.constant 0 : index
    %c0_414 = arith.constant 0 : index
    %c0_415 = arith.constant 0 : index
    %550 = vector.load %arg2[%c0_413, %c0_414, %c0_415] : memref<4x4x32xf32, #tpu.memory_space<vmem>>, vector<1x4x32xf32>
    %551 = vector.shape_cast %550 : vector<1x4x32xf32> to vector<4x32xf32>
    %cst_416 = arith.constant dense<0.000000e+00> : vector<8x32xf32>
    %552 = tpu.matmul %549, %551, %cst_416 {dimension_numbers = #tpu.dot_dimension_numbers<[1], [0], [0], [1], [0, 0, 1, 1], [], []>} : vector<8x4xf32>, vector<4x32xf32>, vector<8x32xf32> -> vector<8x32xf32>
    %c0_417 = arith.constant 0 : index
    %c0_418 = arith.constant 0 : index
    %c0_419 = arith.constant 0 : index
    %553 = vector.load %arg3[%c0_417, %c0_418, %c0_419] : memref<4x8x32xf32, #tpu.memory_space<vmem>>, vector<1x8x32xf32>
    %554 = vector.shape_cast %553 : vector<1x8x32xf32> to vector<8x32xf32>
    %cst_420 = arith.constant dense<0.000000e+00> : vector<8x32xf32>
    %555 = tpu.matmul %480, %554, %cst_420 {dimension_numbers = #tpu.dot_dimension_numbers<[1], [0], [0], [1], [0, 0, 1, 1], [], []>} : vector<8x8xf32>, vector<8x32xf32>, vector<8x32xf32> -> vector<8x32xf32>
    %556 = arith.addf %552, %555 : vector<8x32xf32>
    %c0_421 = arith.constant 0 : index
    %c0_422 = arith.constant 0 : index
    %c0_423 = arith.constant 0 : index
    %557 = vector.load %arg4[%c0_421, %c0_422, %c0_423] : memref<4x1x32xf32, #tpu.memory_space<vmem>>, vector<1x1x32xf32>
    %558 = vector.shape_cast %557 : vector<1x1x32xf32> to vector<1x32xf32>
    %559 = vector.broadcast %558 : vector<1x32xf32> to vector<8x32xf32>
    %560 = arith.addf %556, %559 : vector<8x32xf32>
    %561 = arith.negf %560 : vector<8x32xf32>
    %562 = math.exp %561 : vector<8x32xf32>
    %cst_424 = arith.constant 1.000000e+00 : f32
    %563 = vector.broadcast %cst_424 : f32 to vector<8x32xf32>
    %564 = arith.addf %563, %562 : vector<8x32xf32>
    %565 = arith.divf %563, %564 : vector<8x32xf32>
    %c1_425 = arith.constant 1 : index
    %c0_426 = arith.constant 0 : index
    %c0_427 = arith.constant 0 : index
    %566 = vector.load %arg2[%c1_425, %c0_426, %c0_427] : memref<4x4x32xf32, #tpu.memory_space<vmem>>, vector<1x4x32xf32>
    %567 = vector.shape_cast %566 : vector<1x4x32xf32> to vector<4x32xf32>
    %cst_428 = arith.constant dense<0.000000e+00> : vector<8x32xf32>
    %568 = tpu.matmul %549, %567, %cst_428 {dimension_numbers = #tpu.dot_dimension_numbers<[1], [0], [0], [1], [0, 0, 1, 1], [], []>} : vector<8x4xf32>, vector<4x32xf32>, vector<8x32xf32> -> vector<8x32xf32>
    %c1_429 = arith.constant 1 : index
    %c0_430 = arith.constant 0 : index
    %c0_431 = arith.constant 0 : index
    %569 = vector.load %arg3[%c1_429, %c0_430, %c0_431] : memref<4x8x32xf32, #tpu.memory_space<vmem>>, vector<1x8x32xf32>
    %570 = vector.shape_cast %569 : vector<1x8x32xf32> to vector<8x32xf32>
    %cst_432 = arith.constant dense<0.000000e+00> : vector<8x32xf32>
    %571 = tpu.matmul %480, %570, %cst_432 {dimension_numbers = #tpu.dot_dimension_numbers<[1], [0], [0], [1], [0, 0, 1, 1], [], []>} : vector<8x8xf32>, vector<8x32xf32>, vector<8x32xf32> -> vector<8x32xf32>
    %572 = arith.addf %568, %571 : vector<8x32xf32>
    %c1_433 = arith.constant 1 : index
    %c0_434 = arith.constant 0 : index
    %c0_435 = arith.constant 0 : index
    %573 = vector.load %arg4[%c1_433, %c0_434, %c0_435] : memref<4x1x32xf32, #tpu.memory_space<vmem>>, vector<1x1x32xf32>
    %574 = vector.shape_cast %573 : vector<1x1x32xf32> to vector<1x32xf32>
    %575 = vector.broadcast %574 : vector<1x32xf32> to vector<8x32xf32>
    %576 = arith.addf %572, %575 : vector<8x32xf32>
    %577 = arith.negf %576 : vector<8x32xf32>
    %578 = math.exp %577 : vector<8x32xf32>
    %cst_436 = arith.constant 1.000000e+00 : f32
    %579 = vector.broadcast %cst_436 : f32 to vector<8x32xf32>
    %580 = arith.addf %579, %578 : vector<8x32xf32>
    %581 = arith.divf %579, %580 : vector<8x32xf32>
    %c2_437 = arith.constant 2 : index
    %c0_438 = arith.constant 0 : index
    %c0_439 = arith.constant 0 : index
    %582 = vector.load %arg2[%c2_437, %c0_438, %c0_439] : memref<4x4x32xf32, #tpu.memory_space<vmem>>, vector<1x4x32xf32>
    %583 = vector.shape_cast %582 : vector<1x4x32xf32> to vector<4x32xf32>
    %cst_440 = arith.constant dense<0.000000e+00> : vector<8x32xf32>
    %584 = tpu.matmul %549, %583, %cst_440 {dimension_numbers = #tpu.dot_dimension_numbers<[1], [0], [0], [1], [0, 0, 1, 1], [], []>} : vector<8x4xf32>, vector<4x32xf32>, vector<8x32xf32> -> vector<8x32xf32>
    %c2_441 = arith.constant 2 : index
    %c0_442 = arith.constant 0 : index
    %c0_443 = arith.constant 0 : index
    %585 = vector.load %arg3[%c2_441, %c0_442, %c0_443] : memref<4x8x32xf32, #tpu.memory_space<vmem>>, vector<1x8x32xf32>
    %586 = vector.shape_cast %585 : vector<1x8x32xf32> to vector<8x32xf32>
    %cst_444 = arith.constant dense<0.000000e+00> : vector<8x32xf32>
    %587 = tpu.matmul %480, %586, %cst_444 {dimension_numbers = #tpu.dot_dimension_numbers<[1], [0], [0], [1], [0, 0, 1, 1], [], []>} : vector<8x8xf32>, vector<8x32xf32>, vector<8x32xf32> -> vector<8x32xf32>
    %588 = arith.addf %584, %587 : vector<8x32xf32>
    %c2_445 = arith.constant 2 : index
    %c0_446 = arith.constant 0 : index
    %c0_447 = arith.constant 0 : index
    %589 = vector.load %arg4[%c2_445, %c0_446, %c0_447] : memref<4x1x32xf32, #tpu.memory_space<vmem>>, vector<1x1x32xf32>
    %590 = vector.shape_cast %589 : vector<1x1x32xf32> to vector<1x32xf32>
    %591 = vector.broadcast %590 : vector<1x32xf32> to vector<8x32xf32>
    %592 = arith.addf %588, %591 : vector<8x32xf32>
    %593 = math.tanh %592 : vector<8x32xf32>
    %c3_448 = arith.constant 3 : index
    %c0_449 = arith.constant 0 : index
    %c0_450 = arith.constant 0 : index
    %594 = vector.load %arg2[%c3_448, %c0_449, %c0_450] : memref<4x4x32xf32, #tpu.memory_space<vmem>>, vector<1x4x32xf32>
    %595 = vector.shape_cast %594 : vector<1x4x32xf32> to vector<4x32xf32>
    %cst_451 = arith.constant dense<0.000000e+00> : vector<8x32xf32>
    %596 = tpu.matmul %549, %595, %cst_451 {dimension_numbers = #tpu.dot_dimension_numbers<[1], [0], [0], [1], [0, 0, 1, 1], [], []>} : vector<8x4xf32>, vector<4x32xf32>, vector<8x32xf32> -> vector<8x32xf32>
    %c3_452 = arith.constant 3 : index
    %c0_453 = arith.constant 0 : index
    %c0_454 = arith.constant 0 : index
    %597 = vector.load %arg3[%c3_452, %c0_453, %c0_454] : memref<4x8x32xf32, #tpu.memory_space<vmem>>, vector<1x8x32xf32>
    %598 = vector.shape_cast %597 : vector<1x8x32xf32> to vector<8x32xf32>
    %cst_455 = arith.constant dense<0.000000e+00> : vector<8x32xf32>
    %599 = tpu.matmul %480, %598, %cst_455 {dimension_numbers = #tpu.dot_dimension_numbers<[1], [0], [0], [1], [0, 0, 1, 1], [], []>} : vector<8x8xf32>, vector<8x32xf32>, vector<8x32xf32> -> vector<8x32xf32>
    %600 = arith.addf %596, %599 : vector<8x32xf32>
    %c3_456 = arith.constant 3 : index
    %c0_457 = arith.constant 0 : index
    %c0_458 = arith.constant 0 : index
    %601 = vector.load %arg4[%c3_456, %c0_457, %c0_458] : memref<4x1x32xf32, #tpu.memory_space<vmem>>, vector<1x1x32xf32>
    %602 = vector.shape_cast %601 : vector<1x1x32xf32> to vector<1x32xf32>
    %603 = vector.broadcast %602 : vector<1x32xf32> to vector<8x32xf32>
    %604 = arith.addf %600, %603 : vector<8x32xf32>
    %605 = arith.negf %604 : vector<8x32xf32>
    %606 = math.exp %605 : vector<8x32xf32>
    %cst_459 = arith.constant 1.000000e+00 : f32
    %607 = vector.broadcast %cst_459 : f32 to vector<8x32xf32>
    %608 = arith.addf %607, %606 : vector<8x32xf32>
    %609 = arith.divf %607, %608 : vector<8x32xf32>
    %610 = arith.mulf %581, %476 : vector<8x32xf32>
    %611 = arith.mulf %565, %593 : vector<8x32xf32>
    %612 = arith.addf %610, %611 : vector<8x32xf32>
    %613 = math.tanh %612 : vector<8x32xf32>
    %614 = arith.mulf %609, %613 : vector<8x32xf32>
    %c0_460 = arith.constant 0 : index
    %c0_461 = arith.constant 0 : index
    %615 = vector.load %arg5[%c0_460, %c0_461] : memref<32x8xf32, #tpu.memory_space<vmem>>, vector<32x8xf32>
    %cst_462 = arith.constant dense<0.000000e+00> : vector<8x8xf32>
    %616 = tpu.matmul %614, %615, %cst_462 {dimension_numbers = #tpu.dot_dimension_numbers<[1], [0], [0], [1], [0, 0, 1, 1], [], []>} : vector<8x32xf32>, vector<32x8xf32>, vector<8x8xf32> -> vector<8x8xf32>
    %c0_463 = arith.constant 0 : index
    %c0_464 = arith.constant 0 : index
    %c0_465 = arith.constant 0 : index
    %617 = vector.load %arg6[%c0_463, %c0_464, %c0_465] : memref<4x8x32xf32, #tpu.memory_space<vmem>>, vector<1x8x32xf32>
    %618 = vector.shape_cast %617 : vector<1x8x32xf32> to vector<8x32xf32>
    %cst_466 = arith.constant dense<0.000000e+00> : vector<8x32xf32>
    %619 = tpu.matmul %616, %618, %cst_466 {dimension_numbers = #tpu.dot_dimension_numbers<[1], [0], [0], [1], [0, 0, 1, 1], [], []>} : vector<8x8xf32>, vector<8x32xf32>, vector<8x32xf32> -> vector<8x32xf32>
    %c0_467 = arith.constant 0 : index
    %c0_468 = arith.constant 0 : index
    %c0_469 = arith.constant 0 : index
    %620 = vector.load %arg7[%c0_467, %c0_468, %c0_469] : memref<4x8x32xf32, #tpu.memory_space<vmem>>, vector<1x8x32xf32>
    %621 = vector.shape_cast %620 : vector<1x8x32xf32> to vector<8x32xf32>
    %cst_470 = arith.constant dense<0.000000e+00> : vector<8x32xf32>
    %622 = tpu.matmul %547, %621, %cst_470 {dimension_numbers = #tpu.dot_dimension_numbers<[1], [0], [0], [1], [0, 0, 1, 1], [], []>} : vector<8x8xf32>, vector<8x32xf32>, vector<8x32xf32> -> vector<8x32xf32>
    %623 = arith.addf %619, %622 : vector<8x32xf32>
    %c0_471 = arith.constant 0 : index
    %c0_472 = arith.constant 0 : index
    %c0_473 = arith.constant 0 : index
    %624 = vector.load %arg8[%c0_471, %c0_472, %c0_473] : memref<4x1x32xf32, #tpu.memory_space<vmem>>, vector<1x1x32xf32>
    %625 = vector.shape_cast %624 : vector<1x1x32xf32> to vector<1x32xf32>
    %626 = vector.broadcast %625 : vector<1x32xf32> to vector<8x32xf32>
    %627 = arith.addf %623, %626 : vector<8x32xf32>
    %628 = arith.negf %627 : vector<8x32xf32>
    %629 = math.exp %628 : vector<8x32xf32>
    %cst_474 = arith.constant 1.000000e+00 : f32
    %630 = vector.broadcast %cst_474 : f32 to vector<8x32xf32>
    %631 = arith.addf %630, %629 : vector<8x32xf32>
    %632 = arith.divf %630, %631 : vector<8x32xf32>
    %c1_475 = arith.constant 1 : index
    %c0_476 = arith.constant 0 : index
    %c0_477 = arith.constant 0 : index
    %633 = vector.load %arg6[%c1_475, %c0_476, %c0_477] : memref<4x8x32xf32, #tpu.memory_space<vmem>>, vector<1x8x32xf32>
    %634 = vector.shape_cast %633 : vector<1x8x32xf32> to vector<8x32xf32>
    %cst_478 = arith.constant dense<0.000000e+00> : vector<8x32xf32>
    %635 = tpu.matmul %616, %634, %cst_478 {dimension_numbers = #tpu.dot_dimension_numbers<[1], [0], [0], [1], [0, 0, 1, 1], [], []>} : vector<8x8xf32>, vector<8x32xf32>, vector<8x32xf32> -> vector<8x32xf32>
    %c1_479 = arith.constant 1 : index
    %c0_480 = arith.constant 0 : index
    %c0_481 = arith.constant 0 : index
    %636 = vector.load %arg7[%c1_479, %c0_480, %c0_481] : memref<4x8x32xf32, #tpu.memory_space<vmem>>, vector<1x8x32xf32>
    %637 = vector.shape_cast %636 : vector<1x8x32xf32> to vector<8x32xf32>
    %cst_482 = arith.constant dense<0.000000e+00> : vector<8x32xf32>
    %638 = tpu.matmul %547, %637, %cst_482 {dimension_numbers = #tpu.dot_dimension_numbers<[1], [0], [0], [1], [0, 0, 1, 1], [], []>} : vector<8x8xf32>, vector<8x32xf32>, vector<8x32xf32> -> vector<8x32xf32>
    %639 = arith.addf %635, %638 : vector<8x32xf32>
    %c1_483 = arith.constant 1 : index
    %c0_484 = arith.constant 0 : index
    %c0_485 = arith.constant 0 : index
    %640 = vector.load %arg8[%c1_483, %c0_484, %c0_485] : memref<4x1x32xf32, #tpu.memory_space<vmem>>, vector<1x1x32xf32>
    %641 = vector.shape_cast %640 : vector<1x1x32xf32> to vector<1x32xf32>
    %642 = vector.broadcast %641 : vector<1x32xf32> to vector<8x32xf32>
    %643 = arith.addf %639, %642 : vector<8x32xf32>
    %644 = arith.negf %643 : vector<8x32xf32>
    %645 = math.exp %644 : vector<8x32xf32>
    %cst_486 = arith.constant 1.000000e+00 : f32
    %646 = vector.broadcast %cst_486 : f32 to vector<8x32xf32>
    %647 = arith.addf %646, %645 : vector<8x32xf32>
    %648 = arith.divf %646, %647 : vector<8x32xf32>
    %c2_487 = arith.constant 2 : index
    %c0_488 = arith.constant 0 : index
    %c0_489 = arith.constant 0 : index
    %649 = vector.load %arg6[%c2_487, %c0_488, %c0_489] : memref<4x8x32xf32, #tpu.memory_space<vmem>>, vector<1x8x32xf32>
    %650 = vector.shape_cast %649 : vector<1x8x32xf32> to vector<8x32xf32>
    %cst_490 = arith.constant dense<0.000000e+00> : vector<8x32xf32>
    %651 = tpu.matmul %616, %650, %cst_490 {dimension_numbers = #tpu.dot_dimension_numbers<[1], [0], [0], [1], [0, 0, 1, 1], [], []>} : vector<8x8xf32>, vector<8x32xf32>, vector<8x32xf32> -> vector<8x32xf32>
    %c2_491 = arith.constant 2 : index
    %c0_492 = arith.constant 0 : index
    %c0_493 = arith.constant 0 : index
    %652 = vector.load %arg7[%c2_491, %c0_492, %c0_493] : memref<4x8x32xf32, #tpu.memory_space<vmem>>, vector<1x8x32xf32>
    %653 = vector.shape_cast %652 : vector<1x8x32xf32> to vector<8x32xf32>
    %cst_494 = arith.constant dense<0.000000e+00> : vector<8x32xf32>
    %654 = tpu.matmul %547, %653, %cst_494 {dimension_numbers = #tpu.dot_dimension_numbers<[1], [0], [0], [1], [0, 0, 1, 1], [], []>} : vector<8x8xf32>, vector<8x32xf32>, vector<8x32xf32> -> vector<8x32xf32>
    %655 = arith.addf %651, %654 : vector<8x32xf32>
    %c2_495 = arith.constant 2 : index
    %c0_496 = arith.constant 0 : index
    %c0_497 = arith.constant 0 : index
    %656 = vector.load %arg8[%c2_495, %c0_496, %c0_497] : memref<4x1x32xf32, #tpu.memory_space<vmem>>, vector<1x1x32xf32>
    %657 = vector.shape_cast %656 : vector<1x1x32xf32> to vector<1x32xf32>
    %658 = vector.broadcast %657 : vector<1x32xf32> to vector<8x32xf32>
    %659 = arith.addf %655, %658 : vector<8x32xf32>
    %660 = math.tanh %659 : vector<8x32xf32>
    %c3_498 = arith.constant 3 : index
    %c0_499 = arith.constant 0 : index
    %c0_500 = arith.constant 0 : index
    %661 = vector.load %arg6[%c3_498, %c0_499, %c0_500] : memref<4x8x32xf32, #tpu.memory_space<vmem>>, vector<1x8x32xf32>
    %662 = vector.shape_cast %661 : vector<1x8x32xf32> to vector<8x32xf32>
    %cst_501 = arith.constant dense<0.000000e+00> : vector<8x32xf32>
    %663 = tpu.matmul %616, %662, %cst_501 {dimension_numbers = #tpu.dot_dimension_numbers<[1], [0], [0], [1], [0, 0, 1, 1], [], []>} : vector<8x8xf32>, vector<8x32xf32>, vector<8x32xf32> -> vector<8x32xf32>
    %c3_502 = arith.constant 3 : index
    %c0_503 = arith.constant 0 : index
    %c0_504 = arith.constant 0 : index
    %664 = vector.load %arg7[%c3_502, %c0_503, %c0_504] : memref<4x8x32xf32, #tpu.memory_space<vmem>>, vector<1x8x32xf32>
    %665 = vector.shape_cast %664 : vector<1x8x32xf32> to vector<8x32xf32>
    %cst_505 = arith.constant dense<0.000000e+00> : vector<8x32xf32>
    %666 = tpu.matmul %547, %665, %cst_505 {dimension_numbers = #tpu.dot_dimension_numbers<[1], [0], [0], [1], [0, 0, 1, 1], [], []>} : vector<8x8xf32>, vector<8x32xf32>, vector<8x32xf32> -> vector<8x32xf32>
    %667 = arith.addf %663, %666 : vector<8x32xf32>
    %c3_506 = arith.constant 3 : index
    %c0_507 = arith.constant 0 : index
    %c0_508 = arith.constant 0 : index
    %668 = vector.load %arg8[%c3_506, %c0_507, %c0_508] : memref<4x1x32xf32, #tpu.memory_space<vmem>>, vector<1x1x32xf32>
    %669 = vector.shape_cast %668 : vector<1x1x32xf32> to vector<1x32xf32>
    %670 = vector.broadcast %669 : vector<1x32xf32> to vector<8x32xf32>
    %671 = arith.addf %667, %670 : vector<8x32xf32>
    %672 = arith.negf %671 : vector<8x32xf32>
    %673 = math.exp %672 : vector<8x32xf32>
    %cst_509 = arith.constant 1.000000e+00 : f32
    %674 = vector.broadcast %cst_509 : f32 to vector<8x32xf32>
    %675 = arith.addf %674, %673 : vector<8x32xf32>
    %676 = arith.divf %674, %675 : vector<8x32xf32>
    %677 = arith.mulf %648, %543 : vector<8x32xf32>
    %678 = arith.mulf %632, %660 : vector<8x32xf32>
    %679 = arith.addf %677, %678 : vector<8x32xf32>
    %680 = math.tanh %679 : vector<8x32xf32>
    %681 = arith.mulf %676, %680 : vector<8x32xf32>
    %c0_510 = arith.constant 0 : index
    %c0_511 = arith.constant 0 : index
    %682 = vector.load %arg9[%c0_510, %c0_511] : memref<32x8xf32, #tpu.memory_space<vmem>>, vector<32x8xf32>
    %cst_512 = arith.constant dense<0.000000e+00> : vector<8x8xf32>
    %683 = tpu.matmul %681, %682, %cst_512 {dimension_numbers = #tpu.dot_dimension_numbers<[1], [0], [0], [1], [0, 0, 1, 1], [], []>} : vector<8x32xf32>, vector<32x8xf32>, vector<8x8xf32> -> vector<8x8xf32>
    %c5 = arith.constant 5 : index
    %c0_513 = arith.constant 0 : index
    %c0_514 = arith.constant 0 : index
    %684 = vector.load %arg1[%c5, %c0_513, %c0_514] : memref<8x8x4xf32, #tpu.memory_space<vmem>>, vector<1x8x4xf32>
    %685 = vector.shape_cast %684 : vector<1x8x4xf32> to vector<8x4xf32>
    %c0_515 = arith.constant 0 : index
    %c0_516 = arith.constant 0 : index
    %c0_517 = arith.constant 0 : index
    %686 = vector.load %arg2[%c0_515, %c0_516, %c0_517] : memref<4x4x32xf32, #tpu.memory_space<vmem>>, vector<1x4x32xf32>
    %687 = vector.shape_cast %686 : vector<1x4x32xf32> to vector<4x32xf32>
    %cst_518 = arith.constant dense<0.000000e+00> : vector<8x32xf32>
    %688 = tpu.matmul %685, %687, %cst_518 {dimension_numbers = #tpu.dot_dimension_numbers<[1], [0], [0], [1], [0, 0, 1, 1], [], []>} : vector<8x4xf32>, vector<4x32xf32>, vector<8x32xf32> -> vector<8x32xf32>
    %c0_519 = arith.constant 0 : index
    %c0_520 = arith.constant 0 : index
    %c0_521 = arith.constant 0 : index
    %689 = vector.load %arg3[%c0_519, %c0_520, %c0_521] : memref<4x8x32xf32, #tpu.memory_space<vmem>>, vector<1x8x32xf32>
    %690 = vector.shape_cast %689 : vector<1x8x32xf32> to vector<8x32xf32>
    %cst_522 = arith.constant dense<0.000000e+00> : vector<8x32xf32>
    %691 = tpu.matmul %616, %690, %cst_522 {dimension_numbers = #tpu.dot_dimension_numbers<[1], [0], [0], [1], [0, 0, 1, 1], [], []>} : vector<8x8xf32>, vector<8x32xf32>, vector<8x32xf32> -> vector<8x32xf32>
    %692 = arith.addf %688, %691 : vector<8x32xf32>
    %c0_523 = arith.constant 0 : index
    %c0_524 = arith.constant 0 : index
    %c0_525 = arith.constant 0 : index
    %693 = vector.load %arg4[%c0_523, %c0_524, %c0_525] : memref<4x1x32xf32, #tpu.memory_space<vmem>>, vector<1x1x32xf32>
    %694 = vector.shape_cast %693 : vector<1x1x32xf32> to vector<1x32xf32>
    %695 = vector.broadcast %694 : vector<1x32xf32> to vector<8x32xf32>
    %696 = arith.addf %692, %695 : vector<8x32xf32>
    %697 = arith.negf %696 : vector<8x32xf32>
    %698 = math.exp %697 : vector<8x32xf32>
    %cst_526 = arith.constant 1.000000e+00 : f32
    %699 = vector.broadcast %cst_526 : f32 to vector<8x32xf32>
    %700 = arith.addf %699, %698 : vector<8x32xf32>
    %701 = arith.divf %699, %700 : vector<8x32xf32>
    %c1_527 = arith.constant 1 : index
    %c0_528 = arith.constant 0 : index
    %c0_529 = arith.constant 0 : index
    %702 = vector.load %arg2[%c1_527, %c0_528, %c0_529] : memref<4x4x32xf32, #tpu.memory_space<vmem>>, vector<1x4x32xf32>
    %703 = vector.shape_cast %702 : vector<1x4x32xf32> to vector<4x32xf32>
    %cst_530 = arith.constant dense<0.000000e+00> : vector<8x32xf32>
    %704 = tpu.matmul %685, %703, %cst_530 {dimension_numbers = #tpu.dot_dimension_numbers<[1], [0], [0], [1], [0, 0, 1, 1], [], []>} : vector<8x4xf32>, vector<4x32xf32>, vector<8x32xf32> -> vector<8x32xf32>
    %c1_531 = arith.constant 1 : index
    %c0_532 = arith.constant 0 : index
    %c0_533 = arith.constant 0 : index
    %705 = vector.load %arg3[%c1_531, %c0_532, %c0_533] : memref<4x8x32xf32, #tpu.memory_space<vmem>>, vector<1x8x32xf32>
    %706 = vector.shape_cast %705 : vector<1x8x32xf32> to vector<8x32xf32>
    %cst_534 = arith.constant dense<0.000000e+00> : vector<8x32xf32>
    %707 = tpu.matmul %616, %706, %cst_534 {dimension_numbers = #tpu.dot_dimension_numbers<[1], [0], [0], [1], [0, 0, 1, 1], [], []>} : vector<8x8xf32>, vector<8x32xf32>, vector<8x32xf32> -> vector<8x32xf32>
    %708 = arith.addf %704, %707 : vector<8x32xf32>
    %c1_535 = arith.constant 1 : index
    %c0_536 = arith.constant 0 : index
    %c0_537 = arith.constant 0 : index
    %709 = vector.load %arg4[%c1_535, %c0_536, %c0_537] : memref<4x1x32xf32, #tpu.memory_space<vmem>>, vector<1x1x32xf32>
    %710 = vector.shape_cast %709 : vector<1x1x32xf32> to vector<1x32xf32>
    %711 = vector.broadcast %710 : vector<1x32xf32> to vector<8x32xf32>
    %712 = arith.addf %708, %711 : vector<8x32xf32>
    %713 = arith.negf %712 : vector<8x32xf32>
    %714 = math.exp %713 : vector<8x32xf32>
    %cst_538 = arith.constant 1.000000e+00 : f32
    %715 = vector.broadcast %cst_538 : f32 to vector<8x32xf32>
    %716 = arith.addf %715, %714 : vector<8x32xf32>
    %717 = arith.divf %715, %716 : vector<8x32xf32>
    %c2_539 = arith.constant 2 : index
    %c0_540 = arith.constant 0 : index
    %c0_541 = arith.constant 0 : index
    %718 = vector.load %arg2[%c2_539, %c0_540, %c0_541] : memref<4x4x32xf32, #tpu.memory_space<vmem>>, vector<1x4x32xf32>
    %719 = vector.shape_cast %718 : vector<1x4x32xf32> to vector<4x32xf32>
    %cst_542 = arith.constant dense<0.000000e+00> : vector<8x32xf32>
    %720 = tpu.matmul %685, %719, %cst_542 {dimension_numbers = #tpu.dot_dimension_numbers<[1], [0], [0], [1], [0, 0, 1, 1], [], []>} : vector<8x4xf32>, vector<4x32xf32>, vector<8x32xf32> -> vector<8x32xf32>
    %c2_543 = arith.constant 2 : index
    %c0_544 = arith.constant 0 : index
    %c0_545 = arith.constant 0 : index
    %721 = vector.load %arg3[%c2_543, %c0_544, %c0_545] : memref<4x8x32xf32, #tpu.memory_space<vmem>>, vector<1x8x32xf32>
    %722 = vector.shape_cast %721 : vector<1x8x32xf32> to vector<8x32xf32>
    %cst_546 = arith.constant dense<0.000000e+00> : vector<8x32xf32>
    %723 = tpu.matmul %616, %722, %cst_546 {dimension_numbers = #tpu.dot_dimension_numbers<[1], [0], [0], [1], [0, 0, 1, 1], [], []>} : vector<8x8xf32>, vector<8x32xf32>, vector<8x32xf32> -> vector<8x32xf32>
    %724 = arith.addf %720, %723 : vector<8x32xf32>
    %c2_547 = arith.constant 2 : index
    %c0_548 = arith.constant 0 : index
    %c0_549 = arith.constant 0 : index
    %725 = vector.load %arg4[%c2_547, %c0_548, %c0_549] : memref<4x1x32xf32, #tpu.memory_space<vmem>>, vector<1x1x32xf32>
    %726 = vector.shape_cast %725 : vector<1x1x32xf32> to vector<1x32xf32>
    %727 = vector.broadcast %726 : vector<1x32xf32> to vector<8x32xf32>
    %728 = arith.addf %724, %727 : vector<8x32xf32>
    %729 = math.tanh %728 : vector<8x32xf32>
    %c3_550 = arith.constant 3 : index
    %c0_551 = arith.constant 0 : index
    %c0_552 = arith.constant 0 : index
    %730 = vector.load %arg2[%c3_550, %c0_551, %c0_552] : memref<4x4x32xf32, #tpu.memory_space<vmem>>, vector<1x4x32xf32>
    %731 = vector.shape_cast %730 : vector<1x4x32xf32> to vector<4x32xf32>
    %cst_553 = arith.constant dense<0.000000e+00> : vector<8x32xf32>
    %732 = tpu.matmul %685, %731, %cst_553 {dimension_numbers = #tpu.dot_dimension_numbers<[1], [0], [0], [1], [0, 0, 1, 1], [], []>} : vector<8x4xf32>, vector<4x32xf32>, vector<8x32xf32> -> vector<8x32xf32>
    %c3_554 = arith.constant 3 : index
    %c0_555 = arith.constant 0 : index
    %c0_556 = arith.constant 0 : index
    %733 = vector.load %arg3[%c3_554, %c0_555, %c0_556] : memref<4x8x32xf32, #tpu.memory_space<vmem>>, vector<1x8x32xf32>
    %734 = vector.shape_cast %733 : vector<1x8x32xf32> to vector<8x32xf32>
    %cst_557 = arith.constant dense<0.000000e+00> : vector<8x32xf32>
    %735 = tpu.matmul %616, %734, %cst_557 {dimension_numbers = #tpu.dot_dimension_numbers<[1], [0], [0], [1], [0, 0, 1, 1], [], []>} : vector<8x8xf32>, vector<8x32xf32>, vector<8x32xf32> -> vector<8x32xf32>
    %736 = arith.addf %732, %735 : vector<8x32xf32>
    %c3_558 = arith.constant 3 : index
    %c0_559 = arith.constant 0 : index
    %c0_560 = arith.constant 0 : index
    %737 = vector.load %arg4[%c3_558, %c0_559, %c0_560] : memref<4x1x32xf32, #tpu.memory_space<vmem>>, vector<1x1x32xf32>
    %738 = vector.shape_cast %737 : vector<1x1x32xf32> to vector<1x32xf32>
    %739 = vector.broadcast %738 : vector<1x32xf32> to vector<8x32xf32>
    %740 = arith.addf %736, %739 : vector<8x32xf32>
    %741 = arith.negf %740 : vector<8x32xf32>
    %742 = math.exp %741 : vector<8x32xf32>
    %cst_561 = arith.constant 1.000000e+00 : f32
    %743 = vector.broadcast %cst_561 : f32 to vector<8x32xf32>
    %744 = arith.addf %743, %742 : vector<8x32xf32>
    %745 = arith.divf %743, %744 : vector<8x32xf32>
    %746 = arith.mulf %717, %612 : vector<8x32xf32>
    %747 = arith.mulf %701, %729 : vector<8x32xf32>
    %748 = arith.addf %746, %747 : vector<8x32xf32>
    %749 = math.tanh %748 : vector<8x32xf32>
    %750 = arith.mulf %745, %749 : vector<8x32xf32>
    %c0_562 = arith.constant 0 : index
    %c0_563 = arith.constant 0 : index
    %751 = vector.load %arg5[%c0_562, %c0_563] : memref<32x8xf32, #tpu.memory_space<vmem>>, vector<32x8xf32>
    %cst_564 = arith.constant dense<0.000000e+00> : vector<8x8xf32>
    %752 = tpu.matmul %750, %751, %cst_564 {dimension_numbers = #tpu.dot_dimension_numbers<[1], [0], [0], [1], [0, 0, 1, 1], [], []>} : vector<8x32xf32>, vector<32x8xf32>, vector<8x8xf32> -> vector<8x8xf32>
    %c0_565 = arith.constant 0 : index
    %c0_566 = arith.constant 0 : index
    %c0_567 = arith.constant 0 : index
    %753 = vector.load %arg6[%c0_565, %c0_566, %c0_567] : memref<4x8x32xf32, #tpu.memory_space<vmem>>, vector<1x8x32xf32>
    %754 = vector.shape_cast %753 : vector<1x8x32xf32> to vector<8x32xf32>
    %cst_568 = arith.constant dense<0.000000e+00> : vector<8x32xf32>
    %755 = tpu.matmul %752, %754, %cst_568 {dimension_numbers = #tpu.dot_dimension_numbers<[1], [0], [0], [1], [0, 0, 1, 1], [], []>} : vector<8x8xf32>, vector<8x32xf32>, vector<8x32xf32> -> vector<8x32xf32>
    %c0_569 = arith.constant 0 : index
    %c0_570 = arith.constant 0 : index
    %c0_571 = arith.constant 0 : index
    %756 = vector.load %arg7[%c0_569, %c0_570, %c0_571] : memref<4x8x32xf32, #tpu.memory_space<vmem>>, vector<1x8x32xf32>
    %757 = vector.shape_cast %756 : vector<1x8x32xf32> to vector<8x32xf32>
    %cst_572 = arith.constant dense<0.000000e+00> : vector<8x32xf32>
    %758 = tpu.matmul %683, %757, %cst_572 {dimension_numbers = #tpu.dot_dimension_numbers<[1], [0], [0], [1], [0, 0, 1, 1], [], []>} : vector<8x8xf32>, vector<8x32xf32>, vector<8x32xf32> -> vector<8x32xf32>
    %759 = arith.addf %755, %758 : vector<8x32xf32>
    %c0_573 = arith.constant 0 : index
    %c0_574 = arith.constant 0 : index
    %c0_575 = arith.constant 0 : index
    %760 = vector.load %arg8[%c0_573, %c0_574, %c0_575] : memref<4x1x32xf32, #tpu.memory_space<vmem>>, vector<1x1x32xf32>
    %761 = vector.shape_cast %760 : vector<1x1x32xf32> to vector<1x32xf32>
    %762 = vector.broadcast %761 : vector<1x32xf32> to vector<8x32xf32>
    %763 = arith.addf %759, %762 : vector<8x32xf32>
    %764 = arith.negf %763 : vector<8x32xf32>
    %765 = math.exp %764 : vector<8x32xf32>
    %cst_576 = arith.constant 1.000000e+00 : f32
    %766 = vector.broadcast %cst_576 : f32 to vector<8x32xf32>
    %767 = arith.addf %766, %765 : vector<8x32xf32>
    %768 = arith.divf %766, %767 : vector<8x32xf32>
    %c1_577 = arith.constant 1 : index
    %c0_578 = arith.constant 0 : index
    %c0_579 = arith.constant 0 : index
    %769 = vector.load %arg6[%c1_577, %c0_578, %c0_579] : memref<4x8x32xf32, #tpu.memory_space<vmem>>, vector<1x8x32xf32>
    %770 = vector.shape_cast %769 : vector<1x8x32xf32> to vector<8x32xf32>
    %cst_580 = arith.constant dense<0.000000e+00> : vector<8x32xf32>
    %771 = tpu.matmul %752, %770, %cst_580 {dimension_numbers = #tpu.dot_dimension_numbers<[1], [0], [0], [1], [0, 0, 1, 1], [], []>} : vector<8x8xf32>, vector<8x32xf32>, vector<8x32xf32> -> vector<8x32xf32>
    %c1_581 = arith.constant 1 : index
    %c0_582 = arith.constant 0 : index
    %c0_583 = arith.constant 0 : index
    %772 = vector.load %arg7[%c1_581, %c0_582, %c0_583] : memref<4x8x32xf32, #tpu.memory_space<vmem>>, vector<1x8x32xf32>
    %773 = vector.shape_cast %772 : vector<1x8x32xf32> to vector<8x32xf32>
    %cst_584 = arith.constant dense<0.000000e+00> : vector<8x32xf32>
    %774 = tpu.matmul %683, %773, %cst_584 {dimension_numbers = #tpu.dot_dimension_numbers<[1], [0], [0], [1], [0, 0, 1, 1], [], []>} : vector<8x8xf32>, vector<8x32xf32>, vector<8x32xf32> -> vector<8x32xf32>
    %775 = arith.addf %771, %774 : vector<8x32xf32>
    %c1_585 = arith.constant 1 : index
    %c0_586 = arith.constant 0 : index
    %c0_587 = arith.constant 0 : index
    %776 = vector.load %arg8[%c1_585, %c0_586, %c0_587] : memref<4x1x32xf32, #tpu.memory_space<vmem>>, vector<1x1x32xf32>
    %777 = vector.shape_cast %776 : vector<1x1x32xf32> to vector<1x32xf32>
    %778 = vector.broadcast %777 : vector<1x32xf32> to vector<8x32xf32>
    %779 = arith.addf %775, %778 : vector<8x32xf32>
    %780 = arith.negf %779 : vector<8x32xf32>
    %781 = math.exp %780 : vector<8x32xf32>
    %cst_588 = arith.constant 1.000000e+00 : f32
    %782 = vector.broadcast %cst_588 : f32 to vector<8x32xf32>
    %783 = arith.addf %782, %781 : vector<8x32xf32>
    %784 = arith.divf %782, %783 : vector<8x32xf32>
    %c2_589 = arith.constant 2 : index
    %c0_590 = arith.constant 0 : index
    %c0_591 = arith.constant 0 : index
    %785 = vector.load %arg6[%c2_589, %c0_590, %c0_591] : memref<4x8x32xf32, #tpu.memory_space<vmem>>, vector<1x8x32xf32>
    %786 = vector.shape_cast %785 : vector<1x8x32xf32> to vector<8x32xf32>
    %cst_592 = arith.constant dense<0.000000e+00> : vector<8x32xf32>
    %787 = tpu.matmul %752, %786, %cst_592 {dimension_numbers = #tpu.dot_dimension_numbers<[1], [0], [0], [1], [0, 0, 1, 1], [], []>} : vector<8x8xf32>, vector<8x32xf32>, vector<8x32xf32> -> vector<8x32xf32>
    %c2_593 = arith.constant 2 : index
    %c0_594 = arith.constant 0 : index
    %c0_595 = arith.constant 0 : index
    %788 = vector.load %arg7[%c2_593, %c0_594, %c0_595] : memref<4x8x32xf32, #tpu.memory_space<vmem>>, vector<1x8x32xf32>
    %789 = vector.shape_cast %788 : vector<1x8x32xf32> to vector<8x32xf32>
    %cst_596 = arith.constant dense<0.000000e+00> : vector<8x32xf32>
    %790 = tpu.matmul %683, %789, %cst_596 {dimension_numbers = #tpu.dot_dimension_numbers<[1], [0], [0], [1], [0, 0, 1, 1], [], []>} : vector<8x8xf32>, vector<8x32xf32>, vector<8x32xf32> -> vector<8x32xf32>
    %791 = arith.addf %787, %790 : vector<8x32xf32>
    %c2_597 = arith.constant 2 : index
    %c0_598 = arith.constant 0 : index
    %c0_599 = arith.constant 0 : index
    %792 = vector.load %arg8[%c2_597, %c0_598, %c0_599] : memref<4x1x32xf32, #tpu.memory_space<vmem>>, vector<1x1x32xf32>
    %793 = vector.shape_cast %792 : vector<1x1x32xf32> to vector<1x32xf32>
    %794 = vector.broadcast %793 : vector<1x32xf32> to vector<8x32xf32>
    %795 = arith.addf %791, %794 : vector<8x32xf32>
    %796 = math.tanh %795 : vector<8x32xf32>
    %c3_600 = arith.constant 3 : index
    %c0_601 = arith.constant 0 : index
    %c0_602 = arith.constant 0 : index
    %797 = vector.load %arg6[%c3_600, %c0_601, %c0_602] : memref<4x8x32xf32, #tpu.memory_space<vmem>>, vector<1x8x32xf32>
    %798 = vector.shape_cast %797 : vector<1x8x32xf32> to vector<8x32xf32>
    %cst_603 = arith.constant dense<0.000000e+00> : vector<8x32xf32>
    %799 = tpu.matmul %752, %798, %cst_603 {dimension_numbers = #tpu.dot_dimension_numbers<[1], [0], [0], [1], [0, 0, 1, 1], [], []>} : vector<8x8xf32>, vector<8x32xf32>, vector<8x32xf32> -> vector<8x32xf32>
    %c3_604 = arith.constant 3 : index
    %c0_605 = arith.constant 0 : index
    %c0_606 = arith.constant 0 : index
    %800 = vector.load %arg7[%c3_604, %c0_605, %c0_606] : memref<4x8x32xf32, #tpu.memory_space<vmem>>, vector<1x8x32xf32>
    %801 = vector.shape_cast %800 : vector<1x8x32xf32> to vector<8x32xf32>
    %cst_607 = arith.constant dense<0.000000e+00> : vector<8x32xf32>
    %802 = tpu.matmul %683, %801, %cst_607 {dimension_numbers = #tpu.dot_dimension_numbers<[1], [0], [0], [1], [0, 0, 1, 1], [], []>} : vector<8x8xf32>, vector<8x32xf32>, vector<8x32xf32> -> vector<8x32xf32>
    %803 = arith.addf %799, %802 : vector<8x32xf32>
    %c3_608 = arith.constant 3 : index
    %c0_609 = arith.constant 0 : index
    %c0_610 = arith.constant 0 : index
    %804 = vector.load %arg8[%c3_608, %c0_609, %c0_610] : memref<4x1x32xf32, #tpu.memory_space<vmem>>, vector<1x1x32xf32>
    %805 = vector.shape_cast %804 : vector<1x1x32xf32> to vector<1x32xf32>
    %806 = vector.broadcast %805 : vector<1x32xf32> to vector<8x32xf32>
    %807 = arith.addf %803, %806 : vector<8x32xf32>
    %808 = arith.negf %807 : vector<8x32xf32>
    %809 = math.exp %808 : vector<8x32xf32>
    %cst_611 = arith.constant 1.000000e+00 : f32
    %810 = vector.broadcast %cst_611 : f32 to vector<8x32xf32>
    %811 = arith.addf %810, %809 : vector<8x32xf32>
    %812 = arith.divf %810, %811 : vector<8x32xf32>
    %813 = arith.mulf %784, %679 : vector<8x32xf32>
    %814 = arith.mulf %768, %796 : vector<8x32xf32>
    %815 = arith.addf %813, %814 : vector<8x32xf32>
    %816 = math.tanh %815 : vector<8x32xf32>
    %817 = arith.mulf %812, %816 : vector<8x32xf32>
    %c0_612 = arith.constant 0 : index
    %c0_613 = arith.constant 0 : index
    %818 = vector.load %arg9[%c0_612, %c0_613] : memref<32x8xf32, #tpu.memory_space<vmem>>, vector<32x8xf32>
    %cst_614 = arith.constant dense<0.000000e+00> : vector<8x8xf32>
    %819 = tpu.matmul %817, %818, %cst_614 {dimension_numbers = #tpu.dot_dimension_numbers<[1], [0], [0], [1], [0, 0, 1, 1], [], []>} : vector<8x32xf32>, vector<32x8xf32>, vector<8x8xf32> -> vector<8x8xf32>
    %c6 = arith.constant 6 : index
    %c0_615 = arith.constant 0 : index
    %c0_616 = arith.constant 0 : index
    %820 = vector.load %arg1[%c6, %c0_615, %c0_616] : memref<8x8x4xf32, #tpu.memory_space<vmem>>, vector<1x8x4xf32>
    %821 = vector.shape_cast %820 : vector<1x8x4xf32> to vector<8x4xf32>
    %c0_617 = arith.constant 0 : index
    %c0_618 = arith.constant 0 : index
    %c0_619 = arith.constant 0 : index
    %822 = vector.load %arg2[%c0_617, %c0_618, %c0_619] : memref<4x4x32xf32, #tpu.memory_space<vmem>>, vector<1x4x32xf32>
    %823 = vector.shape_cast %822 : vector<1x4x32xf32> to vector<4x32xf32>
    %cst_620 = arith.constant dense<0.000000e+00> : vector<8x32xf32>
    %824 = tpu.matmul %821, %823, %cst_620 {dimension_numbers = #tpu.dot_dimension_numbers<[1], [0], [0], [1], [0, 0, 1, 1], [], []>} : vector<8x4xf32>, vector<4x32xf32>, vector<8x32xf32> -> vector<8x32xf32>
    %c0_621 = arith.constant 0 : index
    %c0_622 = arith.constant 0 : index
    %c0_623 = arith.constant 0 : index
    %825 = vector.load %arg3[%c0_621, %c0_622, %c0_623] : memref<4x8x32xf32, #tpu.memory_space<vmem>>, vector<1x8x32xf32>
    %826 = vector.shape_cast %825 : vector<1x8x32xf32> to vector<8x32xf32>
    %cst_624 = arith.constant dense<0.000000e+00> : vector<8x32xf32>
    %827 = tpu.matmul %752, %826, %cst_624 {dimension_numbers = #tpu.dot_dimension_numbers<[1], [0], [0], [1], [0, 0, 1, 1], [], []>} : vector<8x8xf32>, vector<8x32xf32>, vector<8x32xf32> -> vector<8x32xf32>
    %828 = arith.addf %824, %827 : vector<8x32xf32>
    %c0_625 = arith.constant 0 : index
    %c0_626 = arith.constant 0 : index
    %c0_627 = arith.constant 0 : index
    %829 = vector.load %arg4[%c0_625, %c0_626, %c0_627] : memref<4x1x32xf32, #tpu.memory_space<vmem>>, vector<1x1x32xf32>
    %830 = vector.shape_cast %829 : vector<1x1x32xf32> to vector<1x32xf32>
    %831 = vector.broadcast %830 : vector<1x32xf32> to vector<8x32xf32>
    %832 = arith.addf %828, %831 : vector<8x32xf32>
    %833 = arith.negf %832 : vector<8x32xf32>
    %834 = math.exp %833 : vector<8x32xf32>
    %cst_628 = arith.constant 1.000000e+00 : f32
    %835 = vector.broadcast %cst_628 : f32 to vector<8x32xf32>
    %836 = arith.addf %835, %834 : vector<8x32xf32>
    %837 = arith.divf %835, %836 : vector<8x32xf32>
    %c1_629 = arith.constant 1 : index
    %c0_630 = arith.constant 0 : index
    %c0_631 = arith.constant 0 : index
    %838 = vector.load %arg2[%c1_629, %c0_630, %c0_631] : memref<4x4x32xf32, #tpu.memory_space<vmem>>, vector<1x4x32xf32>
    %839 = vector.shape_cast %838 : vector<1x4x32xf32> to vector<4x32xf32>
    %cst_632 = arith.constant dense<0.000000e+00> : vector<8x32xf32>
    %840 = tpu.matmul %821, %839, %cst_632 {dimension_numbers = #tpu.dot_dimension_numbers<[1], [0], [0], [1], [0, 0, 1, 1], [], []>} : vector<8x4xf32>, vector<4x32xf32>, vector<8x32xf32> -> vector<8x32xf32>
    %c1_633 = arith.constant 1 : index
    %c0_634 = arith.constant 0 : index
    %c0_635 = arith.constant 0 : index
    %841 = vector.load %arg3[%c1_633, %c0_634, %c0_635] : memref<4x8x32xf32, #tpu.memory_space<vmem>>, vector<1x8x32xf32>
    %842 = vector.shape_cast %841 : vector<1x8x32xf32> to vector<8x32xf32>
    %cst_636 = arith.constant dense<0.000000e+00> : vector<8x32xf32>
    %843 = tpu.matmul %752, %842, %cst_636 {dimension_numbers = #tpu.dot_dimension_numbers<[1], [0], [0], [1], [0, 0, 1, 1], [], []>} : vector<8x8xf32>, vector<8x32xf32>, vector<8x32xf32> -> vector<8x32xf32>
    %844 = arith.addf %840, %843 : vector<8x32xf32>
    %c1_637 = arith.constant 1 : index
    %c0_638 = arith.constant 0 : index
    %c0_639 = arith.constant 0 : index
    %845 = vector.load %arg4[%c1_637, %c0_638, %c0_639] : memref<4x1x32xf32, #tpu.memory_space<vmem>>, vector<1x1x32xf32>
    %846 = vector.shape_cast %845 : vector<1x1x32xf32> to vector<1x32xf32>
    %847 = vector.broadcast %846 : vector<1x32xf32> to vector<8x32xf32>
    %848 = arith.addf %844, %847 : vector<8x32xf32>
    %849 = arith.negf %848 : vector<8x32xf32>
    %850 = math.exp %849 : vector<8x32xf32>
    %cst_640 = arith.constant 1.000000e+00 : f32
    %851 = vector.broadcast %cst_640 : f32 to vector<8x32xf32>
    %852 = arith.addf %851, %850 : vector<8x32xf32>
    %853 = arith.divf %851, %852 : vector<8x32xf32>
    %c2_641 = arith.constant 2 : index
    %c0_642 = arith.constant 0 : index
    %c0_643 = arith.constant 0 : index
    %854 = vector.load %arg2[%c2_641, %c0_642, %c0_643] : memref<4x4x32xf32, #tpu.memory_space<vmem>>, vector<1x4x32xf32>
    %855 = vector.shape_cast %854 : vector<1x4x32xf32> to vector<4x32xf32>
    %cst_644 = arith.constant dense<0.000000e+00> : vector<8x32xf32>
    %856 = tpu.matmul %821, %855, %cst_644 {dimension_numbers = #tpu.dot_dimension_numbers<[1], [0], [0], [1], [0, 0, 1, 1], [], []>} : vector<8x4xf32>, vector<4x32xf32>, vector<8x32xf32> -> vector<8x32xf32>
    %c2_645 = arith.constant 2 : index
    %c0_646 = arith.constant 0 : index
    %c0_647 = arith.constant 0 : index
    %857 = vector.load %arg3[%c2_645, %c0_646, %c0_647] : memref<4x8x32xf32, #tpu.memory_space<vmem>>, vector<1x8x32xf32>
    %858 = vector.shape_cast %857 : vector<1x8x32xf32> to vector<8x32xf32>
    %cst_648 = arith.constant dense<0.000000e+00> : vector<8x32xf32>
    %859 = tpu.matmul %752, %858, %cst_648 {dimension_numbers = #tpu.dot_dimension_numbers<[1], [0], [0], [1], [0, 0, 1, 1], [], []>} : vector<8x8xf32>, vector<8x32xf32>, vector<8x32xf32> -> vector<8x32xf32>
    %860 = arith.addf %856, %859 : vector<8x32xf32>
    %c2_649 = arith.constant 2 : index
    %c0_650 = arith.constant 0 : index
    %c0_651 = arith.constant 0 : index
    %861 = vector.load %arg4[%c2_649, %c0_650, %c0_651] : memref<4x1x32xf32, #tpu.memory_space<vmem>>, vector<1x1x32xf32>
    %862 = vector.shape_cast %861 : vector<1x1x32xf32> to vector<1x32xf32>
    %863 = vector.broadcast %862 : vector<1x32xf32> to vector<8x32xf32>
    %864 = arith.addf %860, %863 : vector<8x32xf32>
    %865 = math.tanh %864 : vector<8x32xf32>
    %c3_652 = arith.constant 3 : index
    %c0_653 = arith.constant 0 : index
    %c0_654 = arith.constant 0 : index
    %866 = vector.load %arg2[%c3_652, %c0_653, %c0_654] : memref<4x4x32xf32, #tpu.memory_space<vmem>>, vector<1x4x32xf32>
    %867 = vector.shape_cast %866 : vector<1x4x32xf32> to vector<4x32xf32>
    %cst_655 = arith.constant dense<0.000000e+00> : vector<8x32xf32>
    %868 = tpu.matmul %821, %867, %cst_655 {dimension_numbers = #tpu.dot_dimension_numbers<[1], [0], [0], [1], [0, 0, 1, 1], [], []>} : vector<8x4xf32>, vector<4x32xf32>, vector<8x32xf32> -> vector<8x32xf32>
    %c3_656 = arith.constant 3 : index
    %c0_657 = arith.constant 0 : index
    %c0_658 = arith.constant 0 : index
    %869 = vector.load %arg3[%c3_656, %c0_657, %c0_658] : memref<4x8x32xf32, #tpu.memory_space<vmem>>, vector<1x8x32xf32>
    %870 = vector.shape_cast %869 : vector<1x8x32xf32> to vector<8x32xf32>
    %cst_659 = arith.constant dense<0.000000e+00> : vector<8x32xf32>
    %871 = tpu.matmul %752, %870, %cst_659 {dimension_numbers = #tpu.dot_dimension_numbers<[1], [0], [0], [1], [0, 0, 1, 1], [], []>} : vector<8x8xf32>, vector<8x32xf32>, vector<8x32xf32> -> vector<8x32xf32>
    %872 = arith.addf %868, %871 : vector<8x32xf32>
    %c3_660 = arith.constant 3 : index
    %c0_661 = arith.constant 0 : index
    %c0_662 = arith.constant 0 : index
    %873 = vector.load %arg4[%c3_660, %c0_661, %c0_662] : memref<4x1x32xf32, #tpu.memory_space<vmem>>, vector<1x1x32xf32>
    %874 = vector.shape_cast %873 : vector<1x1x32xf32> to vector<1x32xf32>
    %875 = vector.broadcast %874 : vector<1x32xf32> to vector<8x32xf32>
    %876 = arith.addf %872, %875 : vector<8x32xf32>
    %877 = arith.negf %876 : vector<8x32xf32>
    %878 = math.exp %877 : vector<8x32xf32>
    %cst_663 = arith.constant 1.000000e+00 : f32
    %879 = vector.broadcast %cst_663 : f32 to vector<8x32xf32>
    %880 = arith.addf %879, %878 : vector<8x32xf32>
    %881 = arith.divf %879, %880 : vector<8x32xf32>
    %882 = arith.mulf %853, %748 : vector<8x32xf32>
    %883 = arith.mulf %837, %865 : vector<8x32xf32>
    %884 = arith.addf %882, %883 : vector<8x32xf32>
    %885 = math.tanh %884 : vector<8x32xf32>
    %886 = arith.mulf %881, %885 : vector<8x32xf32>
    %c0_664 = arith.constant 0 : index
    %c0_665 = arith.constant 0 : index
    %887 = vector.load %arg5[%c0_664, %c0_665] : memref<32x8xf32, #tpu.memory_space<vmem>>, vector<32x8xf32>
    %cst_666 = arith.constant dense<0.000000e+00> : vector<8x8xf32>
    %888 = tpu.matmul %886, %887, %cst_666 {dimension_numbers = #tpu.dot_dimension_numbers<[1], [0], [0], [1], [0, 0, 1, 1], [], []>} : vector<8x32xf32>, vector<32x8xf32>, vector<8x8xf32> -> vector<8x8xf32>
    %c0_667 = arith.constant 0 : index
    %c0_668 = arith.constant 0 : index
    %c0_669 = arith.constant 0 : index
    %889 = vector.load %arg6[%c0_667, %c0_668, %c0_669] : memref<4x8x32xf32, #tpu.memory_space<vmem>>, vector<1x8x32xf32>
    %890 = vector.shape_cast %889 : vector<1x8x32xf32> to vector<8x32xf32>
    %cst_670 = arith.constant dense<0.000000e+00> : vector<8x32xf32>
    %891 = tpu.matmul %888, %890, %cst_670 {dimension_numbers = #tpu.dot_dimension_numbers<[1], [0], [0], [1], [0, 0, 1, 1], [], []>} : vector<8x8xf32>, vector<8x32xf32>, vector<8x32xf32> -> vector<8x32xf32>
    %c0_671 = arith.constant 0 : index
    %c0_672 = arith.constant 0 : index
    %c0_673 = arith.constant 0 : index
    %892 = vector.load %arg7[%c0_671, %c0_672, %c0_673] : memref<4x8x32xf32, #tpu.memory_space<vmem>>, vector<1x8x32xf32>
    %893 = vector.shape_cast %892 : vector<1x8x32xf32> to vector<8x32xf32>
    %cst_674 = arith.constant dense<0.000000e+00> : vector<8x32xf32>
    %894 = tpu.matmul %819, %893, %cst_674 {dimension_numbers = #tpu.dot_dimension_numbers<[1], [0], [0], [1], [0, 0, 1, 1], [], []>} : vector<8x8xf32>, vector<8x32xf32>, vector<8x32xf32> -> vector<8x32xf32>
    %895 = arith.addf %891, %894 : vector<8x32xf32>
    %c0_675 = arith.constant 0 : index
    %c0_676 = arith.constant 0 : index
    %c0_677 = arith.constant 0 : index
    %896 = vector.load %arg8[%c0_675, %c0_676, %c0_677] : memref<4x1x32xf32, #tpu.memory_space<vmem>>, vector<1x1x32xf32>
    %897 = vector.shape_cast %896 : vector<1x1x32xf32> to vector<1x32xf32>
    %898 = vector.broadcast %897 : vector<1x32xf32> to vector<8x32xf32>
    %899 = arith.addf %895, %898 : vector<8x32xf32>
    %900 = arith.negf %899 : vector<8x32xf32>
    %901 = math.exp %900 : vector<8x32xf32>
    %cst_678 = arith.constant 1.000000e+00 : f32
    %902 = vector.broadcast %cst_678 : f32 to vector<8x32xf32>
    %903 = arith.addf %902, %901 : vector<8x32xf32>
    %904 = arith.divf %902, %903 : vector<8x32xf32>
    %c1_679 = arith.constant 1 : index
    %c0_680 = arith.constant 0 : index
    %c0_681 = arith.constant 0 : index
    %905 = vector.load %arg6[%c1_679, %c0_680, %c0_681] : memref<4x8x32xf32, #tpu.memory_space<vmem>>, vector<1x8x32xf32>
    %906 = vector.shape_cast %905 : vector<1x8x32xf32> to vector<8x32xf32>
    %cst_682 = arith.constant dense<0.000000e+00> : vector<8x32xf32>
    %907 = tpu.matmul %888, %906, %cst_682 {dimension_numbers = #tpu.dot_dimension_numbers<[1], [0], [0], [1], [0, 0, 1, 1], [], []>} : vector<8x8xf32>, vector<8x32xf32>, vector<8x32xf32> -> vector<8x32xf32>
    %c1_683 = arith.constant 1 : index
    %c0_684 = arith.constant 0 : index
    %c0_685 = arith.constant 0 : index
    %908 = vector.load %arg7[%c1_683, %c0_684, %c0_685] : memref<4x8x32xf32, #tpu.memory_space<vmem>>, vector<1x8x32xf32>
    %909 = vector.shape_cast %908 : vector<1x8x32xf32> to vector<8x32xf32>
    %cst_686 = arith.constant dense<0.000000e+00> : vector<8x32xf32>
    %910 = tpu.matmul %819, %909, %cst_686 {dimension_numbers = #tpu.dot_dimension_numbers<[1], [0], [0], [1], [0, 0, 1, 1], [], []>} : vector<8x8xf32>, vector<8x32xf32>, vector<8x32xf32> -> vector<8x32xf32>
    %911 = arith.addf %907, %910 : vector<8x32xf32>
    %c1_687 = arith.constant 1 : index
    %c0_688 = arith.constant 0 : index
    %c0_689 = arith.constant 0 : index
    %912 = vector.load %arg8[%c1_687, %c0_688, %c0_689] : memref<4x1x32xf32, #tpu.memory_space<vmem>>, vector<1x1x32xf32>
    %913 = vector.shape_cast %912 : vector<1x1x32xf32> to vector<1x32xf32>
    %914 = vector.broadcast %913 : vector<1x32xf32> to vector<8x32xf32>
    %915 = arith.addf %911, %914 : vector<8x32xf32>
    %916 = arith.negf %915 : vector<8x32xf32>
    %917 = math.exp %916 : vector<8x32xf32>
    %cst_690 = arith.constant 1.000000e+00 : f32
    %918 = vector.broadcast %cst_690 : f32 to vector<8x32xf32>
    %919 = arith.addf %918, %917 : vector<8x32xf32>
    %920 = arith.divf %918, %919 : vector<8x32xf32>
    %c2_691 = arith.constant 2 : index
    %c0_692 = arith.constant 0 : index
    %c0_693 = arith.constant 0 : index
    %921 = vector.load %arg6[%c2_691, %c0_692, %c0_693] : memref<4x8x32xf32, #tpu.memory_space<vmem>>, vector<1x8x32xf32>
    %922 = vector.shape_cast %921 : vector<1x8x32xf32> to vector<8x32xf32>
    %cst_694 = arith.constant dense<0.000000e+00> : vector<8x32xf32>
    %923 = tpu.matmul %888, %922, %cst_694 {dimension_numbers = #tpu.dot_dimension_numbers<[1], [0], [0], [1], [0, 0, 1, 1], [], []>} : vector<8x8xf32>, vector<8x32xf32>, vector<8x32xf32> -> vector<8x32xf32>
    %c2_695 = arith.constant 2 : index
    %c0_696 = arith.constant 0 : index
    %c0_697 = arith.constant 0 : index
    %924 = vector.load %arg7[%c2_695, %c0_696, %c0_697] : memref<4x8x32xf32, #tpu.memory_space<vmem>>, vector<1x8x32xf32>
    %925 = vector.shape_cast %924 : vector<1x8x32xf32> to vector<8x32xf32>
    %cst_698 = arith.constant dense<0.000000e+00> : vector<8x32xf32>
    %926 = tpu.matmul %819, %925, %cst_698 {dimension_numbers = #tpu.dot_dimension_numbers<[1], [0], [0], [1], [0, 0, 1, 1], [], []>} : vector<8x8xf32>, vector<8x32xf32>, vector<8x32xf32> -> vector<8x32xf32>
    %927 = arith.addf %923, %926 : vector<8x32xf32>
    %c2_699 = arith.constant 2 : index
    %c0_700 = arith.constant 0 : index
    %c0_701 = arith.constant 0 : index
    %928 = vector.load %arg8[%c2_699, %c0_700, %c0_701] : memref<4x1x32xf32, #tpu.memory_space<vmem>>, vector<1x1x32xf32>
    %929 = vector.shape_cast %928 : vector<1x1x32xf32> to vector<1x32xf32>
    %930 = vector.broadcast %929 : vector<1x32xf32> to vector<8x32xf32>
    %931 = arith.addf %927, %930 : vector<8x32xf32>
    %932 = math.tanh %931 : vector<8x32xf32>
    %c3_702 = arith.constant 3 : index
    %c0_703 = arith.constant 0 : index
    %c0_704 = arith.constant 0 : index
    %933 = vector.load %arg6[%c3_702, %c0_703, %c0_704] : memref<4x8x32xf32, #tpu.memory_space<vmem>>, vector<1x8x32xf32>
    %934 = vector.shape_cast %933 : vector<1x8x32xf32> to vector<8x32xf32>
    %cst_705 = arith.constant dense<0.000000e+00> : vector<8x32xf32>
    %935 = tpu.matmul %888, %934, %cst_705 {dimension_numbers = #tpu.dot_dimension_numbers<[1], [0], [0], [1], [0, 0, 1, 1], [], []>} : vector<8x8xf32>, vector<8x32xf32>, vector<8x32xf32> -> vector<8x32xf32>
    %c3_706 = arith.constant 3 : index
    %c0_707 = arith.constant 0 : index
    %c0_708 = arith.constant 0 : index
    %936 = vector.load %arg7[%c3_706, %c0_707, %c0_708] : memref<4x8x32xf32, #tpu.memory_space<vmem>>, vector<1x8x32xf32>
    %937 = vector.shape_cast %936 : vector<1x8x32xf32> to vector<8x32xf32>
    %cst_709 = arith.constant dense<0.000000e+00> : vector<8x32xf32>
    %938 = tpu.matmul %819, %937, %cst_709 {dimension_numbers = #tpu.dot_dimension_numbers<[1], [0], [0], [1], [0, 0, 1, 1], [], []>} : vector<8x8xf32>, vector<8x32xf32>, vector<8x32xf32> -> vector<8x32xf32>
    %939 = arith.addf %935, %938 : vector<8x32xf32>
    %c3_710 = arith.constant 3 : index
    %c0_711 = arith.constant 0 : index
    %c0_712 = arith.constant 0 : index
    %940 = vector.load %arg8[%c3_710, %c0_711, %c0_712] : memref<4x1x32xf32, #tpu.memory_space<vmem>>, vector<1x1x32xf32>
    %941 = vector.shape_cast %940 : vector<1x1x32xf32> to vector<1x32xf32>
    %942 = vector.broadcast %941 : vector<1x32xf32> to vector<8x32xf32>
    %943 = arith.addf %939, %942 : vector<8x32xf32>
    %944 = arith.negf %943 : vector<8x32xf32>
    %945 = math.exp %944 : vector<8x32xf32>
    %cst_713 = arith.constant 1.000000e+00 : f32
    %946 = vector.broadcast %cst_713 : f32 to vector<8x32xf32>
    %947 = arith.addf %946, %945 : vector<8x32xf32>
    %948 = arith.divf %946, %947 : vector<8x32xf32>
    %949 = arith.mulf %920, %815 : vector<8x32xf32>
    %950 = arith.mulf %904, %932 : vector<8x32xf32>
    %951 = arith.addf %949, %950 : vector<8x32xf32>
    %952 = math.tanh %951 : vector<8x32xf32>
    %953 = arith.mulf %948, %952 : vector<8x32xf32>
    %c0_714 = arith.constant 0 : index
    %c0_715 = arith.constant 0 : index
    %954 = vector.load %arg9[%c0_714, %c0_715] : memref<32x8xf32, #tpu.memory_space<vmem>>, vector<32x8xf32>
    %cst_716 = arith.constant dense<0.000000e+00> : vector<8x8xf32>
    %955 = tpu.matmul %953, %954, %cst_716 {dimension_numbers = #tpu.dot_dimension_numbers<[1], [0], [0], [1], [0, 0, 1, 1], [], []>} : vector<8x32xf32>, vector<32x8xf32>, vector<8x8xf32> -> vector<8x8xf32>
    %c7 = arith.constant 7 : index
    %c0_717 = arith.constant 0 : index
    %c0_718 = arith.constant 0 : index
    %956 = vector.load %arg1[%c7, %c0_717, %c0_718] : memref<8x8x4xf32, #tpu.memory_space<vmem>>, vector<1x8x4xf32>
    %957 = vector.shape_cast %956 : vector<1x8x4xf32> to vector<8x4xf32>
    %c0_719 = arith.constant 0 : index
    %c0_720 = arith.constant 0 : index
    %c0_721 = arith.constant 0 : index
    %958 = vector.load %arg2[%c0_719, %c0_720, %c0_721] : memref<4x4x32xf32, #tpu.memory_space<vmem>>, vector<1x4x32xf32>
    %959 = vector.shape_cast %958 : vector<1x4x32xf32> to vector<4x32xf32>
    %cst_722 = arith.constant dense<0.000000e+00> : vector<8x32xf32>
    %960 = tpu.matmul %957, %959, %cst_722 {dimension_numbers = #tpu.dot_dimension_numbers<[1], [0], [0], [1], [0, 0, 1, 1], [], []>} : vector<8x4xf32>, vector<4x32xf32>, vector<8x32xf32> -> vector<8x32xf32>
    %c0_723 = arith.constant 0 : index
    %c0_724 = arith.constant 0 : index
    %c0_725 = arith.constant 0 : index
    %961 = vector.load %arg3[%c0_723, %c0_724, %c0_725] : memref<4x8x32xf32, #tpu.memory_space<vmem>>, vector<1x8x32xf32>
    %962 = vector.shape_cast %961 : vector<1x8x32xf32> to vector<8x32xf32>
    %cst_726 = arith.constant dense<0.000000e+00> : vector<8x32xf32>
    %963 = tpu.matmul %888, %962, %cst_726 {dimension_numbers = #tpu.dot_dimension_numbers<[1], [0], [0], [1], [0, 0, 1, 1], [], []>} : vector<8x8xf32>, vector<8x32xf32>, vector<8x32xf32> -> vector<8x32xf32>
    %964 = arith.addf %960, %963 : vector<8x32xf32>
    %c0_727 = arith.constant 0 : index
    %c0_728 = arith.constant 0 : index
    %c0_729 = arith.constant 0 : index
    %965 = vector.load %arg4[%c0_727, %c0_728, %c0_729] : memref<4x1x32xf32, #tpu.memory_space<vmem>>, vector<1x1x32xf32>
    %966 = vector.shape_cast %965 : vector<1x1x32xf32> to vector<1x32xf32>
    %967 = vector.broadcast %966 : vector<1x32xf32> to vector<8x32xf32>
    %968 = arith.addf %964, %967 : vector<8x32xf32>
    %969 = arith.negf %968 : vector<8x32xf32>
    %970 = math.exp %969 : vector<8x32xf32>
    %cst_730 = arith.constant 1.000000e+00 : f32
    %971 = vector.broadcast %cst_730 : f32 to vector<8x32xf32>
    %972 = arith.addf %971, %970 : vector<8x32xf32>
    %973 = arith.divf %971, %972 : vector<8x32xf32>
    %c1_731 = arith.constant 1 : index
    %c0_732 = arith.constant 0 : index
    %c0_733 = arith.constant 0 : index
    %974 = vector.load %arg2[%c1_731, %c0_732, %c0_733] : memref<4x4x32xf32, #tpu.memory_space<vmem>>, vector<1x4x32xf32>
    %975 = vector.shape_cast %974 : vector<1x4x32xf32> to vector<4x32xf32>
    %cst_734 = arith.constant dense<0.000000e+00> : vector<8x32xf32>
    %976 = tpu.matmul %957, %975, %cst_734 {dimension_numbers = #tpu.dot_dimension_numbers<[1], [0], [0], [1], [0, 0, 1, 1], [], []>} : vector<8x4xf32>, vector<4x32xf32>, vector<8x32xf32> -> vector<8x32xf32>
    %c1_735 = arith.constant 1 : index
    %c0_736 = arith.constant 0 : index
    %c0_737 = arith.constant 0 : index
    %977 = vector.load %arg3[%c1_735, %c0_736, %c0_737] : memref<4x8x32xf32, #tpu.memory_space<vmem>>, vector<1x8x32xf32>
    %978 = vector.shape_cast %977 : vector<1x8x32xf32> to vector<8x32xf32>
    %cst_738 = arith.constant dense<0.000000e+00> : vector<8x32xf32>
    %979 = tpu.matmul %888, %978, %cst_738 {dimension_numbers = #tpu.dot_dimension_numbers<[1], [0], [0], [1], [0, 0, 1, 1], [], []>} : vector<8x8xf32>, vector<8x32xf32>, vector<8x32xf32> -> vector<8x32xf32>
    %980 = arith.addf %976, %979 : vector<8x32xf32>
    %c1_739 = arith.constant 1 : index
    %c0_740 = arith.constant 0 : index
    %c0_741 = arith.constant 0 : index
    %981 = vector.load %arg4[%c1_739, %c0_740, %c0_741] : memref<4x1x32xf32, #tpu.memory_space<vmem>>, vector<1x1x32xf32>
    %982 = vector.shape_cast %981 : vector<1x1x32xf32> to vector<1x32xf32>
    %983 = vector.broadcast %982 : vector<1x32xf32> to vector<8x32xf32>
    %984 = arith.addf %980, %983 : vector<8x32xf32>
    %985 = arith.negf %984 : vector<8x32xf32>
    %986 = math.exp %985 : vector<8x32xf32>
    %cst_742 = arith.constant 1.000000e+00 : f32
    %987 = vector.broadcast %cst_742 : f32 to vector<8x32xf32>
    %988 = arith.addf %987, %986 : vector<8x32xf32>
    %989 = arith.divf %987, %988 : vector<8x32xf32>
    %c2_743 = arith.constant 2 : index
    %c0_744 = arith.constant 0 : index
    %c0_745 = arith.constant 0 : index
    %990 = vector.load %arg2[%c2_743, %c0_744, %c0_745] : memref<4x4x32xf32, #tpu.memory_space<vmem>>, vector<1x4x32xf32>
    %991 = vector.shape_cast %990 : vector<1x4x32xf32> to vector<4x32xf32>
    %cst_746 = arith.constant dense<0.000000e+00> : vector<8x32xf32>
    %992 = tpu.matmul %957, %991, %cst_746 {dimension_numbers = #tpu.dot_dimension_numbers<[1], [0], [0], [1], [0, 0, 1, 1], [], []>} : vector<8x4xf32>, vector<4x32xf32>, vector<8x32xf32> -> vector<8x32xf32>
    %c2_747 = arith.constant 2 : index
    %c0_748 = arith.constant 0 : index
    %c0_749 = arith.constant 0 : index
    %993 = vector.load %arg3[%c2_747, %c0_748, %c0_749] : memref<4x8x32xf32, #tpu.memory_space<vmem>>, vector<1x8x32xf32>
    %994 = vector.shape_cast %993 : vector<1x8x32xf32> to vector<8x32xf32>
    %cst_750 = arith.constant dense<0.000000e+00> : vector<8x32xf32>
    %995 = tpu.matmul %888, %994, %cst_750 {dimension_numbers = #tpu.dot_dimension_numbers<[1], [0], [0], [1], [0, 0, 1, 1], [], []>} : vector<8x8xf32>, vector<8x32xf32>, vector<8x32xf32> -> vector<8x32xf32>
    %996 = arith.addf %992, %995 : vector<8x32xf32>
    %c2_751 = arith.constant 2 : index
    %c0_752 = arith.constant 0 : index
    %c0_753 = arith.constant 0 : index
    %997 = vector.load %arg4[%c2_751, %c0_752, %c0_753] : memref<4x1x32xf32, #tpu.memory_space<vmem>>, vector<1x1x32xf32>
    %998 = vector.shape_cast %997 : vector<1x1x32xf32> to vector<1x32xf32>
    %999 = vector.broadcast %998 : vector<1x32xf32> to vector<8x32xf32>
    %1000 = arith.addf %996, %999 : vector<8x32xf32>
    %1001 = math.tanh %1000 : vector<8x32xf32>
    %c3_754 = arith.constant 3 : index
    %c0_755 = arith.constant 0 : index
    %c0_756 = arith.constant 0 : index
    %1002 = vector.load %arg2[%c3_754, %c0_755, %c0_756] : memref<4x4x32xf32, #tpu.memory_space<vmem>>, vector<1x4x32xf32>
    %1003 = vector.shape_cast %1002 : vector<1x4x32xf32> to vector<4x32xf32>
    %cst_757 = arith.constant dense<0.000000e+00> : vector<8x32xf32>
    %1004 = tpu.matmul %957, %1003, %cst_757 {dimension_numbers = #tpu.dot_dimension_numbers<[1], [0], [0], [1], [0, 0, 1, 1], [], []>} : vector<8x4xf32>, vector<4x32xf32>, vector<8x32xf32> -> vector<8x32xf32>
    %c3_758 = arith.constant 3 : index
    %c0_759 = arith.constant 0 : index
    %c0_760 = arith.constant 0 : index
    %1005 = vector.load %arg3[%c3_758, %c0_759, %c0_760] : memref<4x8x32xf32, #tpu.memory_space<vmem>>, vector<1x8x32xf32>
    %1006 = vector.shape_cast %1005 : vector<1x8x32xf32> to vector<8x32xf32>
    %cst_761 = arith.constant dense<0.000000e+00> : vector<8x32xf32>
    %1007 = tpu.matmul %888, %1006, %cst_761 {dimension_numbers = #tpu.dot_dimension_numbers<[1], [0], [0], [1], [0, 0, 1, 1], [], []>} : vector<8x8xf32>, vector<8x32xf32>, vector<8x32xf32> -> vector<8x32xf32>
    %1008 = arith.addf %1004, %1007 : vector<8x32xf32>
    %c3_762 = arith.constant 3 : index
    %c0_763 = arith.constant 0 : index
    %c0_764 = arith.constant 0 : index
    %1009 = vector.load %arg4[%c3_762, %c0_763, %c0_764] : memref<4x1x32xf32, #tpu.memory_space<vmem>>, vector<1x1x32xf32>
    %1010 = vector.shape_cast %1009 : vector<1x1x32xf32> to vector<1x32xf32>
    %1011 = vector.broadcast %1010 : vector<1x32xf32> to vector<8x32xf32>
    %1012 = arith.addf %1008, %1011 : vector<8x32xf32>
    %1013 = arith.negf %1012 : vector<8x32xf32>
    %1014 = math.exp %1013 : vector<8x32xf32>
    %cst_765 = arith.constant 1.000000e+00 : f32
    %1015 = vector.broadcast %cst_765 : f32 to vector<8x32xf32>
    %1016 = arith.addf %1015, %1014 : vector<8x32xf32>
    %1017 = arith.divf %1015, %1016 : vector<8x32xf32>
    %1018 = arith.mulf %989, %884 : vector<8x32xf32>
    %1019 = arith.mulf %973, %1001 : vector<8x32xf32>
    %1020 = arith.addf %1018, %1019 : vector<8x32xf32>
    %1021 = math.tanh %1020 : vector<8x32xf32>
    %1022 = arith.mulf %1017, %1021 : vector<8x32xf32>
    %c0_766 = arith.constant 0 : index
    %c0_767 = arith.constant 0 : index
    %1023 = vector.load %arg5[%c0_766, %c0_767] : memref<32x8xf32, #tpu.memory_space<vmem>>, vector<32x8xf32>
    %cst_768 = arith.constant dense<0.000000e+00> : vector<8x8xf32>
    %1024 = tpu.matmul %1022, %1023, %cst_768 {dimension_numbers = #tpu.dot_dimension_numbers<[1], [0], [0], [1], [0, 0, 1, 1], [], []>} : vector<8x32xf32>, vector<32x8xf32>, vector<8x8xf32> -> vector<8x8xf32>
    %c0_769 = arith.constant 0 : index
    %c0_770 = arith.constant 0 : index
    %c0_771 = arith.constant 0 : index
    %1025 = vector.load %arg6[%c0_769, %c0_770, %c0_771] : memref<4x8x32xf32, #tpu.memory_space<vmem>>, vector<1x8x32xf32>
    %1026 = vector.shape_cast %1025 : vector<1x8x32xf32> to vector<8x32xf32>
    %cst_772 = arith.constant dense<0.000000e+00> : vector<8x32xf32>
    %1027 = tpu.matmul %1024, %1026, %cst_772 {dimension_numbers = #tpu.dot_dimension_numbers<[1], [0], [0], [1], [0, 0, 1, 1], [], []>} : vector<8x8xf32>, vector<8x32xf32>, vector<8x32xf32> -> vector<8x32xf32>
    %c0_773 = arith.constant 0 : index
    %c0_774 = arith.constant 0 : index
    %c0_775 = arith.constant 0 : index
    %1028 = vector.load %arg7[%c0_773, %c0_774, %c0_775] : memref<4x8x32xf32, #tpu.memory_space<vmem>>, vector<1x8x32xf32>
    %1029 = vector.shape_cast %1028 : vector<1x8x32xf32> to vector<8x32xf32>
    %cst_776 = arith.constant dense<0.000000e+00> : vector<8x32xf32>
    %1030 = tpu.matmul %955, %1029, %cst_776 {dimension_numbers = #tpu.dot_dimension_numbers<[1], [0], [0], [1], [0, 0, 1, 1], [], []>} : vector<8x8xf32>, vector<8x32xf32>, vector<8x32xf32> -> vector<8x32xf32>
    %1031 = arith.addf %1027, %1030 : vector<8x32xf32>
    %c0_777 = arith.constant 0 : index
    %c0_778 = arith.constant 0 : index
    %c0_779 = arith.constant 0 : index
    %1032 = vector.load %arg8[%c0_777, %c0_778, %c0_779] : memref<4x1x32xf32, #tpu.memory_space<vmem>>, vector<1x1x32xf32>
    %1033 = vector.shape_cast %1032 : vector<1x1x32xf32> to vector<1x32xf32>
    %1034 = vector.broadcast %1033 : vector<1x32xf32> to vector<8x32xf32>
    %1035 = arith.addf %1031, %1034 : vector<8x32xf32>
    %1036 = arith.negf %1035 : vector<8x32xf32>
    %1037 = math.exp %1036 : vector<8x32xf32>
    %cst_780 = arith.constant 1.000000e+00 : f32
    %1038 = vector.broadcast %cst_780 : f32 to vector<8x32xf32>
    %1039 = arith.addf %1038, %1037 : vector<8x32xf32>
    %1040 = arith.divf %1038, %1039 : vector<8x32xf32>
    %c1_781 = arith.constant 1 : index
    %c0_782 = arith.constant 0 : index
    %c0_783 = arith.constant 0 : index
    %1041 = vector.load %arg6[%c1_781, %c0_782, %c0_783] : memref<4x8x32xf32, #tpu.memory_space<vmem>>, vector<1x8x32xf32>
    %1042 = vector.shape_cast %1041 : vector<1x8x32xf32> to vector<8x32xf32>
    %cst_784 = arith.constant dense<0.000000e+00> : vector<8x32xf32>
    %1043 = tpu.matmul %1024, %1042, %cst_784 {dimension_numbers = #tpu.dot_dimension_numbers<[1], [0], [0], [1], [0, 0, 1, 1], [], []>} : vector<8x8xf32>, vector<8x32xf32>, vector<8x32xf32> -> vector<8x32xf32>
    %c1_785 = arith.constant 1 : index
    %c0_786 = arith.constant 0 : index
    %c0_787 = arith.constant 0 : index
    %1044 = vector.load %arg7[%c1_785, %c0_786, %c0_787] : memref<4x8x32xf32, #tpu.memory_space<vmem>>, vector<1x8x32xf32>
    %1045 = vector.shape_cast %1044 : vector<1x8x32xf32> to vector<8x32xf32>
    %cst_788 = arith.constant dense<0.000000e+00> : vector<8x32xf32>
    %1046 = tpu.matmul %955, %1045, %cst_788 {dimension_numbers = #tpu.dot_dimension_numbers<[1], [0], [0], [1], [0, 0, 1, 1], [], []>} : vector<8x8xf32>, vector<8x32xf32>, vector<8x32xf32> -> vector<8x32xf32>
    %1047 = arith.addf %1043, %1046 : vector<8x32xf32>
    %c1_789 = arith.constant 1 : index
    %c0_790 = arith.constant 0 : index
    %c0_791 = arith.constant 0 : index
    %1048 = vector.load %arg8[%c1_789, %c0_790, %c0_791] : memref<4x1x32xf32, #tpu.memory_space<vmem>>, vector<1x1x32xf32>
    %1049 = vector.shape_cast %1048 : vector<1x1x32xf32> to vector<1x32xf32>
    %1050 = vector.broadcast %1049 : vector<1x32xf32> to vector<8x32xf32>
    %1051 = arith.addf %1047, %1050 : vector<8x32xf32>
    %1052 = arith.negf %1051 : vector<8x32xf32>
    %1053 = math.exp %1052 : vector<8x32xf32>
    %cst_792 = arith.constant 1.000000e+00 : f32
    %1054 = vector.broadcast %cst_792 : f32 to vector<8x32xf32>
    %1055 = arith.addf %1054, %1053 : vector<8x32xf32>
    %1056 = arith.divf %1054, %1055 : vector<8x32xf32>
    %c2_793 = arith.constant 2 : index
    %c0_794 = arith.constant 0 : index
    %c0_795 = arith.constant 0 : index
    %1057 = vector.load %arg6[%c2_793, %c0_794, %c0_795] : memref<4x8x32xf32, #tpu.memory_space<vmem>>, vector<1x8x32xf32>
    %1058 = vector.shape_cast %1057 : vector<1x8x32xf32> to vector<8x32xf32>
    %cst_796 = arith.constant dense<0.000000e+00> : vector<8x32xf32>
    %1059 = tpu.matmul %1024, %1058, %cst_796 {dimension_numbers = #tpu.dot_dimension_numbers<[1], [0], [0], [1], [0, 0, 1, 1], [], []>} : vector<8x8xf32>, vector<8x32xf32>, vector<8x32xf32> -> vector<8x32xf32>
    %c2_797 = arith.constant 2 : index
    %c0_798 = arith.constant 0 : index
    %c0_799 = arith.constant 0 : index
    %1060 = vector.load %arg7[%c2_797, %c0_798, %c0_799] : memref<4x8x32xf32, #tpu.memory_space<vmem>>, vector<1x8x32xf32>
    %1061 = vector.shape_cast %1060 : vector<1x8x32xf32> to vector<8x32xf32>
    %cst_800 = arith.constant dense<0.000000e+00> : vector<8x32xf32>
    %1062 = tpu.matmul %955, %1061, %cst_800 {dimension_numbers = #tpu.dot_dimension_numbers<[1], [0], [0], [1], [0, 0, 1, 1], [], []>} : vector<8x8xf32>, vector<8x32xf32>, vector<8x32xf32> -> vector<8x32xf32>
    %1063 = arith.addf %1059, %1062 : vector<8x32xf32>
    %c2_801 = arith.constant 2 : index
    %c0_802 = arith.constant 0 : index
    %c0_803 = arith.constant 0 : index
    %1064 = vector.load %arg8[%c2_801, %c0_802, %c0_803] : memref<4x1x32xf32, #tpu.memory_space<vmem>>, vector<1x1x32xf32>
    %1065 = vector.shape_cast %1064 : vector<1x1x32xf32> to vector<1x32xf32>
    %1066 = vector.broadcast %1065 : vector<1x32xf32> to vector<8x32xf32>
    %1067 = arith.addf %1063, %1066 : vector<8x32xf32>
    %1068 = math.tanh %1067 : vector<8x32xf32>
    %c3_804 = arith.constant 3 : index
    %c0_805 = arith.constant 0 : index
    %c0_806 = arith.constant 0 : index
    %1069 = vector.load %arg6[%c3_804, %c0_805, %c0_806] : memref<4x8x32xf32, #tpu.memory_space<vmem>>, vector<1x8x32xf32>
    %1070 = vector.shape_cast %1069 : vector<1x8x32xf32> to vector<8x32xf32>
    %cst_807 = arith.constant dense<0.000000e+00> : vector<8x32xf32>
    %1071 = tpu.matmul %1024, %1070, %cst_807 {dimension_numbers = #tpu.dot_dimension_numbers<[1], [0], [0], [1], [0, 0, 1, 1], [], []>} : vector<8x8xf32>, vector<8x32xf32>, vector<8x32xf32> -> vector<8x32xf32>
    %c3_808 = arith.constant 3 : index
    %c0_809 = arith.constant 0 : index
    %c0_810 = arith.constant 0 : index
    %1072 = vector.load %arg7[%c3_808, %c0_809, %c0_810] : memref<4x8x32xf32, #tpu.memory_space<vmem>>, vector<1x8x32xf32>
    %1073 = vector.shape_cast %1072 : vector<1x8x32xf32> to vector<8x32xf32>
    %cst_811 = arith.constant dense<0.000000e+00> : vector<8x32xf32>
    %1074 = tpu.matmul %955, %1073, %cst_811 {dimension_numbers = #tpu.dot_dimension_numbers<[1], [0], [0], [1], [0, 0, 1, 1], [], []>} : vector<8x8xf32>, vector<8x32xf32>, vector<8x32xf32> -> vector<8x32xf32>
    %1075 = arith.addf %1071, %1074 : vector<8x32xf32>
    %c3_812 = arith.constant 3 : index
    %c0_813 = arith.constant 0 : index
    %c0_814 = arith.constant 0 : index
    %1076 = vector.load %arg8[%c3_812, %c0_813, %c0_814] : memref<4x1x32xf32, #tpu.memory_space<vmem>>, vector<1x1x32xf32>
    %1077 = vector.shape_cast %1076 : vector<1x1x32xf32> to vector<1x32xf32>
    %1078 = vector.broadcast %1077 : vector<1x32xf32> to vector<8x32xf32>
    %1079 = arith.addf %1075, %1078 : vector<8x32xf32>
    %1080 = arith.negf %1079 : vector<8x32xf32>
    %1081 = math.exp %1080 : vector<8x32xf32>
    %cst_815 = arith.constant 1.000000e+00 : f32
    %1082 = vector.broadcast %cst_815 : f32 to vector<8x32xf32>
    %1083 = arith.addf %1082, %1081 : vector<8x32xf32>
    %1084 = arith.divf %1082, %1083 : vector<8x32xf32>
    %1085 = arith.mulf %1056, %951 : vector<8x32xf32>
    %1086 = arith.mulf %1040, %1068 : vector<8x32xf32>
    %1087 = arith.addf %1085, %1086 : vector<8x32xf32>
    %1088 = math.tanh %1087 : vector<8x32xf32>
    %1089 = arith.mulf %1084, %1088 : vector<8x32xf32>
    %c0_816 = arith.constant 0 : index
    %c0_817 = arith.constant 0 : index
    %1090 = vector.load %arg9[%c0_816, %c0_817] : memref<32x8xf32, #tpu.memory_space<vmem>>, vector<32x8xf32>
    %cst_818 = arith.constant dense<0.000000e+00> : vector<8x8xf32>
    %1091 = tpu.matmul %1089, %1090, %cst_818 {dimension_numbers = #tpu.dot_dimension_numbers<[1], [0], [0], [1], [0, 0, 1, 1], [], []>} : vector<8x32xf32>, vector<32x8xf32>, vector<8x8xf32> -> vector<8x8xf32>
    %1092 = arith.addf %1024, %1091 : vector<8x8xf32>
    %cst_819 = arith.constant 5.000000e-01 : f32
    %1093 = vector.broadcast %cst_819 : f32 to vector<8x8xf32>
    %1094 = arith.mulf %1092, %1093 : vector<8x8xf32>
    %c0_820 = arith.constant 0 : index
    %c0_821 = arith.constant 0 : index
    %1095 = vector.load %arg10[%c0_820, %c0_821] : memref<8x8xf32, #tpu.memory_space<vmem>>, vector<8x8xf32>
    tpu.vector_store %arg10[%c0_820, %c0_821], %1094 {strides = array<i32>} : memref<8x8xf32, #tpu.memory_space<vmem>>, vector<8x8xf32>,
    return
  }
  func.func @transform_0(%arg0: i32) -> (i32, i32, i32) {
    %c0_i32 = arith.constant 0 : i32
    %c0_i32_0 = arith.constant 0 : i32
    %c0_i32_1 = arith.constant 0 : i32
    %c0_i32_2 = arith.constant 0 : i32
    return %c0_i32, %c0_i32_0, %c0_i32_1 : i32, i32, i32
  }
  func.func @transform_1(%arg0: i32) -> (i32, i32, i32) {
    %c0_i32 = arith.constant 0 : i32
    %c0_i32_0 = arith.constant 0 : i32
    %c0_i32_1 = arith.constant 0 : i32
    %c0_i32_2 = arith.constant 0 : i32
    return %c0_i32, %c0_i32_0, %c0_i32_1 : i32, i32, i32
  }
  func.func @transform_2(%arg0: i32) -> (i32, i32, i32) {
    %c0_i32 = arith.constant 0 : i32
    %c0_i32_0 = arith.constant 0 : i32
    %c0_i32_1 = arith.constant 0 : i32
    %c0_i32_2 = arith.constant 0 : i32
    return %c0_i32, %c0_i32_0, %c0_i32_1 : i32, i32, i32
  }
  func.func @transform_3(%arg0: i32) -> (i32, i32, i32) {
    %c0_i32 = arith.constant 0 : i32
    %c0_i32_0 = arith.constant 0 : i32
    %c0_i32_1 = arith.constant 0 : i32
    %c0_i32_2 = arith.constant 0 : i32
    return %c0_i32, %c0_i32_0, %c0_i32_1 : i32, i32, i32
  }
  func.func @transform_4(%arg0: i32) -> (i32, i32) {
    %c0_i32 = arith.constant 0 : i32
    %c0_i32_0 = arith.constant 0 : i32
    %c0_i32_1 = arith.constant 0 : i32
    return %c0_i32, %c0_i32_0 : i32, i32
  }
  func.func @transform_5(%arg0: i32) -> (i32, i32, i32) {
    %c0_i32 = arith.constant 0 : i32
    %c0_i32_0 = arith.constant 0 : i32
    %c0_i32_1 = arith.constant 0 : i32
    %c0_i32_2 = arith.constant 0 : i32
    return %c0_i32, %c0_i32_0, %c0_i32_1 : i32, i32, i32
  }
  func.func @transform_6(%arg0: i32) -> (i32, i32, i32) {
    %c0_i32 = arith.constant 0 : i32
    %c0_i32_0 = arith.constant 0 : i32
    %c0_i32_1 = arith.constant 0 : i32
    %c0_i32_2 = arith.constant 0 : i32
    return %c0_i32, %c0_i32_0, %c0_i32_1 : i32, i32, i32
  }
  func.func @transform_7(%arg0: i32) -> (i32, i32, i32) {
    %c0_i32 = arith.constant 0 : i32
    %c0_i32_0 = arith.constant 0 : i32
    %c0_i32_1 = arith.constant 0 : i32
    %c0_i32_2 = arith.constant 0 : i32
    return %c0_i32, %c0_i32_0, %c0_i32_1 : i32, i32, i32
  }
  func.func @transform_8(%arg0: i32) -> (i32, i32) {
    %c0_i32 = arith.constant 0 : i32
    %c0_i32_0 = arith.constant 0 : i32
    %c0_i32_1 = arith.constant 0 : i32
    return %c0_i32, %c0_i32_0 : i32, i32
  }
  func.func @transform_9(%arg0: i32) -> (i32, i32) {
    %c0_i32 = arith.constant 0 : i32
    %c0_i32_0 = arith.constant 0 : i32
    %c0_i32_1 = arith.constant 0 : i32
    return %c0_i32, %c0_i32_0 : i32, i32
  }
}

</mosaic_0001>

<bundles_post_ra>
// kernel: lstm_encoder_forward.1
= control target key start
LH: loop header
LB: loop body
LE: loop exit
PB: predicated region body
PF: predicated region fallthrough
CT: control target
= control target key end

     0   :  { %v12656_v1 = vmov 0.0   ;;  %vm12657_vm0 = vmmov 0   ;;  %vm114_vm1 = vcmask 1043456   ;;  %s14120_s0 = inlined_call_operand.vmem [shape: f32[8,8,4], index: 0, kind: input, shape index: {}]   ;;  %s14121_s1 = inlined_call_operand.vmem [shape: f32[4,4,32], index: 1, kind: input, shape index: {}]   ;;  %s14122_s2 = inlined_call_operand.vmem [shape: f32[4,8,32], index: 2, kind: input, shape index: {}]   ;;  %s14123_s3 = inlined_call_operand.vmem [shape: f32[4,1,32], index: 3, kind: input, shape index: {}]   ;;  %s14124_s4 = inlined_call_operand.vmem [shape: f32[32,8], index: 4, kind: input, shape index: {}]   ;;  %s14125_s5 = inlined_call_operand.vmem [shape: f32[4,8,32], index: 5, kind: input, shape index: {}]   ;;  %s14126_s6 = inlined_call_operand.vmem [shape: f32[4,8,32], index: 6, kind: input, shape index: {}]   ;;  %s14127_s7 = inlined_call_operand.vmem [shape: f32[4,1,32], index: 7, kind: input, shape index: {}]   ;;  %s14128_s8 = inlined_call_operand.vmem [shape: f32[32,8], index: 8, kind: input, shape index: {}]   ;;  %s14129_s9 = inlined_call_operand.hbm [shape: f32[8,8], index: 9, kind: output, shape index: {}]  }
   0x1   :  { %v12713_v0 = vld [vmem:[%s14122_s2] sm:$0xff]  ;;  %11412 = vmatprep.subr.mxu1 %v12656_v1  ;;  %11414 = vmatprep.mubr.msk.f32.mxu1 %vm12657_vm0, %v12656_v1  ;;  %v12728_v3 = vld [vmem:[%s14122_s2 + $0x8] sm:$0xff] }
   0x2   :  { %v12721_v2 = vld [vmem:[%s14121_s1] sm:$0xf]  ;;  %11413 = vmatpush3.msra.mxu1 %v12713_v0  ;;  %11422 = vmatprep.subr.mxu0 %v12656_v1 }
   0x3   :  { %11415 = vmatmul.mubr.f32.vlgmr.msra.gmra.mrb[0].mxu1 %v12656_v1  ;;  %11417 = vmatprep.subr.mxu1 %v12656_v1 }
   0x4   :  { %14 = vsyncpa [#allocation3], 0  ;;  %11418 = vmatpush3.msk.msra.mxu1 %vm114_vm1, %v12721_v2  ;;  %11419 = vmatprep.mubr.msk.f32.mxu1 %vm12657_vm0, %v12656_v1  ;;  %v33_v4 = vld [vmem:[%s14120_s0] sm:$0xff]  ;;  %vm110_vm2 = vcmask 31744   ;;  %v12752_v6 = vld [vmem:[%s14122_s2 + $0x10] sm:$0xff]  ;;  %v12658_v13 = vmov 0.0|0.0  }
   0x5   :  { %11427 = vmatprep.subr.mxu1 %v12656_v1  ;;  %v12743_v5 = vld [vmem:[%s14121_s1 + $0x4] sm:$0xf]  ;;  %11423 = vmatpush3.msra.mxu0 %v12728_v3  ;;  %v12765_v7 = vld [vmem:[%s14121_s1 + $0x8] sm:$0xf]  ;;  %v12773_v8 = vld [vmem:[%s14122_s2 + $0x18] sm:$0xff]  ;;  %vm692_vm3 = vcmask 261120  }
   0x6   :  { %11424 = vmatprep.mubr.msk.f32.mxu0 %vm12657_vm0, %v12656_v1  ;;  %11432 = vmatprep.subr.mxu0 %v12656_v1  ;;  %v12786_v9 = vld [vmem:[%s14121_s1 + $0xc] sm:$0xf]  ;;  %v688_v10 = vld [vmem:[%s14124_s4] sm:$0xff]  ;;  %v690_v12 = vld [vmem:[%s14124_s4 + $0x10] sm:$0xff]  ;;  %vm36_vm4 = vcmask 64512  }
   0x7   :  { %11420 = vmatmul.mubr.msk.f32.vlgmr.msra.gmra.mrb[2].mxu1 %vm110_vm2, %v33_v4  ;;  %11425 = vmatmul.mubr.f32.vlgmr.msra.gmra.mrb[0].mxu0 %v12656_v1  ;;  %v689_v11 = vld [vmem:[%s14124_s4 + $0x8] sm:$0xff]  ;;  %v691_v15 = vld [vmem:[%s14124_s4 + $0x18] sm:$0xff]  ;;  %v12826_v17 = vld [vmem:[%s14126_s6] sm:$0xff] }
   0x8   :  { %11428 = vmatpush3.msk.msra.mxu1 %vm114_vm1, %v12743_v5  ;;  %11429 = vmatprep.mubr.msk.f32.mxu1 %vm12657_vm0, %v12656_v1  ;;  %v12812_v14 = vpack.c.bf16 %v689_v11, %v688_v10  ;;  %v12818_v16 = vpack.c.bf16 %v691_v15, %v690_v12  ;;  %v12831_v18 = vld [vmem:[%s14125_s5] sm:$0xff]  ;;  %v12873_v10 = vld [vmem:[%s14126_s6 + $0x8] sm:$0xff]  ;;  %v12883_v11 = vld [vmem:[%s14126_s6 + $0x10] sm:$0xff] }
   0x9   :  { %11437 = vmatprep.subr.mxu1 %v12656_v1  ;;  %11433 = vmatpush3.msra.mxu0 %v12752_v6  ;;  %v12843_v22 = vld [vmem:[%s14123_s3] ss:$0 sm:$0xff]  ;;  %v12849_v29 = vld [vmem:[%s14123_s3 + $0x1] ss:$0 sm:$0xff]  ;;  %v12855_v42 = vld [vmem:[%s14123_s3 + $0x2] ss:$0 sm:$0xff] }
   0xa   :  { %11434 = vmatprep.mubr.msk.f32.mxu0 %vm12657_vm0, %v12656_v1  ;;  %11442 = vmatprep.subr.mxu0 %v12656_v1  ;;  %v12860_v44 = vld [vmem:[%s14123_s3 + $0x3] ss:$0 sm:$0xff]  ;;  %v12893_v12 = vld [vmem:[%s14126_s6 + $0x18] sm:$0xff] }
   0xb   :  { %11430 = vmatmul.mubr.msk.f32.vlgmr.msra.gmra.mrb[4].mxu1 %vm110_vm2, %v33_v4  ;;  %11435 = vmatmul.mubr.f32.vlgmr.msra.gmra.mrb[2].mxu0 %v12656_v1 }
   0xc   :  { %11438 = vmatpush3.msk.msra.mxu1 %vm114_vm1, %v12765_v7  ;;  %11439 = vmatprep.mubr.msk.f32.mxu1 %vm12657_vm0, %v12656_v1 }
   0xd   :  { %11447 = vmatprep.subr.mxu1 %v12656_v1  ;;  %11443 = vmatpush3.msra.mxu0 %v12773_v8 }
   0xe   :  { %11444 = vmatprep.mubr.msk.f32.mxu0 %vm12657_vm0, %v12656_v1  ;;  %12228 = vmatprep.subr.bf16.mxu0 %v12658_v13 }
   0xf   :  { %11440 = vmatmul.mubr.msk.f32.vlgmr.msra.gmra.mrb[6].mxu1 %vm110_vm2, %v33_v4  ;;  %11445 = vmatmul.mubr.f32.vlgmr.msra.gmra.mrb[4].mxu0 %v12656_v1 }
  0x10   :  { %11448 = vmatpush3.msk.msra.mxu1 %vm114_vm1, %v12786_v9  ;;  %11449 = vmatprep.mubr.msk.f32.mxu1 %vm12657_vm0, %v12656_v1 }
  0x11   :  { %11460 = vmatprep.mubr.msk.f32.mxu0 %vm12657_vm0, %v12656_v1  ;;  %11463 = vmatprep.subr.mxu1 %v12656_v1 }
  0x12   :  { %12230 = vmatpush3.bf16.msra.mxu0 %v12812_v14 }
  0x13   :  { %11450 = vmatmul.mubr.msk.f32.vlgmr.msra.gmra.mrb[8].mxu1 %vm110_vm2, %v33_v4  ;;  %12231 = vmatprep.subr.bf16.mxu0 %v12658_v13 }
  0x14   :  { %11465 = vmatprep.mubr.msk.f32.mxu1 %vm12657_vm0, %v12656_v1  ;;  %11464 = vmatpush3.msra.mxu1 %v12826_v17 }
  0x15   :  { %11468 = vmatprep.subr.mxu1 %v12656_v1 }
  0x16   :  { %12233 = vmatpush3.bf16.msra.mxu0 %v12818_v16 }
  0x17   :  { %11473 = vmatprep.subr.mxu0 %v12656_v1  ;;  %11466 = vmatmul.mubr.f32.vlgmr.msra.gmra.mrb[10].mxu1 %v12656_v1 }
  0x18   :  { %11469 = vmatpush3.msra.mxu1 %v12831_v18  ;;  %11470 = vmatprep.mubr.msk.f32.mxu1 %vm12657_vm0, %v12656_v1 }
  0x19   :  { %11478 = vmatprep.subr.mxu1 %v12656_v1 }
  0xd6   :  { %v106_v19 = vpop.f32.mrb[0].mxu1 }
  0xd7   :  { %v11416_v20 = vpop.f32.mrb[1].mxu1 }
  0xd8   :  { %v12905_v20 = vld [vmem:[%s14125_s5 + $0x8] sm:$0xff] }
  0xda   :  { %v184_v21 = vpop.f32.mrb[2].mxu1  ;;  %v272_v23 = vpop.f32.mrb[0].mxu0 }
  0xdb   :  { %v185_v24 = vadd.f32 %v184_v21, %v106_v19  ;;  %v11421_v25 = vpop.f32.mrb[3].mxu1  ;;  %v11426_v26 = vpop.f32.mrb[1].mxu0 }
  0xdc   :  { %v12929_v25 = vld [vmem:[%s14125_s5 + $0x18] sm:$0xff]  ;;  %v10873_v26 = vld [vmem:[%s14120_s0 + $0x8] sm:$0xff] }
  0xdd   :  { %v195_v27 = vadd.f32 %v12843_v22, %v185_v24  ;;  %v12918_v24 = vld [vmem:[%s14125_s5 + $0x10] sm:$0xff] }
  0xde   :  { %v345_v28 = vpop.f32.mrb[4].mxu1  ;;  %v434_v30 = vpop.f32.mrb[2].mxu0 }
  0xdf   :  { %v10830_v31 = vmul.f32 -1.442695, %v195_v27  ;;  %v346_v32 = vadd.f32 %v345_v28, %v272_v23  ;;  %v11431_v33 = vpop.f32.mrb[5].mxu1  ;;  %v11436_v34 = vpop.f32.mrb[3].mxu0 }
  0xe0   :  { %v1402_v34 = vld [vmem:[%s14128_s8] sm:$0xff] }
  0xe1   :  { %12328 = vpow2.f32 %v10830_v31  ;;  %v357_v35 = vadd.f32 %v12849_v29, %v346_v32 }
  0xe2   :  { %v507_v36 = vpop.f32.mrb[6].mxu1  ;;  %v591_v37 = vpop.f32.mrb[4].mxu0 }
  0xe3   :  { %v10837_v38 = vmul.f32 -1.442695, %v357_v35  ;;  %v508_v39 = vadd.f32 %v507_v36, %v434_v30  ;;  %v11441_v40 = vpop.f32.mrb[7].mxu1  ;;  %v11446_v41 = vpop.f32.mrb[5].mxu0  ;;  %v1403_v35 = vld [vmem:[%s14128_s8 + $0x8] sm:$0xff]  ;;  %v1404_v36 = vld [vmem:[%s14128_s8 + $0x10] sm:$0xff] }
  0xe4   :  { %v12999_v41 = vld [vmem:[%s14127_s7] ss:$0 sm:$0xff] }
  0xe5   :  { %12330 = vpow2.f32 %v10837_v38  ;;  %v519_v47 = vadd.f32 %v12855_v42, %v508_v39  ;;  %v1405_v38 = vld [vmem:[%s14128_s8 + $0x18] sm:$0xff] }
  0xe6   :  { %v664_v43 = vpop.f32.mrb[8].mxu1  ;;  %v12991_v39 = vpack.c.bf16 %v1405_v38, %v1404_v36 }
  0xe7   :  { %v665_v45 = vadd.f32 %v664_v43, %v591_v37  ;;  %v11451_v46 = vpop.f32.mrb[9].mxu1  ;;  %12332 = vtanh.f32 %v519_v47  ;;  %v12985_v37 = vpack.c.bf16 %v1403_v35, %v1402_v34 }
  0xe9   :  { %v676_v48 = vadd.f32 %v12860_v44, %v665_v45 }
  0xea   :  { %v12900_v15 = vpop.f32.mrb[10].mxu1 }
  0xeb   :  { %v12329_v49 = vpop.eup %12328  ;;  %v10850_v50 = vmul.f32 -1.442695, %v676_v48  ;;  %v11467_v19 = vpop.f32.mrb[11].mxu1  ;;  %v13006_v48 = vld [vmem:[%s14127_s7 + $0x1] ss:$0 sm:$0xff] }
  0xec   :  { %v199_v51 = vadd.f32 1.0, %v12329_v49 }
  0xed   :  { %12334 = vpow2.f32 %v10850_v50 }
  0xee   :  { %12336 = vrcp.f32 %v199_v51 }
  0xef   :  { %v12331_v52 = vpop.eup %12330 }
  0xf0   :  { %v361_v53 = vadd.f32 1.0, %v12331_v52 }
  0xf1   :  { %v12333_v54 = vpop.eup %12332 }
  0xf2   :  { %12338 = vrcp.f32 %v361_v53 }
  0xf7   :  { %v12335_v55 = vpop.eup %12334 }
  0xf8   :  { %v12337_v56 = vpop.eup %12336  ;;  %v680_v58 = vadd.f32 1.0, %v12335_v55 }
  0xf9   :  { %v684_v57 = vmul.f32 %v12337_v56, %v12333_v54 }
  0xfa   :  { %12340 = vrcp.f32 %v680_v58 }
  0xfc   :  { %v12339_v59 = vpop.eup %12338 }
  0xfd   :  { %v683_v60 = vmul.f32 0.0, %v12339_v59  ;;  %v13017_v59 = vld [vmem:[%s14127_s7 + $0x3] ss:$0 sm:$0xff] }
  0xff   :  { %v12864_v61 = vadd.f32 %v684_v57, %v683_v60  ;;  %v13012_v57 = vld [vmem:[%s14127_s7 + $0x2] ss:$0 sm:$0xff] }
 0x101   :  { %12342 = vtanh.f32 %v12864_v61 }
 0x104   :  { %v12341_v62 = vpop.eup %12340 }
 0x10b   :  { %v12343_v63 = vpop.eup %12342 }
 0x10c   :  { %v687_v4 = vmul.f32 %v12343_v63, %v12341_v62 }
 0x10e   :  { %11461 = vmatmul.mubr.msk.f32.vlgmr.msra.gmra.mrb[6].mxu0 %vm692_vm3, %v687_v4 }
 0x10f   :  { %11475 = vmatprep.mubr.msk.f32.mxu0 %vm12657_vm0, %v12656_v1  ;;  %11474 = vmatpush3.msra.mxu0 %v12873_v10 }
 0x110   :  { %11483 = vmatprep.subr.mxu0 %v12656_v1 }
 0x112   :  { %11476 = vmatmul.mubr.f32.vlgmr.msra.gmra.mrb[8].mxu0 %v12656_v1 }
 0x113   :  { %11485 = vmatprep.mubr.msk.f32.mxu0 %vm12657_vm0, %v12656_v1  ;;  %11484 = vmatpush3.msra.mxu0 %v12883_v11 }
 0x114   :  { %11493 = vmatprep.subr.mxu0 %v12656_v1 }
 0x116   :  { %11486 = vmatmul.mubr.f32.vlgmr.msra.gmra.mrb[10].mxu0 %v12656_v1 }
 0x117   :  { %11495 = vmatprep.mubr.msk.f32.mxu0 %vm12657_vm0, %v12656_v1  ;;  %11494 = vmatpush3.msra.mxu0 %v12893_v12 }
 0x118   :  { %12234 = vmatprep.subr.bf16.mxu0 %v12658_v13 }
 0x11a   :  { %11496 = vmatmul.mubr.f32.vlgmr.msra.gmra.mrb[12].mxu0 %v12656_v1 }
 0x11b   :  { %11511 = vmatprep.mubr.msk.f32.mxu0 %vm12657_vm0, %v12656_v1  ;;  %12236 = vmatpush3.bf16.msra.mxu0 %v12985_v37 }
 0x11c   :  { %12237 = vmatprep.subr.bf16.mxu0 %v12658_v13 }
 0x11f   :  { %12239 = vmatpush3.bf16.msra.mxu0 %v12991_v39 }
 0x120   :  { %11524 = vmatprep.subr.mxu0 %v12656_v1 }
 0x1e1   :  { %v12907_v21 = vpop.f32.mrb[6].mxu0 }
 0x1e2   :  { %v11462_v23 = vpop.f32.mrb[7].mxu0  ;;  %11471 = vmatmul.mubr.msk.f32.vlgmr.msra.gmra.mrb[12].mxu1 %vm36_vm4, %v12907_v21 }
 0x1e3   :  { %11479 = vmatpush3.msra.mxu1 %v12905_v20  ;;  %11480 = vmatprep.mubr.msk.f32.mxu1 %vm12657_vm0, %v12656_v1 }
 0x1e4   :  { %11488 = vmatprep.subr.mxu1 %v12656_v1 }
 0x1e5   :  { %v995_v27 = vpop.f32.mrb[8].mxu0 }
 0x1e6   :  { %11481 = vmatmul.mubr.msk.f32.vlgmr.msra.gmra.mrb[14].mxu1 %vm36_vm4, %v12907_v21  ;;  %v11477_v28 = vpop.f32.mrb[9].mxu0 }
 0x1e7   :  { %11489 = vmatpush3.msra.mxu1 %v12918_v24  ;;  %11490 = vmatprep.mubr.msk.f32.mxu1 %vm12657_vm0, %v12656_v1 }
 0x1e8   :  { %11498 = vmatprep.subr.mxu1 %v12656_v1 }
 0x1e9   :  { %v1154_v30 = vpop.f32.mrb[10].mxu0 }
 0x1ea   :  { %11491 = vmatmul.mubr.msk.f32.vlgmr.msra.gmra.mrb[16].mxu1 %vm36_vm4, %v12907_v21  ;;  %v11487_v31 = vpop.f32.mrb[11].mxu0 }
 0x1eb   :  { %11499 = vmatpush3.msra.mxu1 %v12929_v25  ;;  %11500 = vmatprep.mubr.msk.f32.mxu1 %vm12657_vm0, %v12656_v1 }
 0x1ec   :  { %11514 = vmatprep.subr.mxu1 %v12656_v1 }
 0x1ed   :  { %v1308_v32 = vpop.f32.mrb[12].mxu0 }
 0x1ee   :  { %11501 = vmatmul.mubr.msk.f32.vlgmr.msra.gmra.mrb[18].mxu1 %vm36_vm4, %v12907_v21  ;;  %v11497_v33 = vpop.f32.mrb[13].mxu0 }
 0x1ef   :  { %11515 = vmatpush3.msra.mxu1 %v12713_v0  ;;  %11516 = vmatprep.mubr.msk.f32.mxu1 %vm12657_vm0, %v12656_v1 }
 0x1f0   :  { %11519 = vmatprep.subr.mxu1 %v12656_v1 }
 0x1f2   :  { %11517 = vmatmul.mubr.msk.f32.vlgmr.msra.gmra.mrb[20].mxu1 %vm36_vm4, %v12907_v21 }
 0x1f3   :  { %11520 = vmatpush3.msk.msra.mxu1 %vm114_vm1, %v12721_v2  ;;  %11521 = vmatprep.mubr.msk.f32.mxu1 %vm12657_vm0, %v12656_v1 }
 0x1f4   :  { %11529 = vmatprep.subr.mxu1 %v12656_v1 }
 0x1f6   :  { %11522 = vmatmul.mubr.msk.f32.vlgmr.msra.gmra.mrb[22].mxu1 %vm110_vm2, %v10873_v26 }
 0x1f7   :  { %11530 = vmatpush3.msk.msra.mxu1 %vm114_vm1, %v12743_v5  ;;  %11531 = vmatprep.mubr.msk.f32.mxu1 %vm12657_vm0, %v12656_v1 }
 0x1f8   :  { %11539 = vmatprep.subr.mxu1 %v12656_v1 }
 0x1fa   :  { %11532 = vmatmul.mubr.msk.f32.vlgmr.msra.gmra.mrb[24].mxu1 %vm110_vm2, %v10873_v26 }
 0x1fb   :  { %11540 = vmatpush3.msk.msra.mxu1 %vm114_vm1, %v12765_v7  ;;  %11541 = vmatprep.mubr.msk.f32.mxu1 %vm12657_vm0, %v12656_v1 }
 0x1fc   :  { %11549 = vmatprep.subr.mxu1 %v12656_v1 }
 0x1fe   :  { %11542 = vmatmul.mubr.msk.f32.vlgmr.msra.gmra.mrb[26].mxu1 %vm110_vm2, %v10873_v26 }
 0x1ff   :  { %11550 = vmatpush3.msk.msra.mxu1 %vm114_vm1, %v12786_v9  ;;  %11551 = vmatprep.mubr.msk.f32.mxu1 %vm12657_vm0, %v12656_v1 }
 0x200   :  { %11565 = vmatprep.subr.mxu1 %v12656_v1 }
 0x202   :  { %11552 = vmatmul.mubr.msk.f32.vlgmr.msra.gmra.mrb[28].mxu1 %vm110_vm2, %v10873_v26 }
 0x203   :  { %11566 = vmatpush3.msra.mxu1 %v12826_v17  ;;  %11567 = vmatprep.mubr.msk.f32.mxu1 %vm12657_vm0, %v12656_v1 }
 0x204   :  { %11570 = vmatprep.subr.mxu1 %v12656_v1 }
 0x2b5   :  { %v907_v40 = vpop.f32.mrb[12].mxu1 }
 0x2b6   :  { %v908_v43 = vadd.f32 %v907_v40, %v12900_v15  ;;  %v11472_v45 = vpop.f32.mrb[13].mxu1 }
 0x2b8   :  { %v918_v46 = vadd.f32 %v12999_v41, %v908_v43 }
 0x2b9   :  { %v1065_v47 = vpop.f32.mrb[14].mxu1 }
 0x2ba   :  { %v10854_v49 = vmul.f32 -1.442695, %v918_v46  ;;  %v1066_v50 = vadd.f32 %v1065_v47, %v995_v27  ;;  %v11482_v51 = vpop.f32.mrb[15].mxu1 }
 0x2bc   :  { %12344 = vpow2.f32 %v10854_v49  ;;  %v1077_v52 = vadd.f32 %v13006_v48, %v1066_v50 }
 0x2bd   :  { %v1224_v53 = vpop.f32.mrb[16].mxu1 }
 0x2be   :  { %v10860_v54 = vmul.f32 -1.442695, %v1077_v52  ;;  %v1225_v55 = vadd.f32 %v1224_v53, %v1154_v30  ;;  %v11492_v56 = vpop.f32.mrb[17].mxu1 }
 0x2c0   :  { %12346 = vpow2.f32 %v10860_v54  ;;  %v1236_v63 = vadd.f32 %v13012_v57, %v1225_v55 }
 0x2c1   :  { %v1378_v58 = vpop.f32.mrb[18].mxu1 }
 0x2c2   :  { %v1379_v60 = vadd.f32 %v1378_v58, %v1308_v32  ;;  %v11502_v62 = vpop.f32.mrb[19].mxu1  ;;  %12348 = vtanh.f32 %v1236_v63 }
 0x2c4   :  { %v1390_v4 = vadd.f32 %v13017_v59, %v1379_v60 }
 0x2c5   :  { %v1547_v15 = vpop.f32.mrb[20].mxu1 }
 0x2c6   :  { %v12345_v19 = vpop.eup %12344  ;;  %v10871_v23 = vmul.f32 -1.442695, %v1390_v4  ;;  %v11518_v26 = vpop.f32.mrb[21].mxu1 }
 0x2c7   :  { %v922_v27 = vadd.f32 1.0, %v12345_v19 }
 0x2c9   :  { %12350 = vrcp.f32 %v922_v27  ;;  %v1620_v28 = vpop.f32.mrb[22].mxu1 }
 0x2ca   :  { %v12347_v30 = vpop.eup %12346  ;;  %12352 = vpow2.f32 %v10871_v23  ;;  %v1621_v31 = vadd.f32 %v1620_v28, %v1547_v15  ;;  %v11523_v33 = vpop.f32.mrb[23].mxu1 }
 0x2cb   :  { %v1081_v34 = vadd.f32 1.0, %v12347_v30 }
 0x2cc   :  { %v12349_v32 = vpop.eup %12348  ;;  %v1624_v58 = vadd.f32 %v12843_v22, %v1621_v31 }
 0x2cd   :  { %12354 = vrcp.f32 %v1081_v34  ;;  %v1767_v51 = vpop.f32.mrb[24].mxu1 }
 0x2ce   :  { %v11533_v52 = vpop.f32.mrb[25].mxu1 }
 0x2d1   :  { %v1914_v53 = vpop.f32.mrb[26].mxu1 }
 0x2d2   :  { %v11543_v54 = vpop.f32.mrb[27].mxu1 }
 0x2d3   :  { %v12351_v35 = vpop.eup %12350 }
 0x2d4   :  { %v12353_v36 = vpop.eup %12352  ;;  %v1398_v38 = vmul.f32 %v12351_v35, %v12349_v32 }
 0x2d5   :  { %v1394_v43 = vadd.f32 1.0, %v12353_v36  ;;  %v2056_v55 = vpop.f32.mrb[28].mxu1 }
 0x2d6   :  { %v11553_v56 = vpop.f32.mrb[29].mxu1 }
 0x2d7   :  { %v12355_v40 = vpop.eup %12354  ;;  %12356 = vrcp.f32 %v1394_v43 }
 0x2d8   :  { %v1397_v45 = vmul.f32 0.0, %v12355_v40 }
 0x2da   :  { %v13021_v46 = vadd.f32 %v1398_v38, %v1397_v45 }
 0x2dc   :  { %12358 = vtanh.f32 %v13021_v46 }
 0x2e1   :  { %v12357_v47 = vpop.eup %12356 }
 0x2e6   :  { %v12359_v49 = vpop.eup %12358 }
 0x2e7   :  { %v1401_v50 = vmul.f32 %v12359_v49, %v12357_v47 }
 0x2e9   :  { %11512 = vmatmul.mubr.msk.f32.vlgmr.msra.gmra.mrb[14].mxu0 %vm692_vm3, %v1401_v50 }
 0x2ea   :  { %11525 = vmatpush3.msra.mxu0 %v12728_v3  ;;  %11526 = vmatprep.mubr.msk.f32.mxu0 %vm12657_vm0, %v12656_v1 }
 0x2eb   :  { %11534 = vmatprep.subr.mxu0 %v12656_v1 }
 0x2ed   :  { %11527 = vmatmul.mubr.msk.f32.vlgmr.msra.gmra.mrb[16].mxu0 %vm36_vm4, %v12907_v21 }
 0x2ee   :  { %11535 = vmatpush3.msra.mxu0 %v12752_v6  ;;  %11536 = vmatprep.mubr.msk.f32.mxu0 %vm12657_vm0, %v12656_v1 }
 0x2ef   :  { %11544 = vmatprep.subr.mxu0 %v12656_v1 }
 0x2f1   :  { %11537 = vmatmul.mubr.msk.f32.vlgmr.msra.gmra.mrb[18].mxu0 %vm36_vm4, %v12907_v21 }
 0x2f2   :  { %11545 = vmatpush3.msra.mxu0 %v12773_v8  ;;  %11546 = vmatprep.mubr.msk.f32.mxu0 %vm12657_vm0, %v12656_v1 }
 0x2f3   :  { %12240 = vmatprep.subr.bf16.mxu0 %v12658_v13 }
 0x2f5   :  { %11547 = vmatmul.mubr.msk.f32.vlgmr.msra.gmra.mrb[20].mxu0 %vm36_vm4, %v12907_v21  ;;  %v10877_v21 = vmul.f32 -1.442695, %v1624_v58 }
 0x2f6   :  { %12242 = vmatpush3.bf16.msra.mxu0 %v12812_v14  ;;  %11562 = vmatprep.mubr.msk.f32.mxu0 %vm12657_vm0, %v12656_v1 }
 0x2f7   :  { %12243 = vmatprep.subr.bf16.mxu0 %v12658_v13  ;;  %12360 = vpow2.f32 %v10877_v21 }
 0x2fa   :  { %12245 = vmatpush3.bf16.msra.mxu0 %v12818_v16 }
 0x2fb   :  { %11575 = vmatprep.subr.mxu0 %v12656_v1 }
 0x301   :  { %v12361_v4 = vpop.eup %12360 }
 0x302   :  { %v1628_v26 = vadd.f32 1.0, %v12361_v4 }
 0x3bc   :  { %v1475_v60 = vpop.f32.mrb[14].mxu0 }
 0x3bd   :  { %v11513_v62 = vpop.f32.mrb[15].mxu0  ;;  %11568 = vmatmul.mubr.msk.f32.vlgmr.msra.gmra.mrb[30].mxu1 %vm36_vm4, %v1475_v60 }
 0x3be   :  { %11571 = vmatpush3.msra.mxu1 %v12831_v18  ;;  %11572 = vmatprep.mubr.msk.f32.mxu1 %vm12657_vm0, %v12656_v1 }
 0x3bf   :  { %11580 = vmatprep.subr.mxu1 %v12656_v1 }
 0x3c0   :  { %v1697_v63 = vpop.f32.mrb[16].mxu0 }
 0x3c1   :  { %v1768_v15 = vadd.f32 %v1767_v51, %v1697_v63  ;;  %v11528_v19 = vpop.f32.mrb[17].mxu0 }
 0x3c3   :  { %v1771_v23 = vadd.f32 %v12849_v29, %v1768_v15 }
 0x3c4   :  { %v1844_v27 = vpop.f32.mrb[18].mxu0 }
 0x3c5   :  { %v10881_v28 = vmul.f32 -1.442695, %v1771_v23  ;;  %v1915_v30 = vadd.f32 %v1914_v53, %v1844_v27  ;;  %v11538_v31 = vpop.f32.mrb[19].mxu0  ;;  %v10902_v27 = vld [vmem:[%s14120_s0 + $0x10] sm:$0xff] }
 0x3c7   :  { %12362 = vpow2.f32 %v10881_v28  ;;  %v1918_v33 = vadd.f32 %v12855_v42, %v1915_v30 }
 0x3c8   :  { %12364 = vrcp.f32 %v1628_v26  ;;  %v1986_v34 = vpop.f32.mrb[20].mxu0 }
 0x3c9   :  { %12366 = vtanh.f32 %v1918_v33  ;;  %v2057_v32 = vadd.f32 %v2056_v55, %v1986_v34  ;;  %v11548_v35 = vpop.f32.mrb[21].mxu0 }
 0x3cb   :  { %v2060_v36 = vadd.f32 %v12860_v44, %v2057_v32 }
 0x3cd   :  { %v10888_v38 = vmul.f32 -1.442695, %v2060_v36 }
 0x3cf   :  { %12368 = vpow2.f32 %v10888_v38 }
 0x3d1   :  { %v12363_v40 = vpop.eup %12362 }
 0x3d2   :  { %v12365_v43 = vpop.eup %12364  ;;  %v1775_v45 = vadd.f32 1.0, %v12363_v40 }
 0x3d3   :  { %v12367_v47 = vpop.eup %12366 }
 0x3d4   :  { %12370 = vrcp.f32 %v1775_v45  ;;  %v2068_v49 = vmul.f32 %v12367_v47, %v12365_v43 }
 0x3d9   :  { %v12369_v50 = vpop.eup %12368 }
 0x3da   :  { %v2064_v52 = vadd.f32 1.0, %v12369_v50 }
 0x3dc   :  { %12372 = vrcp.f32 %v2064_v52 }
 0x3de   :  { %v12371_v51 = vpop.eup %12370 }
 0x3df   :  { %v2067_v53 = vmul.f32 %v12371_v51, %v12864_v61 }
 0x3e1   :  { %v13059_v54 = vadd.f32 %v2068_v49, %v2067_v53 }
 0x3e3   :  { %12374 = vtanh.f32 %v13059_v54 }
 0x3e6   :  { %v12373_v55 = vpop.eup %12372 }
 0x3ed   :  { %v12375_v56 = vpop.eup %12374 }
 0x3ee   :  { %v2071_v58 = vmul.f32 %v12375_v56, %v12373_v55 }
 0x3f0   :  { %11563 = vmatmul.mubr.msk.f32.vlgmr.msra.gmra.mrb[22].mxu0 %vm692_vm3, %v2071_v58 }
 0x3f1   :  { %11576 = vmatpush3.msra.mxu0 %v12873_v10  ;;  %11577 = vmatprep.mubr.msk.f32.mxu0 %vm12657_vm0, %v12656_v1 }
 0x3f2   :  { %11585 = vmatprep.subr.mxu0 %v12656_v1 }
 0x3f4   :  { %11578 = vmatmul.mubr.msk.f32.vlgmr.msra.gmra.mrb[24].mxu0 %vm36_vm4, %v1475_v60 }
 0x3f5   :  { %11586 = vmatpush3.msra.mxu0 %v12883_v11  ;;  %11587 = vmatprep.mubr.msk.f32.mxu0 %vm12657_vm0, %v12656_v1 }
 0x3f6   :  { %11595 = vmatprep.subr.mxu0 %v12656_v1 }
 0x3f8   :  { %11588 = vmatmul.mubr.msk.f32.vlgmr.msra.gmra.mrb[26].mxu0 %vm36_vm4, %v1475_v60 }
 0x3f9   :  { %11596 = vmatpush3.msra.mxu0 %v12893_v12  ;;  %11597 = vmatprep.mubr.msk.f32.mxu0 %vm12657_vm0, %v12656_v1 }
 0x3fa   :  { %12246 = vmatprep.subr.bf16.mxu0 %v12658_v13 }
 0x3fc   :  { %11598 = vmatmul.mubr.msk.f32.vlgmr.msra.gmra.mrb[28].mxu0 %vm36_vm4, %v1475_v60 }
 0x3fd   :  { %12248 = vmatpush3.bf16.msra.mxu0 %v12985_v37  ;;  %11613 = vmatprep.mubr.msk.f32.mxu0 %vm12657_vm0, %v12656_v1 }
 0x3fe   :  { %12249 = vmatprep.subr.bf16.mxu0 %v12658_v13 }
 0x401   :  { %12251 = vmatpush3.bf16.msra.mxu0 %v12991_v39 }
 0x402   :  { %11626 = vmatprep.subr.mxu0 %v12656_v1 }
 0x490   :  { %v2214_v61 = vpop.f32.mrb[30].mxu1 }
 0x491   :  { %v11569_v21 = vpop.f32.mrb[31].mxu1 }
 0x4c3   :  { %v13084_v62 = vpop.f32.mrb[22].mxu0 }
 0x4c4   :  { %v11564_v63 = vpop.f32.mrb[23].mxu0  ;;  %11573 = vmatmul.mubr.msk.f32.vlgmr.msra.gmra.mrb[32].mxu1 %vm36_vm4, %v13084_v62 }
 0x4c5   :  { %11581 = vmatpush3.msra.mxu1 %v12905_v20  ;;  %11582 = vmatprep.mubr.msk.f32.mxu1 %vm12657_vm0, %v12656_v1 }
 0x4c6   :  { %11590 = vmatprep.subr.mxu1 %v12656_v1 }
 0x4c7   :  { %v2364_v60 = vpop.f32.mrb[24].mxu0 }
 0x4c8   :  { %v11579_v4 = vpop.f32.mrb[25].mxu0  ;;  %11583 = vmatmul.mubr.msk.f32.vlgmr.msra.gmra.mrb[34].mxu1 %vm36_vm4, %v13084_v62 }
 0x4c9   :  { %11591 = vmatpush3.msra.mxu1 %v12918_v24  ;;  %11592 = vmatprep.mubr.msk.f32.mxu1 %vm12657_vm0, %v12656_v1 }
 0x4ca   :  { %11600 = vmatprep.subr.mxu1 %v12656_v1 }
 0x4cb   :  { %v2511_v15 = vpop.f32.mrb[26].mxu0 }
 0x4cc   :  { %v11589_v19 = vpop.f32.mrb[27].mxu0  ;;  %11593 = vmatmul.mubr.msk.f32.vlgmr.msra.gmra.mrb[36].mxu1 %vm36_vm4, %v13084_v62 }
 0x4cd   :  { %11601 = vmatpush3.msra.mxu1 %v12929_v25  ;;  %11602 = vmatprep.mubr.msk.f32.mxu1 %vm12657_vm0, %v12656_v1 }
 0x4ce   :  { %11616 = vmatprep.subr.mxu1 %v12656_v1 }
 0x4cf   :  { %v2653_v23 = vpop.f32.mrb[28].mxu0 }
 0x4d0   :  { %v11599_v26 = vpop.f32.mrb[29].mxu0  ;;  %11603 = vmatmul.mubr.msk.f32.vlgmr.msra.gmra.mrb[38].mxu1 %vm36_vm4, %v13084_v62 }
 0x4d1   :  { %11617 = vmatpush3.msra.mxu1 %v12713_v0  ;;  %11618 = vmatprep.mubr.msk.f32.mxu1 %vm12657_vm0, %v12656_v1 }
 0x4d2   :  { %11621 = vmatprep.subr.mxu1 %v12656_v1 }
 0x4d4   :  { %11619 = vmatmul.mubr.msk.f32.vlgmr.msra.gmra.mrb[40].mxu1 %vm36_vm4, %v13084_v62 }
 0x4d5   :  { %11622 = vmatpush3.msk.msra.mxu1 %vm114_vm1, %v12721_v2  ;;  %11623 = vmatprep.mubr.msk.f32.mxu1 %vm12657_vm0, %v12656_v1 }
 0x4d6   :  { %11631 = vmatprep.subr.mxu1 %v12656_v1 }
 0x4d8   :  { %11624 = vmatmul.mubr.msk.f32.vlgmr.msra.gmra.mrb[42].mxu1 %vm110_vm2, %v10902_v27 }
 0x4d9   :  { %11632 = vmatpush3.msk.msra.mxu1 %vm114_vm1, %v12743_v5  ;;  %11633 = vmatprep.mubr.msk.f32.mxu1 %vm12657_vm0, %v12656_v1 }
 0x4da   :  { %11641 = vmatprep.subr.mxu1 %v12656_v1 }
 0x4dc   :  { %11634 = vmatmul.mubr.msk.f32.vlgmr.msra.gmra.mrb[44].mxu1 %vm110_vm2, %v10902_v27 }
 0x4dd   :  { %11642 = vmatpush3.msk.msra.mxu1 %vm114_vm1, %v12765_v7  ;;  %11643 = vmatprep.mubr.msk.f32.mxu1 %vm12657_vm0, %v12656_v1 }
 0x4de   :  { %11651 = vmatprep.subr.mxu1 %v12656_v1 }
 0x4e0   :  { %11644 = vmatmul.mubr.msk.f32.vlgmr.msra.gmra.mrb[46].mxu1 %vm110_vm2, %v10902_v27 }
 0x4e1   :  { %11652 = vmatpush3.msk.msra.mxu1 %vm114_vm1, %v12786_v9  ;;  %11653 = vmatprep.mubr.msk.f32.mxu1 %vm12657_vm0, %v12656_v1 }
 0x4e2   :  { %11667 = vmatprep.subr.mxu1 %v12656_v1 }
 0x4e4   :  { %11654 = vmatmul.mubr.msk.f32.vlgmr.msra.gmra.mrb[48].mxu1 %vm110_vm2, %v10902_v27 }
 0x4e5   :  { %11668 = vmatpush3.msra.mxu1 %v12826_v17  ;;  %11669 = vmatprep.mubr.msk.f32.mxu1 %vm12657_vm0, %v12656_v1 }
 0x4e6   :  { %11672 = vmatprep.subr.mxu1 %v12656_v1 }
 0x597   :  { %v2287_v0 = vpop.f32.mrb[32].mxu1 }
 0x598   :  { %v2288_v2 = vadd.f32 %v2287_v0, %v2214_v61  ;;  %v11574_v5 = vpop.f32.mrb[33].mxu1 }
 0x59a   :  { %v2291_v7 = vadd.f32 %v12999_v41, %v2288_v2 }
 0x59b   :  { %v2434_v9 = vpop.f32.mrb[34].mxu1 }
 0x59c   :  { %v10892_v28 = vmul.f32 -1.442695, %v2291_v7  ;;  %v2435_v30 = vadd.f32 %v2434_v9, %v2364_v60  ;;  %v11584_v31 = vpop.f32.mrb[35].mxu1 }
 0x59e   :  { %12376 = vpow2.f32 %v10892_v28  ;;  %v2438_v33 = vadd.f32 %v13006_v48, %v2435_v30 }
 0x59f   :  { %v2581_v34 = vpop.f32.mrb[36].mxu1 }
 0x5a0   :  { %v10895_v32 = vmul.f32 -1.442695, %v2438_v33  ;;  %v2582_v35 = vadd.f32 %v2581_v34, %v2511_v15  ;;  %v11594_v36 = vpop.f32.mrb[37].mxu1 }
 0x5a2   :  { %12378 = vpow2.f32 %v10895_v32  ;;  %v2585_v45 = vadd.f32 %v13012_v57, %v2582_v35 }
 0x5a3   :  { %v2723_v38 = vpop.f32.mrb[38].mxu1 }
 0x5a4   :  { %v2724_v40 = vadd.f32 %v2723_v38, %v2653_v23  ;;  %v11604_v43 = vpop.f32.mrb[39].mxu1  ;;  %12380 = vtanh.f32 %v2585_v45 }
 0x5a6   :  { %v2727_v47 = vadd.f32 %v13017_v59, %v2724_v40 }
 0x5a7   :  { %v2880_v49 = vpop.f32.mrb[40].mxu1 }
 0x5a8   :  { %v12377_v50 = vpop.eup %12376  ;;  %v10900_v51 = vmul.f32 -1.442695, %v2727_v47  ;;  %v11620_v52 = vpop.f32.mrb[41].mxu1 }
 0x5a9   :  { %v2295_v53 = vadd.f32 1.0, %v12377_v50 }
 0x5ab   :  { %12382 = vrcp.f32 %v2295_v53  ;;  %v2953_v55 = vpop.f32.mrb[42].mxu1 }
 0x5ac   :  { %v12379_v56 = vpop.eup %12378  ;;  %12384 = vpow2.f32 %v10900_v51  ;;  %v2954_v58 = vadd.f32 %v2953_v55, %v2880_v49  ;;  %v11625_v61 = vpop.f32.mrb[43].mxu1 }
 0x5ad   :  { %v2442_v21 = vadd.f32 1.0, %v12379_v56 }
 0x5ae   :  { %v12381_v63 = vpop.eup %12380  ;;  %v2957_v28 = vadd.f32 %v12843_v22, %v2954_v58 }
 0x5af   :  { %12386 = vrcp.f32 %v2442_v21 }
 0x5b5   :  { %v12383_v60 = vpop.eup %12382 }
 0x5b6   :  { %v12385_v4 = vpop.eup %12384  ;;  %v2735_v15 = vmul.f32 %v12383_v60, %v12381_v63 }
 0x5b7   :  { %v2731_v23 = vadd.f32 1.0, %v12385_v4 }
 0x5b9   :  { %v12387_v19 = vpop.eup %12386  ;;  %12388 = vrcp.f32 %v2731_v23 }
 0x5ba   :  { %v2734_v26 = vmul.f32 %v12387_v19, %v13021_v46 }
 0x5bc   :  { %v13148_v27 = vadd.f32 %v2735_v15, %v2734_v26 }
 0x5be   :  { %12390 = vtanh.f32 %v13148_v27 }
 0x5c3   :  { %v12389_v0 = vpop.eup %12388 }
 0x5c8   :  { %v12391_v2 = vpop.eup %12390 }
 0x5c9   :  { %v2738_v5 = vmul.f32 %v12391_v2, %v12389_v0 }
 0x5cb   :  { %11614 = vmatmul.mubr.msk.f32.vlgmr.msra.gmra.mrb[30].mxu0 %vm692_vm3, %v2738_v5  ;;  %v10931_v5 = vld [vmem:[%s14120_s0 + $0x18] sm:$0xff] }
 0x5cc   :  { %11627 = vmatpush3.msra.mxu0 %v12728_v3  ;;  %11628 = vmatprep.mubr.msk.f32.mxu0 %vm12657_vm0, %v12656_v1  ;;  %v3100_v3 = vpop.f32.mrb[44].mxu1 }
 0x5cd   :  { %11636 = vmatprep.subr.mxu0 %v12656_v1 }
 0x5cf   :  { %11629 = vmatmul.mubr.msk.f32.vlgmr.msra.gmra.mrb[32].mxu0 %vm36_vm4, %v13084_v62 }
 0x5d0   :  { %11637 = vmatpush3.msra.mxu0 %v12752_v6  ;;  %11638 = vmatprep.mubr.msk.f32.mxu0 %vm12657_vm0, %v12656_v1  ;;  %v11635_v6 = vpop.f32.mrb[45].mxu1 }
 0x5d1   :  { %11646 = vmatprep.subr.mxu0 %v12656_v1  ;;  %v13272_v6 = vld [vmem:[%s14121_s1 + $0x8] sm:$0xf] }
 0x5d3   :  { %11639 = vmatmul.mubr.msk.f32.vlgmr.msra.gmra.mrb[34].mxu0 %vm36_vm4, %v13084_v62 }
 0x5d4   :  { %11647 = vmatpush3.msra.mxu0 %v12773_v8  ;;  %11648 = vmatprep.mubr.msk.f32.mxu0 %vm12657_vm0, %v12656_v1  ;;  %v3247_v8 = vpop.f32.mrb[46].mxu1 }
 0x5d5   :  { %12252 = vmatprep.subr.bf16.mxu0 %v12658_v13  ;;  %v11645_v46 = vpop.f32.mrb[47].mxu1 }
 0x5d6   :  { %v3389_v7 = vpop.f32.mrb[48].mxu1 }
 0x5d7   :  { %11649 = vmatmul.mubr.msk.f32.vlgmr.msra.gmra.mrb[36].mxu0 %vm36_vm4, %v13084_v62  ;;  %v11655_v9 = vpop.f32.mrb[49].mxu1  ;;  %v10906_v62 = vmul.f32 -1.442695, %v2957_v28 }
 0x5d8   :  { %12254 = vmatpush3.bf16.msra.mxu0 %v12812_v14  ;;  %11664 = vmatprep.mubr.msk.f32.mxu0 %vm12657_vm0, %v12656_v1 }
 0x5d9   :  { %12255 = vmatprep.subr.bf16.mxu0 %v12658_v13  ;;  %12392 = vpow2.f32 %v10906_v62 }
 0x5dc   :  { %12257 = vmatpush3.bf16.msra.mxu0 %v12818_v16 }
 0x5dd   :  { %11677 = vmatprep.subr.mxu0 %v12656_v1 }
 0x5e3   :  { %v12393_v34 = vpop.eup %12392 }
 0x5e4   :  { %v2961_v22 = vadd.f32 1.0, %v12393_v34 }
 0x69e   :  { %v2808_v30 = vpop.f32.mrb[30].mxu0 }
 0x69f   :  { %v11615_v31 = vpop.f32.mrb[31].mxu0  ;;  %11670 = vmatmul.mubr.msk.f32.vlgmr.msra.gmra.mrb[50].mxu1 %vm36_vm4, %v2808_v30 }
 0x6a0   :  { %11673 = vmatpush3.msra.mxu1 %v12831_v18  ;;  %11674 = vmatprep.mubr.msk.f32.mxu1 %vm12657_vm0, %v12656_v1 }
 0x6a1   :  { %11682 = vmatprep.subr.mxu1 %v12656_v1 }
 0x6a2   :  { %v3030_v33 = vpop.f32.mrb[32].mxu0 }
 0x6a3   :  { %v3101_v32 = vadd.f32 %v3100_v3, %v3030_v33  ;;  %v11630_v35 = vpop.f32.mrb[33].mxu0  ;;  %v13261_v3 = vld [vmem:[%s14121_s1 + $0x4] sm:$0xf] }
 0x6a5   :  { %v3104_v36 = vadd.f32 %v12849_v29, %v3101_v32 }
 0x6a6   :  { %v3177_v38 = vpop.f32.mrb[34].mxu0 }
 0x6a7   :  { %v10910_v40 = vmul.f32 -1.442695, %v3104_v36  ;;  %v3248_v43 = vadd.f32 %v3247_v8, %v3177_v38  ;;  %v11640_v45 = vpop.f32.mrb[35].mxu0  ;;  %v13283_v8 = vld [vmem:[%s14121_s1 + $0xc] sm:$0xf] }
 0x6a9   :  { %12394 = vpow2.f32 %v10910_v40  ;;  %v3251_v47 = vadd.f32 %v12855_v42, %v3248_v43 }
 0x6aa   :  { %12396 = vrcp.f32 %v2961_v22  ;;  %v3319_v18 = vpop.f32.mrb[36].mxu0 }
 0x6ab   :  { %12398 = vtanh.f32 %v3251_v47  ;;  %v3390_v49 = vadd.f32 %v3389_v7, %v3319_v18  ;;  %v11650_v50 = vpop.f32.mrb[37].mxu0 }
 0x6ad   :  { %v3393_v51 = vadd.f32 %v12860_v44, %v3390_v49 }
 0x6af   :  { %v10917_v52 = vmul.f32 -1.442695, %v3393_v51 }
 0x6b1   :  { %12400 = vpow2.f32 %v10917_v52 }
 0x6b3   :  { %v12395_v53 = vpop.eup %12394 }
 0x6b4   :  { %v12397_v55 = vpop.eup %12396  ;;  %v3108_v29 = vadd.f32 1.0, %v12395_v53 }
 0x6b5   :  { %v12399_v56 = vpop.eup %12398 }
 0x6b6   :  { %12402 = vrcp.f32 %v3108_v29  ;;  %v3401_v58 = vmul.f32 %v12399_v56, %v12397_v55 }
 0x6bb   :  { %v12401_v61 = vpop.eup %12400 }
 0x6bc   :  { %v3397_v63 = vadd.f32 1.0, %v12401_v61 }
 0x6be   :  { %12404 = vrcp.f32 %v3397_v63 }
 0x6c0   :  { %v12403_v21 = vpop.eup %12402 }
 0x6c1   :  { %v3400_v42 = vmul.f32 %v12403_v21, %v13059_v54 }
 0x6c3   :  { %v13186_v60 = vadd.f32 %v3401_v58, %v3400_v42 }
 0x6c5   :  { %12406 = vtanh.f32 %v13186_v60 }
 0x6c8   :  { %v12405_v4 = vpop.eup %12404 }
 0x6cf   :  { %v12407_v44 = vpop.eup %12406 }
 0x6d0   :  { %v3404_v15 = vmul.f32 %v12407_v44, %v12405_v4 }
 0x6d2   :  { %11665 = vmatmul.mubr.msk.f32.vlgmr.msra.gmra.mrb[38].mxu0 %vm692_vm3, %v3404_v15  ;;  %v13307_v15 = vld [vmem:[%s14122_s2 + $0x8] sm:$0xff] }
 0x6d3   :  { %11678 = vmatpush3.msra.mxu0 %v12873_v10  ;;  %11679 = vmatprep.mubr.msk.f32.mxu0 %vm12657_vm0, %v12656_v1 }
 0x6d4   :  { %11687 = vmatprep.subr.mxu0 %v12656_v1 }
 0x6d6   :  { %11680 = vmatmul.mubr.msk.f32.vlgmr.msra.gmra.mrb[40].mxu0 %vm36_vm4, %v2808_v30 }
 0x6d7   :  { %11688 = vmatpush3.msra.mxu0 %v12883_v11  ;;  %11689 = vmatprep.mubr.msk.f32.mxu0 %vm12657_vm0, %v12656_v1 }
 0x6d8   :  { %11697 = vmatprep.subr.mxu0 %v12656_v1 }
 0x6da   :  { %11690 = vmatmul.mubr.msk.f32.vlgmr.msra.gmra.mrb[42].mxu0 %vm36_vm4, %v2808_v30 }
 0x6db   :  { %11698 = vmatpush3.msra.mxu0 %v12893_v12  ;;  %11699 = vmatprep.mubr.msk.f32.mxu0 %vm12657_vm0, %v12656_v1 }
 0x6dc   :  { %12258 = vmatprep.subr.bf16.mxu0 %v12658_v13 }
 0x6de   :  { %11700 = vmatmul.mubr.msk.f32.vlgmr.msra.gmra.mrb[44].mxu0 %vm36_vm4, %v2808_v30 }
 0x6df   :  { %12260 = vmatpush3.bf16.msra.mxu0 %v12985_v37  ;;  %11715 = vmatprep.mubr.msk.f32.mxu0 %vm12657_vm0, %v12656_v1 }
 0x6e0   :  { %12261 = vmatprep.subr.bf16.mxu0 %v12658_v13 }
 0x6e3   :  { %12263 = vmatpush3.bf16.msra.mxu0 %v12991_v39 }
 0x6e4   :  { %11728 = vmatprep.subr.mxu0 %v12656_v1 }
 0x772   :  { %v3547_v10 = vpop.f32.mrb[50].mxu1 }
 0x773   :  { %v11671_v11 = vpop.f32.mrb[51].mxu1 }
 0x7a5   :  { %v13211_v12 = vpop.f32.mrb[38].mxu0 }
 0x7a6   :  { %v11666_v54 = vpop.f32.mrb[39].mxu0  ;;  %11675 = vmatmul.mubr.msk.f32.vlgmr.msra.gmra.mrb[52].mxu1 %vm36_vm4, %v13211_v12 }
 0x7a7   :  { %11683 = vmatpush3.msra.mxu1 %v12905_v20  ;;  %11684 = vmatprep.mubr.msk.f32.mxu1 %vm12657_vm0, %v12656_v1 }
 0x7a8   :  { %11692 = vmatprep.subr.mxu1 %v12656_v1 }
 0x7a9   :  { %v3697_v19 = vpop.f32.mrb[40].mxu0 }
 0x7aa   :  { %v11681_v23 = vpop.f32.mrb[41].mxu0  ;;  %11685 = vmatmul.mubr.msk.f32.vlgmr.msra.gmra.mrb[54].mxu1 %vm36_vm4, %v13211_v12 }
 0x7ab   :  { %11693 = vmatpush3.msra.mxu1 %v12918_v24  ;;  %11694 = vmatprep.mubr.msk.f32.mxu1 %vm12657_vm0, %v12656_v1  ;;  %v13236_v24 = vld [vmem:[%s14122_s2] sm:$0xff] }
 0x7ac   :  { %11702 = vmatprep.subr.mxu1 %v12656_v1 }
 0x7ad   :  { %v3844_v26 = vpop.f32.mrb[42].mxu0 }
 0x7ae   :  { %v11691_v0 = vpop.f32.mrb[43].mxu0  ;;  %11695 = vmatmul.mubr.msk.f32.vlgmr.msra.gmra.mrb[56].mxu1 %vm36_vm4, %v13211_v12 }
 0x7af   :  { %11703 = vmatpush3.msra.mxu1 %v12929_v25  ;;  %11704 = vmatprep.mubr.msk.f32.mxu1 %vm12657_vm0, %v12656_v1  ;;  %v13247_v25 = vld [vmem:[%s14121_s1] sm:$0xf] }
 0x7b0   :  { %11718 = vmatprep.subr.mxu1 %v12656_v1 }
 0x7b1   :  { %v3986_v20 = vpop.f32.mrb[44].mxu0 }
 0x7b2   :  { %v11701_v2 = vpop.f32.mrb[45].mxu0  ;;  %11705 = vmatmul.mubr.msk.f32.vlgmr.msra.gmra.mrb[58].mxu1 %vm36_vm4, %v13211_v12 }
 0x7b3   :  { %11719 = vmatpush3.msra.mxu1 %v13236_v24  ;;  %11720 = vmatprep.mubr.msk.f32.mxu1 %vm12657_vm0, %v12656_v1 }
 0x7b4   :  { %11723 = vmatprep.subr.mxu1 %v12656_v1 }
 0x7b6   :  { %11721 = vmatmul.mubr.msk.f32.vlgmr.msra.gmra.mrb[60].mxu1 %vm36_vm4, %v13211_v12 }
 0x7b7   :  { %11724 = vmatpush3.msk.msra.mxu1 %vm114_vm1, %v13247_v25  ;;  %11725 = vmatprep.mubr.msk.f32.mxu1 %vm12657_vm0, %v12656_v1 }
 0x7b8   :  { %11733 = vmatprep.subr.mxu1 %v12656_v1 }
 0x7ba   :  { %11726 = vmatmul.mubr.msk.f32.vlgmr.msra.gmra.mrb[62].mxu1 %vm110_vm2, %v10931_v5 }
 0x7bb   :  { %11734 = vmatpush3.msk.msra.mxu1 %vm114_vm1, %v13261_v3  ;;  %11735 = vmatprep.mubr.msk.f32.mxu1 %vm12657_vm0, %v12656_v1 }
 0x7bc   :  { %11743 = vmatprep.subr.mxu1 %v12656_v1 }
 0x7be   :  { %11736 = vmatmul.mubr.msk.f32.vlgmr.msra.gmra.mrb[64].mxu1 %vm110_vm2, %v10931_v5 }
 0x7bf   :  { %11744 = vmatpush3.msk.msra.mxu1 %vm114_vm1, %v13272_v6  ;;  %11745 = vmatprep.mubr.msk.f32.mxu1 %vm12657_vm0, %v12656_v1 }
 0x7c0   :  { %11753 = vmatprep.subr.mxu1 %v12656_v1 }
 0x7c2   :  { %11746 = vmatmul.mubr.msk.f32.vlgmr.msra.gmra.mrb[66].mxu1 %vm110_vm2, %v10931_v5 }
 0x7c3   :  { %11754 = vmatpush3.msk.msra.mxu1 %vm114_vm1, %v13283_v8  ;;  %11755 = vmatprep.mubr.msk.f32.mxu1 %vm12657_vm0, %v12656_v1 }
 0x7c4   :  { %11769 = vmatprep.subr.mxu1 %v12656_v1 }
 0x7c6   :  { %11756 = vmatmul.mubr.msk.f32.vlgmr.msra.gmra.mrb[68].mxu1 %vm110_vm2, %v10931_v5 }
 0x7c7   :  { %11770 = vmatpush3.msra.mxu1 %v12826_v17  ;;  %11771 = vmatprep.mubr.msk.f32.mxu1 %vm12657_vm0, %v12656_v1 }
 0x7c8   :  { %11774 = vmatprep.subr.mxu1 %v12656_v1 }
 0x879   :  { %v3620_v46 = vpop.f32.mrb[52].mxu1 }
 0x87a   :  { %v3621_v7 = vadd.f32 %v3620_v46, %v3547_v10  ;;  %v11676_v9 = vpop.f32.mrb[53].mxu1  ;;  %v13329_v10 = vld [vmem:[%s14122_s2 + $0x18] sm:$0xff] }
 0x87c   :  { %v3624_v28 = vadd.f32 %v12999_v41, %v3621_v7  ;;  %v13353_v7 = vld [vmem:[%s14125_s5] sm:$0xff] }
 0x87d   :  { %v3767_v62 = vpop.f32.mrb[54].mxu1 }
 0x87e   :  { %v10921_v30 = vmul.f32 -1.442695, %v3624_v28  ;;  %v3768_v31 = vadd.f32 %v3767_v62, %v3697_v19  ;;  %v11686_v33 = vpop.f32.mrb[55].mxu1 }
 0x880   :  { %12408 = vpow2.f32 %v10921_v30  ;;  %v3771_v34 = vadd.f32 %v13006_v48, %v3768_v31  ;;  %v13362_v31 = vld [vmem:[%s14123_s3 + $0x1] ss:$0 sm:$0xff] }
 0x881   :  { %v3914_v32 = vpop.f32.mrb[56].mxu1 }
 0x882   :  { %v10924_v35 = vmul.f32 -1.442695, %v3771_v34  ;;  %v3915_v17 = vadd.f32 %v3914_v32, %v3844_v26  ;;  %v11696_v36 = vpop.f32.mrb[57].mxu1 }
 0x884   :  { %12410 = vpow2.f32 %v10924_v35  ;;  %v3918_v43 = vadd.f32 %v13012_v57, %v3915_v17 }
 0x885   :  { %v4056_v22 = vpop.f32.mrb[58].mxu1 }
 0x886   :  { %v4057_v38 = vadd.f32 %v4056_v22, %v3986_v20  ;;  %v11706_v40 = vpop.f32.mrb[59].mxu1  ;;  %12412 = vtanh.f32 %v3918_v43  ;;  %v13368_v22 = vld [vmem:[%s14123_s3 + $0x2] ss:$0 sm:$0xff] }
 0x888   :  { %v4060_v45 = vadd.f32 %v13017_v59, %v4057_v38 }
 0x889   :  { %v4213_v41 = vpop.f32.mrb[60].mxu1 }
 0x88a   :  { %v12409_v47 = vpop.eup %12408  ;;  %v10929_v18 = vmul.f32 -1.442695, %v4060_v45  ;;  %v11722_v49 = vpop.f32.mrb[61].mxu1 }
 0x88b   :  { %v3628_v50 = vadd.f32 1.0, %v12409_v47 }
 0x88d   :  { %12414 = vrcp.f32 %v3628_v50  ;;  %v4286_v48 = vpop.f32.mrb[62].mxu1 }
 0x88e   :  { %v12411_v51 = vpop.eup %12410  ;;  %12416 = vpow2.f32 %v10929_v18  ;;  %v4287_v52 = vadd.f32 %v4286_v48, %v4213_v41  ;;  %v11727_v53 = vpop.f32.mrb[63].mxu1  ;;  %v13374_v41 = vld [vmem:[%s14123_s3 + $0x3] ss:$0 sm:$0xff] }
 0x88f   :  { %v3775_v55 = vadd.f32 1.0, %v12411_v51 }
 0x890   :  { %v12413_v29 = vpop.eup %12412 }
 0x891   :  { %12418 = vrcp.f32 %v3775_v55  ;;  %v4433_v11 = vpop.f32.mrb[64].mxu1 }
 0x892   :  { %v11737_v54 = vpop.f32.mrb[65].mxu1 }
 0x895   :  { %v4580_v19 = vpop.f32.mrb[66].mxu1 }
 0x896   :  { %v11747_v23 = vpop.f32.mrb[67].mxu1 }
 0x897   :  { %v12415_v56 = vpop.eup %12414 }
 0x898   :  { %v12417_v58 = vpop.eup %12416  ;;  %v4068_v57 = vmul.f32 %v12415_v56, %v12413_v29 }
 0x899   :  { %v4064_v59 = vadd.f32 1.0, %v12417_v58  ;;  %v4722_v26 = vpop.f32.mrb[68].mxu1 }
 0x89a   :  { %v11757_v0 = vpop.f32.mrb[69].mxu1 }
 0x89b   :  { %v12419_v61 = vpop.eup %12418  ;;  %12420 = vrcp.f32 %v4064_v59  ;;  %v13436_v0 = vld [vmem:[%s14125_s5 + $0x10] sm:$0xff] }
 0x89c   :  { %v4067_v21 = vmul.f32 %v12419_v61, %v13148_v27  ;;  %v13318_v27 = vld [vmem:[%s14122_s2 + $0x10] sm:$0xff] }
 0x89e   :  { %v13300_v63 = vadd.f32 %v4068_v57, %v4067_v21  ;;  %v13385_v21 = vld [vmem:[%s14126_s6 + $0x8] sm:$0xff] }
 0x8a0   :  { %12422 = vtanh.f32 %v13300_v63 }
 0x8a5   :  { %v12421_v42 = vpop.eup %12420 }
 0x8aa   :  { %v12423_v4 = vpop.eup %12422 }
 0x8ab   :  { %v4071_v44 = vmul.f32 %v12423_v4, %v12421_v42  ;;  %v13405_v42 = vld [vmem:[%s14126_s6 + $0x18] sm:$0xff] }
 0x8ad   :  { %11716 = vmatmul.mubr.msk.f32.vlgmr.msra.gmra.mrb[46].mxu0 %vm692_vm3, %v4071_v44 }
 0x8ae   :  { %11729 = vmatpush3.msra.mxu0 %v13307_v15  ;;  %11730 = vmatprep.mubr.msk.f32.mxu0 %vm12657_vm0, %v12656_v1 }
 0x8af   :  { %11738 = vmatprep.subr.mxu0 %v12656_v1 }
 0x8b1   :  { %11731 = vmatmul.mubr.msk.f32.vlgmr.msra.gmra.mrb[48].mxu0 %vm36_vm4, %v13211_v12 }
 0x8b2   :  { %11739 = vmatpush3.msra.mxu0 %v13318_v27  ;;  %11740 = vmatprep.mubr.msk.f32.mxu0 %vm12657_vm0, %v12656_v1 }
 0x8b3   :  { %11748 = vmatprep.subr.mxu0 %v12656_v1 }
 0x8b5   :  { %11741 = vmatmul.mubr.msk.f32.vlgmr.msra.gmra.mrb[50].mxu0 %vm36_vm4, %v13211_v12 }
 0x8b6   :  { %11749 = vmatpush3.msra.mxu0 %v13329_v10  ;;  %11750 = vmatprep.mubr.msk.f32.mxu0 %vm12657_vm0, %v12656_v1 }
 0x8b7   :  { %12264 = vmatprep.subr.bf16.mxu0 %v12658_v13 }
 0x8b9   :  { %11751 = vmatmul.mubr.msk.f32.vlgmr.msra.gmra.mrb[52].mxu0 %vm36_vm4, %v13211_v12  ;;  %v13346_v12 = vld [vmem:[%s14123_s3] ss:$0 sm:$0xff] }
 0x8ba   :  { %12266 = vmatpush3.bf16.msra.mxu0 %v12812_v14  ;;  %11766 = vmatprep.mubr.msk.f32.mxu0 %vm12657_vm0, %v12656_v1  ;;  %v4290_v20 = vadd.f32 %v13346_v12, %v4287_v52 }
 0x8bb   :  { %12267 = vmatprep.subr.bf16.mxu0 %v12658_v13 }
 0x8bc   :  { %v10935_v2 = vmul.f32 -1.442695, %v4290_v20 }
 0x8be   :  { %12269 = vmatpush3.bf16.msra.mxu0 %v12818_v16  ;;  %12424 = vpow2.f32 %v10935_v2 }
 0x8bf   :  { %11779 = vmatprep.subr.mxu0 %v12656_v1 }
 0x8c8   :  { %v12425_v28 = vpop.eup %12424 }
 0x8c9   :  { %v4294_v34 = vadd.f32 1.0, %v12425_v28  ;;  %v10960_v28 = vld [vmem:[%s14120_s0 + $0x20] sm:$0xff] }
 0x980   :  { %v4141_v5 = vpop.f32.mrb[46].mxu0 }
 0x981   :  { %v11717_v46 = vpop.f32.mrb[47].mxu0  ;;  %11772 = vmatmul.mubr.msk.f32.vlgmr.msra.gmra.mrb[70].mxu1 %vm36_vm4, %v4141_v5 }
 0x982   :  { %11775 = vmatpush3.msra.mxu1 %v13353_v7  ;;  %11776 = vmatprep.mubr.msk.f32.mxu1 %vm12657_vm0, %v12656_v1 }
 0x983   :  { %11784 = vmatprep.subr.mxu1 %v12656_v1 }
 0x984   :  { %v4363_v9 = vpop.f32.mrb[48].mxu0 }
 0x985   :  { %v4434_v62 = vadd.f32 %v4433_v11, %v4363_v9  ;;  %v11732_v30 = vpop.f32.mrb[49].mxu0 }
 0x987   :  { %v4437_v33 = vadd.f32 %v13362_v31, %v4434_v62  ;;  %v13491_v62 = vld [vmem:[%s14126_s6] sm:$0xff] }
 0x988   :  { %v4510_v32 = vpop.f32.mrb[50].mxu0 }
 0x989   :  { %v10939_v35 = vmul.f32 -1.442695, %v4437_v33  ;;  %v4581_v17 = vadd.f32 %v4580_v19, %v4510_v32  ;;  %v11742_v36 = vpop.f32.mrb[51].mxu0  ;;  %v13425_v19 = vld [vmem:[%s14125_s5 + $0x8] sm:$0xff]  ;;  %v13500_v32 = vld [vmem:[%s14127_s7] ss:$0 sm:$0xff] }
 0x98b   :  { %12426 = vpow2.f32 %v10939_v35  ;;  %v4584_v38 = vadd.f32 %v13368_v22, %v4581_v17 }
 0x98c   :  { %12428 = vrcp.f32 %v4294_v34  ;;  %v4652_v40 = vpop.f32.mrb[52].mxu0 }
 0x98d   :  { %12430 = vtanh.f32 %v4584_v38  ;;  %v4723_v43 = vadd.f32 %v4722_v26, %v4652_v40  ;;  %v11752_v45 = vpop.f32.mrb[53].mxu0 }
 0x98f   :  { %v4726_v47 = vadd.f32 %v13374_v41, %v4723_v43  ;;  %v13506_v43 = vld [vmem:[%s14127_s7 + $0x1] ss:$0 sm:$0xff] }
 0x991   :  { %v10946_v18 = vmul.f32 -1.442695, %v4726_v47 }
 0x993   :  { %12432 = vpow2.f32 %v10946_v18 }
 0x995   :  { %v12427_v49 = vpop.eup %12426 }
 0x996   :  { %v12429_v50 = vpop.eup %12428  ;;  %v4441_v48 = vadd.f32 1.0, %v12427_v49 }
 0x997   :  { %v12431_v51 = vpop.eup %12430 }
 0x998   :  { %12434 = vrcp.f32 %v4441_v48  ;;  %v4734_v52 = vmul.f32 %v12431_v51, %v12429_v50 }
 0x99d   :  { %v12433_v53 = vpop.eup %12432 }
 0x99e   :  { %v4730_v29 = vadd.f32 1.0, %v12433_v53  ;;  %v13512_v53 = vld [vmem:[%s14127_s7 + $0x2] ss:$0 sm:$0xff] }
 0x9a0   :  { %12436 = vrcp.f32 %v4730_v29  ;;  %v13518_v29 = vld [vmem:[%s14127_s7 + $0x3] ss:$0 sm:$0xff] }
 0x9a2   :  { %v12435_v55 = vpop.eup %12434 }
 0x9a3   :  { %v4733_v56 = vmul.f32 %v12435_v55, %v13186_v60  ;;  %v13395_v60 = vld [vmem:[%s14126_s6 + $0x10] sm:$0xff] }
 0x9a5   :  { %v13378_v58 = vadd.f32 %v4734_v52, %v4733_v56 }
 0x9a7   :  { %12438 = vtanh.f32 %v13378_v58 }
 0x9aa   :  { %v12437_v57 = vpop.eup %12436 }
 0x9b1   :  { %v12439_v61 = vpop.eup %12438 }
 0x9b2   :  { %v4737_v59 = vmul.f32 %v12439_v61, %v12437_v57 }
 0x9b4   :  { %11767 = vmatmul.mubr.msk.f32.vlgmr.msra.gmra.mrb[54].mxu0 %vm692_vm3, %v4737_v59 }
 0x9b5   :  { %11780 = vmatpush3.msra.mxu0 %v13385_v21  ;;  %11781 = vmatprep.mubr.msk.f32.mxu0 %vm12657_vm0, %v12656_v1 }
 0x9b6   :  { %11789 = vmatprep.subr.mxu0 %v12656_v1 }
 0x9b8   :  { %11782 = vmatmul.mubr.msk.f32.vlgmr.msra.gmra.mrb[56].mxu0 %vm36_vm4, %v4141_v5 }
 0x9b9   :  { %11790 = vmatpush3.msra.mxu0 %v13395_v60  ;;  %11791 = vmatprep.mubr.msk.f32.mxu0 %vm12657_vm0, %v12656_v1 }
 0x9ba   :  { %11799 = vmatprep.subr.mxu0 %v12656_v1 }
 0x9bc   :  { %11792 = vmatmul.mubr.msk.f32.vlgmr.msra.gmra.mrb[58].mxu0 %vm36_vm4, %v4141_v5 }
 0x9bd   :  { %11800 = vmatpush3.msra.mxu0 %v13405_v42  ;;  %11801 = vmatprep.mubr.msk.f32.mxu0 %vm12657_vm0, %v12656_v1 }
 0x9be   :  { %12270 = vmatprep.subr.bf16.mxu0 %v12658_v13 }
 0x9c0   :  { %11802 = vmatmul.mubr.msk.f32.vlgmr.msra.gmra.mrb[60].mxu0 %vm36_vm4, %v4141_v5  ;;  %v13447_v5 = vld [vmem:[%s14125_s5 + $0x18] sm:$0xff] }
 0x9c1   :  { %12272 = vmatpush3.bf16.msra.mxu0 %v12985_v37  ;;  %11817 = vmatprep.mubr.msk.f32.mxu0 %vm12657_vm0, %v12656_v1 }
 0x9c2   :  { %12273 = vmatprep.subr.bf16.mxu0 %v12658_v13 }
 0x9c5   :  { %12275 = vmatpush3.bf16.msra.mxu0 %v12991_v39 }
 0x9c6   :  { %11830 = vmatprep.subr.mxu0 %v12656_v1 }
 0xa54   :  { %v4880_v4 = vpop.f32.mrb[70].mxu1 }
 0xa55   :  { %v11773_v44 = vpop.f32.mrb[71].mxu1 }
 0xa87   :  { %v13418_v11 = vpop.f32.mrb[54].mxu0 }
 0xa88   :  { %v11768_v54 = vpop.f32.mrb[55].mxu0  ;;  %11777 = vmatmul.mubr.msk.f32.vlgmr.msra.gmra.mrb[72].mxu1 %vm36_vm4, %v13418_v11 }
 0xa89   :  { %11785 = vmatpush3.msra.mxu1 %v13425_v19  ;;  %11786 = vmatprep.mubr.msk.f32.mxu1 %vm12657_vm0, %v12656_v1 }
 0xa8a   :  { %11794 = vmatprep.subr.mxu1 %v12656_v1 }
 0xa8b   :  { %v5030_v23 = vpop.f32.mrb[56].mxu0 }
 0xa8c   :  { %v11783_v26 = vpop.f32.mrb[57].mxu0  ;;  %11787 = vmatmul.mubr.msk.f32.vlgmr.msra.gmra.mrb[74].mxu1 %vm36_vm4, %v13418_v11 }
 0xa8d   :  { %11795 = vmatpush3.msra.mxu1 %v13436_v0  ;;  %11796 = vmatprep.mubr.msk.f32.mxu1 %vm12657_vm0, %v12656_v1 }
 0xa8e   :  { %11804 = vmatprep.subr.mxu1 %v12656_v1 }
 0xa8f   :  { %v5177_v20 = vpop.f32.mrb[58].mxu0 }
 0xa90   :  { %v11793_v2 = vpop.f32.mrb[59].mxu0  ;;  %11797 = vmatmul.mubr.msk.f32.vlgmr.msra.gmra.mrb[76].mxu1 %vm36_vm4, %v13418_v11 }
 0xa91   :  { %11805 = vmatpush3.msra.mxu1 %v13447_v5  ;;  %11806 = vmatprep.mubr.msk.f32.mxu1 %vm12657_vm0, %v12656_v1 }
 0xa92   :  { %11820 = vmatprep.subr.mxu1 %v12656_v1 }
 0xa93   :  { %v5319_v46 = vpop.f32.mrb[60].mxu0 }
 0xa94   :  { %v11803_v9 = vpop.f32.mrb[61].mxu0  ;;  %11807 = vmatmul.mubr.msk.f32.vlgmr.msra.gmra.mrb[78].mxu1 %vm36_vm4, %v13418_v11 }
 0xa95   :  { %11821 = vmatpush3.msra.mxu1 %v13236_v24  ;;  %11822 = vmatprep.mubr.msk.f32.mxu1 %vm12657_vm0, %v12656_v1 }
 0xa96   :  { %11825 = vmatprep.subr.mxu1 %v12656_v1 }
 0xa98   :  { %11823 = vmatmul.mubr.msk.f32.vlgmr.msra.gmra.mrb[80].mxu1 %vm36_vm4, %v13418_v11 }
 0xa99   :  { %11826 = vmatpush3.msk.msra.mxu1 %vm114_vm1, %v13247_v25  ;;  %11827 = vmatprep.mubr.msk.f32.mxu1 %vm12657_vm0, %v12656_v1 }
 0xa9a   :  { %11835 = vmatprep.subr.mxu1 %v12656_v1 }
 0xa9c   :  { %11828 = vmatmul.mubr.msk.f32.vlgmr.msra.gmra.mrb[82].mxu1 %vm110_vm2, %v10960_v28 }
 0xa9d   :  { %11836 = vmatpush3.msk.msra.mxu1 %vm114_vm1, %v13261_v3  ;;  %11837 = vmatprep.mubr.msk.f32.mxu1 %vm12657_vm0, %v12656_v1 }
 0xa9e   :  { %11845 = vmatprep.subr.mxu1 %v12656_v1 }
 0xaa0   :  { %11838 = vmatmul.mubr.msk.f32.vlgmr.msra.gmra.mrb[84].mxu1 %vm110_vm2, %v10960_v28 }
 0xaa1   :  { %11846 = vmatpush3.msk.msra.mxu1 %vm114_vm1, %v13272_v6  ;;  %11847 = vmatprep.mubr.msk.f32.mxu1 %vm12657_vm0, %v12656_v1 }
 0xaa2   :  { %11855 = vmatprep.subr.mxu1 %v12656_v1 }
 0xaa4   :  { %11848 = vmatmul.mubr.msk.f32.vlgmr.msra.gmra.mrb[86].mxu1 %vm110_vm2, %v10960_v28 }
 0xaa5   :  { %11856 = vmatpush3.msk.msra.mxu1 %vm114_vm1, %v13283_v8  ;;  %11857 = vmatprep.mubr.msk.f32.mxu1 %vm12657_vm0, %v12656_v1 }
 0xaa6   :  { %11871 = vmatprep.subr.mxu1 %v12656_v1 }
 0xaa8   :  { %11858 = vmatmul.mubr.msk.f32.vlgmr.msra.gmra.mrb[88].mxu1 %vm110_vm2, %v10960_v28 }
 0xaa9   :  { %11872 = vmatpush3.msra.mxu1 %v13491_v62  ;;  %11873 = vmatprep.mubr.msk.f32.mxu1 %vm12657_vm0, %v12656_v1 }
 0xaaa   :  { %11876 = vmatprep.subr.mxu1 %v12656_v1 }
 0xb5b   :  { %v4953_v30 = vpop.f32.mrb[72].mxu1 }
 0xb5c   :  { %v4954_v33 = vadd.f32 %v4953_v30, %v4880_v4  ;;  %v11778_v34 = vpop.f32.mrb[73].mxu1 }
 0xb5e   :  { %v4957_v35 = vadd.f32 %v13500_v32, %v4954_v33 }
 0xb5f   :  { %v5100_v17 = vpop.f32.mrb[74].mxu1 }
 0xb60   :  { %v10950_v36 = vmul.f32 -1.442695, %v4957_v35  ;;  %v5101_v38 = vadd.f32 %v5100_v17, %v5030_v23  ;;  %v11788_v40 = vpop.f32.mrb[75].mxu1 }
 0xb62   :  { %12440 = vpow2.f32 %v10950_v36  ;;  %v5104_v45 = vadd.f32 %v13506_v43, %v5101_v38 }
 0xb63   :  { %v5247_v47 = vpop.f32.mrb[76].mxu1 }
 0xb64   :  { %v10953_v18 = vmul.f32 -1.442695, %v5104_v45  ;;  %v5248_v49 = vadd.f32 %v5247_v47, %v5177_v20  ;;  %v11798_v50 = vpop.f32.mrb[77].mxu1 }
 0xb66   :  { %12442 = vpow2.f32 %v10953_v18  ;;  %v5251_v55 = vadd.f32 %v13512_v53, %v5248_v49 }
 0xb67   :  { %v5389_v48 = vpop.f32.mrb[78].mxu1 }
 0xb68   :  { %v5390_v51 = vadd.f32 %v5389_v48, %v5319_v46  ;;  %v11808_v52 = vpop.f32.mrb[79].mxu1  ;;  %12444 = vtanh.f32 %v5251_v55 }
 0xb6a   :  { %v5393_v56 = vadd.f32 %v13518_v29, %v5390_v51 }
 0xb6b   :  { %v5546_v57 = vpop.f32.mrb[80].mxu1 }
 0xb6c   :  { %v12441_v61 = vpop.eup %12440  ;;  %v10958_v59 = vmul.f32 -1.442695, %v5393_v56  ;;  %v11824_v4 = vpop.f32.mrb[81].mxu1 }
 0xb6d   :  { %v4961_v44 = vadd.f32 1.0, %v12441_v61 }
 0xb6f   :  { %12446 = vrcp.f32 %v4961_v44  ;;  %v5619_v54 = vpop.f32.mrb[82].mxu1 }
 0xb70   :  { %v12443_v23 = vpop.eup %12442  ;;  %12448 = vpow2.f32 %v10958_v59  ;;  %v5620_v26 = vadd.f32 %v5619_v54, %v5546_v57  ;;  %v11829_v20 = vpop.f32.mrb[83].mxu1 }
 0xb71   :  { %v5108_v2 = vadd.f32 1.0, %v12443_v23 }
 0xb72   :  { %v12445_v46 = vpop.eup %12444  ;;  %v5623_v48 = vadd.f32 %v13346_v12, %v5620_v26 }
 0xb73   :  { %12450 = vrcp.f32 %v5108_v2 }
 0xb79   :  { %v12447_v9 = vpop.eup %12446 }
 0xb7a   :  { %v12449_v28 = vpop.eup %12448  ;;  %v5401_v30 = vmul.f32 %v12447_v9, %v12445_v46 }
 0xb7b   :  { %v5397_v34 = vadd.f32 1.0, %v12449_v28 }
 0xb7d   :  { %v12451_v33 = vpop.eup %12450  ;;  %12452 = vrcp.f32 %v5397_v34 }
 0xb7e   :  { %v5400_v35 = vmul.f32 %v12451_v33, %v13300_v63  ;;  %v5766_v63 = vpop.f32.mrb[84].mxu1 }
 0xb7f   :  { %v11839_v45 = vpop.f32.mrb[85].mxu1 }
 0xb80   :  { %v13522_v17 = vadd.f32 %v5401_v30, %v5400_v35  ;;  %v5913_v47 = vpop.f32.mrb[86].mxu1 }
 0xb81   :  { %v11849_v18 = vpop.f32.mrb[87].mxu1 }
 0xb82   :  { %12454 = vtanh.f32 %v13522_v17  ;;  %v6055_v49 = vpop.f32.mrb[88].mxu1 }
 0xb83   :  { %v11859_v50 = vpop.f32.mrb[89].mxu1 }
 0xb87   :  { %v12453_v36 = vpop.eup %12452 }
 0xb8c   :  { %v12455_v38 = vpop.eup %12454 }
 0xb8d   :  { %v5404_v40 = vmul.f32 %v12455_v38, %v12453_v36 }
 0xb8f   :  { %11818 = vmatmul.mubr.msk.f32.vlgmr.msra.gmra.mrb[62].mxu0 %vm692_vm3, %v5404_v40 }
 0xb90   :  { %11831 = vmatpush3.msra.mxu0 %v13307_v15  ;;  %11832 = vmatprep.mubr.msk.f32.mxu0 %vm12657_vm0, %v12656_v1 }
 0xb91   :  { %11840 = vmatprep.subr.mxu0 %v12656_v1 }
 0xb93   :  { %11833 = vmatmul.mubr.msk.f32.vlgmr.msra.gmra.mrb[64].mxu0 %vm36_vm4, %v13418_v11 }
 0xb94   :  { %11841 = vmatpush3.msra.mxu0 %v13318_v27  ;;  %11842 = vmatprep.mubr.msk.f32.mxu0 %vm12657_vm0, %v12656_v1 }
 0xb95   :  { %11850 = vmatprep.subr.mxu0 %v12656_v1 }
 0xb97   :  { %11843 = vmatmul.mubr.msk.f32.vlgmr.msra.gmra.mrb[66].mxu0 %vm36_vm4, %v13418_v11 }
 0xb98   :  { %11851 = vmatpush3.msra.mxu0 %v13329_v10  ;;  %11852 = vmatprep.mubr.msk.f32.mxu0 %vm12657_vm0, %v12656_v1 }
 0xb99   :  { %12276 = vmatprep.subr.bf16.mxu0 %v12658_v13 }
 0xb9b   :  { %11853 = vmatmul.mubr.msk.f32.vlgmr.msra.gmra.mrb[68].mxu0 %vm36_vm4, %v13418_v11  ;;  %v10964_v11 = vmul.f32 -1.442695, %v5623_v48 }
 0xb9c   :  { %12278 = vmatpush3.bf16.msra.mxu0 %v12812_v14  ;;  %11868 = vmatprep.mubr.msk.f32.mxu0 %vm12657_vm0, %v12656_v1 }
 0xb9d   :  { %12279 = vmatprep.subr.bf16.mxu0 %v12658_v13  ;;  %12456 = vpow2.f32 %v10964_v11 }
 0xba0   :  { %12281 = vmatpush3.bf16.msra.mxu0 %v12818_v16 }
 0xba1   :  { %11881 = vmatprep.subr.mxu0 %v12656_v1 }
 0xba7   :  { %v12457_v56 = vpop.eup %12456 }
 0xba8   :  { %v5627_v4 = vadd.f32 1.0, %v12457_v56 }
 0xc62   :  { %v5474_v51 = vpop.f32.mrb[62].mxu0 }
 0xc63   :  { %v11819_v52 = vpop.f32.mrb[63].mxu0  ;;  %11874 = vmatmul.mubr.msk.f32.vlgmr.msra.gmra.mrb[90].mxu1 %vm36_vm4, %v5474_v51 }
 0xc64   :  { %11877 = vmatpush3.msra.mxu1 %v13353_v7  ;;  %11878 = vmatprep.mubr.msk.f32.mxu1 %vm12657_vm0, %v12656_v1 }
 0xc65   :  { %11886 = vmatprep.subr.mxu1 %v12656_v1 }
 0xc66   :  { %v5696_v55 = vpop.f32.mrb[64].mxu0 }
 0xc67   :  { %v5767_v57 = vadd.f32 %v5766_v63, %v5696_v55  ;;  %v11834_v61 = vpop.f32.mrb[65].mxu0 }
 0xc69   :  { %v5770_v59 = vadd.f32 %v13362_v31, %v5767_v57 }
 0xc6a   :  { %v5843_v44 = vpop.f32.mrb[66].mxu0 }
 0xc6b   :  { %v10968_v54 = vmul.f32 -1.442695, %v5770_v59  ;;  %v5914_v23 = vadd.f32 %v5913_v47, %v5843_v44  ;;  %v11844_v26 = vpop.f32.mrb[67].mxu0  ;;  %v10989_v44 = vld [vmem:[%s14120_s0 + $0x28] sm:$0xff] }
 0xc6d   :  { %12458 = vpow2.f32 %v10968_v54  ;;  %v5917_v20 = vadd.f32 %v13368_v22, %v5914_v23 }
 0xc6e   :  { %12460 = vrcp.f32 %v5627_v4  ;;  %v5985_v2 = vpop.f32.mrb[68].mxu0 }
 0xc6f   :  { %12462 = vtanh.f32 %v5917_v20  ;;  %v6056_v46 = vadd.f32 %v6055_v49, %v5985_v2  ;;  %v11854_v9 = vpop.f32.mrb[69].mxu0 }
 0xc71   :  { %v6059_v28 = vadd.f32 %v13374_v41, %v6056_v46 }
 0xc73   :  { %v10975_v30 = vmul.f32 -1.442695, %v6059_v28 }
 0xc75   :  { %12464 = vpow2.f32 %v10975_v30 }
 0xc77   :  { %v12459_v33 = vpop.eup %12458 }
 0xc78   :  { %v12461_v34 = vpop.eup %12460  ;;  %v5774_v35 = vadd.f32 1.0, %v12459_v33 }
 0xc79   :  { %v12463_v36 = vpop.eup %12462 }
 0xc7a   :  { %12466 = vrcp.f32 %v5774_v35  ;;  %v6067_v38 = vmul.f32 %v12463_v36, %v12461_v34 }
 0xc7f   :  { %v12465_v40 = vpop.eup %12464 }
 0xc80   :  { %v6063_v45 = vadd.f32 1.0, %v12465_v40 }
 0xc82   :  { %12468 = vrcp.f32 %v6063_v45 }
 0xc84   :  { %v12467_v63 = vpop.eup %12466 }
 0xc85   :  { %v6066_v47 = vmul.f32 %v12467_v63, %v13378_v58 }
 0xc87   :  { %v13560_v18 = vadd.f32 %v6067_v38, %v6066_v47 }
 0xc89   :  { %12470 = vtanh.f32 %v13560_v18 }
 0xc8c   :  { %v12469_v49 = vpop.eup %12468 }
 0xc93   :  { %v12471_v50 = vpop.eup %12470 }
 0xc94   :  { %v6070_v48 = vmul.f32 %v12471_v50, %v12469_v49 }
 0xc96   :  { %11869 = vmatmul.mubr.msk.f32.vlgmr.msra.gmra.mrb[70].mxu0 %vm692_vm3, %v6070_v48 }
 0xc97   :  { %11882 = vmatpush3.msra.mxu0 %v13385_v21  ;;  %11883 = vmatprep.mubr.msk.f32.mxu0 %vm12657_vm0, %v12656_v1 }
 0xc98   :  { %11891 = vmatprep.subr.mxu0 %v12656_v1 }
 0xc9a   :  { %11884 = vmatmul.mubr.msk.f32.vlgmr.msra.gmra.mrb[72].mxu0 %vm36_vm4, %v5474_v51 }
 0xc9b   :  { %11892 = vmatpush3.msra.mxu0 %v13395_v60  ;;  %11893 = vmatprep.mubr.msk.f32.mxu0 %vm12657_vm0, %v12656_v1 }
 0xc9c   :  { %11901 = vmatprep.subr.mxu0 %v12656_v1 }
 0xc9e   :  { %11894 = vmatmul.mubr.msk.f32.vlgmr.msra.gmra.mrb[74].mxu0 %vm36_vm4, %v5474_v51 }
 0xc9f   :  { %11902 = vmatpush3.msra.mxu0 %v13405_v42  ;;  %11903 = vmatprep.mubr.msk.f32.mxu0 %vm12657_vm0, %v12656_v1 }
 0xca0   :  { %12282 = vmatprep.subr.bf16.mxu0 %v12658_v13 }
 0xca2   :  { %11904 = vmatmul.mubr.msk.f32.vlgmr.msra.gmra.mrb[76].mxu0 %vm36_vm4, %v5474_v51 }
 0xca3   :  { %12284 = vmatpush3.bf16.msra.mxu0 %v12985_v37  ;;  %11919 = vmatprep.mubr.msk.f32.mxu0 %vm12657_vm0, %v12656_v1 }
 0xca4   :  { %12285 = vmatprep.subr.bf16.mxu0 %v12658_v13 }
 0xca7   :  { %12287 = vmatpush3.bf16.msra.mxu0 %v12991_v39 }
 0xca8   :  { %11932 = vmatprep.subr.mxu0 %v12656_v1 }
 0xd36   :  { %v6213_v58 = vpop.f32.mrb[90].mxu1 }
 0xd37   :  { %v11875_v11 = vpop.f32.mrb[91].mxu1 }
 0xd69   :  { %v13585_v52 = vpop.f32.mrb[70].mxu0 }
 0xd6a   :  { %v11870_v55 = vpop.f32.mrb[71].mxu0  ;;  %11879 = vmatmul.mubr.msk.f32.vlgmr.msra.gmra.mrb[92].mxu1 %vm36_vm4, %v13585_v52 }
 0xd6b   :  { %11887 = vmatpush3.msra.mxu1 %v13425_v19  ;;  %11888 = vmatprep.mubr.msk.f32.mxu1 %vm12657_vm0, %v12656_v1 }
 0xd6c   :  { %11896 = vmatprep.subr.mxu1 %v12656_v1 }
 0xd6d   :  { %v6363_v51 = vpop.f32.mrb[72].mxu0 }
 0xd6e   :  { %v11885_v56 = vpop.f32.mrb[73].mxu0  ;;  %11889 = vmatmul.mubr.msk.f32.vlgmr.msra.gmra.mrb[94].mxu1 %vm36_vm4, %v13585_v52 }
 0xd6f   :  { %11897 = vmatpush3.msra.mxu1 %v13436_v0  ;;  %11898 = vmatprep.mubr.msk.f32.mxu1 %vm12657_vm0, %v12656_v1 }
 0xd70   :  { %11906 = vmatprep.subr.mxu1 %v12656_v1 }
 0xd71   :  { %v6510_v57 = vpop.f32.mrb[74].mxu0 }
 0xd72   :  { %v11895_v61 = vpop.f32.mrb[75].mxu0  ;;  %11899 = vmatmul.mubr.msk.f32.vlgmr.msra.gmra.mrb[96].mxu1 %vm36_vm4, %v13585_v52 }
 0xd73   :  { %11907 = vmatpush3.msra.mxu1 %v13447_v5  ;;  %11908 = vmatprep.mubr.msk.f32.mxu1 %vm12657_vm0, %v12656_v1 }
 0xd74   :  { %11922 = vmatprep.subr.mxu1 %v12656_v1 }
 0xd75   :  { %v6652_v59 = vpop.f32.mrb[76].mxu0 }
 0xd76   :  { %v11905_v4 = vpop.f32.mrb[77].mxu0  ;;  %11909 = vmatmul.mubr.msk.f32.vlgmr.msra.gmra.mrb[98].mxu1 %vm36_vm4, %v13585_v52 }
 0xd77   :  { %11923 = vmatpush3.msra.mxu1 %v13236_v24  ;;  %11924 = vmatprep.mubr.msk.f32.mxu1 %vm12657_vm0, %v12656_v1 }
 0xd78   :  { %11927 = vmatprep.subr.mxu1 %v12656_v1 }
 0xd7a   :  { %11925 = vmatmul.mubr.msk.f32.vlgmr.msra.gmra.mrb[100].mxu1 %vm36_vm4, %v13585_v52 }
 0xd7b   :  { %11928 = vmatpush3.msk.msra.mxu1 %vm114_vm1, %v13247_v25  ;;  %11929 = vmatprep.mubr.msk.f32.mxu1 %vm12657_vm0, %v12656_v1 }
 0xd7c   :  { %11937 = vmatprep.subr.mxu1 %v12656_v1 }
 0xd7e   :  { %11930 = vmatmul.mubr.msk.f32.vlgmr.msra.gmra.mrb[102].mxu1 %vm110_vm2, %v10989_v44 }
 0xd7f   :  { %11938 = vmatpush3.msk.msra.mxu1 %vm114_vm1, %v13261_v3  ;;  %11939 = vmatprep.mubr.msk.f32.mxu1 %vm12657_vm0, %v12656_v1 }
 0xd80   :  { %11947 = vmatprep.subr.mxu1 %v12656_v1 }
 0xd82   :  { %11940 = vmatmul.mubr.msk.f32.vlgmr.msra.gmra.mrb[104].mxu1 %vm110_vm2, %v10989_v44 }
 0xd83   :  { %11948 = vmatpush3.msk.msra.mxu1 %vm114_vm1, %v13272_v6  ;;  %11949 = vmatprep.mubr.msk.f32.mxu1 %vm12657_vm0, %v12656_v1 }
 0xd84   :  { %11957 = vmatprep.subr.mxu1 %v12656_v1 }
 0xd86   :  { %11950 = vmatmul.mubr.msk.f32.vlgmr.msra.gmra.mrb[106].mxu1 %vm110_vm2, %v10989_v44 }
 0xd87   :  { %11958 = vmatpush3.msk.msra.mxu1 %vm114_vm1, %v13283_v8  ;;  %11959 = vmatprep.mubr.msk.f32.mxu1 %vm12657_vm0, %v12656_v1 }
 0xd88   :  { %11973 = vmatprep.subr.mxu1 %v12656_v1 }
 0xd8a   :  { %11960 = vmatmul.mubr.msk.f32.vlgmr.msra.gmra.mrb[108].mxu1 %vm110_vm2, %v10989_v44 }
 0xd8b   :  { %11974 = vmatpush3.msra.mxu1 %v13491_v62  ;;  %11975 = vmatprep.mubr.msk.f32.mxu1 %vm12657_vm0, %v12656_v1 }
 0xd8c   :  { %11978 = vmatprep.subr.mxu1 %v12656_v1 }
 0xe3d   :  { %v6286_v24 = vpop.f32.mrb[92].mxu1 }
 0xe3e   :  { %v6287_v25 = vadd.f32 %v6286_v24, %v6213_v58  ;;  %v11880_v3 = vpop.f32.mrb[93].mxu1 }
 0xe40   :  { %v6290_v6 = vadd.f32 %v13500_v32, %v6287_v25 }
 0xe41   :  { %v6433_v8 = vpop.f32.mrb[94].mxu1 }
 0xe42   :  { %v10979_v54 = vmul.f32 -1.442695, %v6290_v6  ;;  %v6434_v23 = vadd.f32 %v6433_v8, %v6363_v51  ;;  %v11890_v26 = vpop.f32.mrb[95].mxu1 }
 0xe44   :  { %12472 = vpow2.f32 %v10979_v54  ;;  %v6437_v20 = vadd.f32 %v13506_v43, %v6434_v23 }
 0xe45   :  { %v6580_v2 = vpop.f32.mrb[96].mxu1 }
 0xe46   :  { %v10982_v46 = vmul.f32 -1.442695, %v6437_v20  ;;  %v6581_v9 = vadd.f32 %v6580_v2, %v6510_v57  ;;  %v11900_v28 = vpop.f32.mrb[97].mxu1 }
 0xe48   :  { %12474 = vpow2.f32 %v10982_v46  ;;  %v6584_v35 = vadd.f32 %v13512_v53, %v6581_v9 }
 0xe49   :  { %v6722_v30 = vpop.f32.mrb[98].mxu1 }
 0xe4a   :  { %v6723_v33 = vadd.f32 %v6722_v30, %v6652_v59  ;;  %v11910_v34 = vpop.f32.mrb[99].mxu1  ;;  %12476 = vtanh.f32 %v6584_v35 }
 0xe4c   :  { %v6726_v36 = vadd.f32 %v13518_v29, %v6723_v33 }
 0xe4d   :  { %v6879_v38 = vpop.f32.mrb[100].mxu1 }
 0xe4e   :  { %v12473_v40 = vpop.eup %12472  ;;  %v10987_v63 = vmul.f32 -1.442695, %v6726_v36  ;;  %v11926_v45 = vpop.f32.mrb[101].mxu1 }
 0xe4f   :  { %v6294_v47 = vadd.f32 1.0, %v12473_v40 }
 0xe51   :  { %12478 = vrcp.f32 %v6294_v47  ;;  %v6952_v49 = vpop.f32.mrb[102].mxu1 }
 0xe52   :  { %v12475_v50 = vpop.eup %12474  ;;  %12480 = vpow2.f32 %v10987_v63  ;;  %v6953_v48 = vadd.f32 %v6952_v49, %v6879_v38  ;;  %v11931_v58 = vpop.f32.mrb[103].mxu1 }
 0xe53   :  { %v6441_v11 = vadd.f32 1.0, %v12475_v50 }
 0xe54   :  { %v12477_v55 = vpop.eup %12476  ;;  %v6956_v54 = vadd.f32 %v13346_v12, %v6953_v48 }
 0xe55   :  { %12482 = vrcp.f32 %v6441_v11 }
 0xe5b   :  { %v12479_v51 = vpop.eup %12478 }
 0xe5c   :  { %v12481_v56 = vpop.eup %12480  ;;  %v6734_v57 = vmul.f32 %v12479_v51, %v12477_v55 }
 0xe5d   :  { %v6730_v59 = vadd.f32 1.0, %v12481_v56 }
 0xe5f   :  { %v12483_v61 = vpop.eup %12482  ;;  %12484 = vrcp.f32 %v6730_v59 }
 0xe60   :  { %v6733_v4 = vmul.f32 %v12483_v61, %v13522_v17 }
 0xe62   :  { %v13649_v44 = vadd.f32 %v6734_v57, %v6733_v4 }
 0xe64   :  { %12486 = vtanh.f32 %v13649_v44 }
 0xe69   :  { %v12485_v24 = vpop.eup %12484 }
 0xe6e   :  { %v12487_v25 = vpop.eup %12486 }
 0xe6f   :  { %v6737_v3 = vmul.f32 %v12487_v25, %v12485_v24 }
 0xe71   :  { %11920 = vmatmul.mubr.msk.f32.vlgmr.msra.gmra.mrb[78].mxu0 %vm692_vm3, %v6737_v3  ;;  %v11018_v3 = vld [vmem:[%s14120_s0 + $0x30] sm:$0xff] }
 0xe72   :  { %11933 = vmatpush3.msra.mxu0 %v13307_v15  ;;  %11934 = vmatprep.mubr.msk.f32.mxu0 %vm12657_vm0, %v12656_v1  ;;  %v7099_v15 = vpop.f32.mrb[104].mxu1 }
 0xe73   :  { %11942 = vmatprep.subr.mxu0 %v12656_v1 }
 0xe75   :  { %11935 = vmatmul.mubr.msk.f32.vlgmr.msra.gmra.mrb[80].mxu0 %vm36_vm4, %v13585_v52 }
 0xe76   :  { %11943 = vmatpush3.msra.mxu0 %v13318_v27  ;;  %11944 = vmatprep.mubr.msk.f32.mxu0 %vm12657_vm0, %v12656_v1  ;;  %v11941_v27 = vpop.f32.mrb[105].mxu1 }
 0xe77   :  { %11952 = vmatprep.subr.mxu0 %v12656_v1  ;;  %v13773_v27 = vld [vmem:[%s14121_s1 + $0x8] sm:$0xf] }
 0xe79   :  { %11945 = vmatmul.mubr.msk.f32.vlgmr.msra.gmra.mrb[82].mxu0 %vm36_vm4, %v13585_v52 }
 0xe7a   :  { %11953 = vmatpush3.msra.mxu0 %v13329_v10  ;;  %11954 = vmatprep.mubr.msk.f32.mxu0 %vm12657_vm0, %v12656_v1  ;;  %v7246_v10 = vpop.f32.mrb[106].mxu1 }
 0xe7b   :  { %12288 = vmatprep.subr.bf16.mxu0 %v12658_v13  ;;  %v11951_v17 = vpop.f32.mrb[107].mxu1 }
 0xe7c   :  { %v7388_v6 = vpop.f32.mrb[108].mxu1 }
 0xe7d   :  { %11955 = vmatmul.mubr.msk.f32.vlgmr.msra.gmra.mrb[84].mxu0 %vm36_vm4, %v13585_v52  ;;  %v11961_v8 = vpop.f32.mrb[109].mxu1  ;;  %v10993_v52 = vmul.f32 -1.442695, %v6956_v54 }
 0xe7e   :  { %12290 = vmatpush3.bf16.msra.mxu0 %v12812_v14  ;;  %11970 = vmatprep.mubr.msk.f32.mxu0 %vm12657_vm0, %v12656_v1 }
 0xe7f   :  { %12291 = vmatprep.subr.bf16.mxu0 %v12658_v13  ;;  %12488 = vpow2.f32 %v10993_v52 }
 0xe82   :  { %12293 = vmatpush3.bf16.msra.mxu0 %v12818_v16 }
 0xe83   :  { %11983 = vmatprep.subr.mxu0 %v12656_v1 }
 0xe89   :  { %v12489_v2 = vpop.eup %12488 }
 0xe8a   :  { %v6960_v12 = vadd.f32 1.0, %v12489_v2 }
 0xf44   :  { %v6807_v23 = vpop.f32.mrb[78].mxu0 }
 0xf45   :  { %v11921_v26 = vpop.f32.mrb[79].mxu0  ;;  %11976 = vmatmul.mubr.msk.f32.vlgmr.msra.gmra.mrb[110].mxu1 %vm36_vm4, %v6807_v23 }
 0xf46   :  { %11979 = vmatpush3.msra.mxu1 %v13353_v7  ;;  %11980 = vmatprep.mubr.msk.f32.mxu1 %vm12657_vm0, %v12656_v1 }
 0xf47   :  { %11988 = vmatprep.subr.mxu1 %v12656_v1 }
 0xf48   :  { %v7029_v20 = vpop.f32.mrb[80].mxu0 }
 0xf49   :  { %v7100_v46 = vadd.f32 %v7099_v15, %v7029_v20  ;;  %v11936_v9 = vpop.f32.mrb[81].mxu0  ;;  %v13762_v15 = vld [vmem:[%s14121_s1 + $0x4] sm:$0xf] }
 0xf4b   :  { %v7103_v28 = vadd.f32 %v13362_v31, %v7100_v46 }
 0xf4c   :  { %v7176_v30 = vpop.f32.mrb[82].mxu0 }
 0xf4d   :  { %v10997_v33 = vmul.f32 -1.442695, %v7103_v28  ;;  %v7247_v34 = vadd.f32 %v7246_v10, %v7176_v30  ;;  %v11946_v35 = vpop.f32.mrb[83].mxu0  ;;  %v13784_v10 = vld [vmem:[%s14121_s1 + $0xc] sm:$0xf] }
 0xf4f   :  { %12490 = vpow2.f32 %v10997_v33  ;;  %v7250_v36 = vadd.f32 %v13368_v22, %v7247_v34 }
 0xf50   :  { %12492 = vrcp.f32 %v6960_v12  ;;  %v7318_v7 = vpop.f32.mrb[84].mxu0 }
 0xf51   :  { %12494 = vtanh.f32 %v7250_v36  ;;  %v7389_v38 = vadd.f32 %v7388_v6, %v7318_v7  ;;  %v11956_v40 = vpop.f32.mrb[85].mxu0 }
 0xf53   :  { %v7392_v63 = vadd.f32 %v13374_v41, %v7389_v38 }
 0xf55   :  { %v11004_v45 = vmul.f32 -1.442695, %v7392_v63 }
 0xf57   :  { %12496 = vpow2.f32 %v11004_v45 }
 0xf59   :  { %v12491_v47 = vpop.eup %12490 }
 0xf5a   :  { %v12493_v49 = vpop.eup %12492  ;;  %v7107_v31 = vadd.f32 1.0, %v12491_v47 }
 0xf5b   :  { %v12495_v50 = vpop.eup %12494 }
 0xf5c   :  { %12498 = vrcp.f32 %v7107_v31  ;;  %v7400_v48 = vmul.f32 %v12495_v50, %v12493_v49 }
 0xf61   :  { %v12497_v58 = vpop.eup %12496 }
 0xf62   :  { %v7396_v55 = vadd.f32 1.0, %v12497_v58 }
 0xf64   :  { %12500 = vrcp.f32 %v7396_v55 }
 0xf66   :  { %v12499_v11 = vpop.eup %12498 }
 0xf67   :  { %v7399_v22 = vmul.f32 %v12499_v11, %v13560_v18 }
 0xf69   :  { %v13687_v51 = vadd.f32 %v7400_v48, %v7399_v22 }
 0xf6b   :  { %12502 = vtanh.f32 %v13687_v51 }
 0xf6e   :  { %v12501_v56 = vpop.eup %12500 }
 0xf75   :  { %v12503_v41 = vpop.eup %12502 }
 0xf76   :  { %v7403_v57 = vmul.f32 %v12503_v41, %v12501_v56 }
 0xf78   :  { %11971 = vmatmul.mubr.msk.f32.vlgmr.msra.gmra.mrb[86].mxu0 %vm692_vm3, %v7403_v57  ;;  %v13808_v57 = vld [vmem:[%s14122_s2 + $0x8] sm:$0xff] }
 0xf79   :  { %11984 = vmatpush3.msra.mxu0 %v13385_v21  ;;  %11985 = vmatprep.mubr.msk.f32.mxu0 %vm12657_vm0, %v12656_v1 }
 0xf7a   :  { %11993 = vmatprep.subr.mxu0 %v12656_v1 }
 0xf7c   :  { %11986 = vmatmul.mubr.msk.f32.vlgmr.msra.gmra.mrb[88].mxu0 %vm36_vm4, %v6807_v23 }
 0xf7d   :  { %11994 = vmatpush3.msra.mxu0 %v13395_v60  ;;  %11995 = vmatprep.mubr.msk.f32.mxu0 %vm12657_vm0, %v12656_v1 }
 0xf7e   :  { %12003 = vmatprep.subr.mxu0 %v12656_v1 }
 0xf80   :  { %11996 = vmatmul.mubr.msk.f32.vlgmr.msra.gmra.mrb[90].mxu0 %vm36_vm4, %v6807_v23 }
 0xf81   :  { %12004 = vmatpush3.msra.mxu0 %v13405_v42  ;;  %12005 = vmatprep.mubr.msk.f32.mxu0 %vm12657_vm0, %v12656_v1 }
 0xf82   :  { %12294 = vmatprep.subr.bf16.mxu0 %v12658_v13 }
 0xf84   :  { %12006 = vmatmul.mubr.msk.f32.vlgmr.msra.gmra.mrb[92].mxu0 %vm36_vm4, %v6807_v23 }
 0xf85   :  { %12296 = vmatpush3.bf16.msra.mxu0 %v12985_v37  ;;  %12021 = vmatprep.mubr.msk.f32.mxu0 %vm12657_vm0, %v12656_v1 }
 0xf86   :  { %12297 = vmatprep.subr.bf16.mxu0 %v12658_v13 }
 0xf89   :  { %12299 = vmatpush3.bf16.msra.mxu0 %v12991_v39 }
 0xf8a   :  { %12034 = vmatprep.subr.mxu0 %v12656_v1 }
0x1018   :  { %v7546_v21 = vpop.f32.mrb[110].mxu1 }
0x1019   :  { %v11977_v60 = vpop.f32.mrb[111].mxu1 }
0x104b   :  { %v13712_v42 = vpop.f32.mrb[86].mxu0 }
0x104c   :  { %v11972_v18 = vpop.f32.mrb[87].mxu0  ;;  %11981 = vmatmul.mubr.msk.f32.vlgmr.msra.gmra.mrb[112].mxu1 %vm36_vm4, %v13712_v42 }
0x104d   :  { %11989 = vmatpush3.msra.mxu1 %v13425_v19  ;;  %11990 = vmatprep.mubr.msk.f32.mxu1 %vm12657_vm0, %v12656_v1 }
0x104e   :  { %11998 = vmatprep.subr.mxu1 %v12656_v1 }
0x104f   :  { %v7696_v61 = vpop.f32.mrb[88].mxu0 }
0x1050   :  { %v11987_v59 = vpop.f32.mrb[89].mxu0  ;;  %11991 = vmatmul.mubr.msk.f32.vlgmr.msra.gmra.mrb[114].mxu1 %vm36_vm4, %v13712_v42 }
0x1051   :  { %11999 = vmatpush3.msra.mxu1 %v13436_v0  ;;  %12000 = vmatprep.mubr.msk.f32.mxu1 %vm12657_vm0, %v12656_v1  ;;  %v13737_v0 = vld [vmem:[%s14122_s2] sm:$0xff] }
0x1052   :  { %12008 = vmatprep.subr.mxu1 %v12656_v1 }
0x1053   :  { %v7843_v4 = vpop.f32.mrb[90].mxu0 }
0x1054   :  { %v11997_v24 = vpop.f32.mrb[91].mxu0  ;;  %12001 = vmatmul.mubr.msk.f32.vlgmr.msra.gmra.mrb[116].mxu1 %vm36_vm4, %v13712_v42 }
0x1055   :  { %12009 = vmatpush3.msra.mxu1 %v13447_v5  ;;  %12010 = vmatprep.mubr.msk.f32.mxu1 %vm12657_vm0, %v12656_v1  ;;  %v13748_v5 = vld [vmem:[%s14121_s1] sm:$0xf] }
0x1056   :  { %12024 = vmatprep.subr.mxu1 %v12656_v1 }
0x1057   :  { %v7985_v19 = vpop.f32.mrb[92].mxu0 }
0x1058   :  { %v12007_v25 = vpop.f32.mrb[93].mxu0  ;;  %12011 = vmatmul.mubr.msk.f32.vlgmr.msra.gmra.mrb[118].mxu1 %vm36_vm4, %v13712_v42 }
0x1059   :  { %12025 = vmatpush3.msra.mxu1 %v13737_v0  ;;  %12026 = vmatprep.mubr.msk.f32.mxu1 %vm12657_vm0, %v12656_v1 }
0x105a   :  { %12029 = vmatprep.subr.mxu1 %v12656_v1 }
0x105c   :  { %12027 = vmatmul.mubr.msk.f32.vlgmr.msra.gmra.mrb[120].mxu1 %vm36_vm4, %v13712_v42 }
0x105d   :  { %12030 = vmatpush3.msk.msra.mxu1 %vm114_vm1, %v13748_v5  ;;  %12031 = vmatprep.mubr.msk.f32.mxu1 %vm12657_vm0, %v12656_v1 }
0x105e   :  { %12039 = vmatprep.subr.mxu1 %v12656_v1 }
0x1060   :  { %12032 = vmatmul.mubr.msk.f32.vlgmr.msra.gmra.mrb[122].mxu1 %vm110_vm2, %v11018_v3 }
0x1061   :  { %12040 = vmatpush3.msk.msra.mxu1 %vm114_vm1, %v13762_v15  ;;  %12041 = vmatprep.mubr.msk.f32.mxu1 %vm12657_vm0, %v12656_v1 }
0x1062   :  { %12049 = vmatprep.subr.mxu1 %v12656_v1 }
0x1064   :  { %12042 = vmatmul.mubr.msk.f32.vlgmr.msra.gmra.mrb[124].mxu1 %vm110_vm2, %v11018_v3 }
0x1065   :  { %12050 = vmatpush3.msk.msra.mxu1 %vm114_vm1, %v13773_v27  ;;  %12051 = vmatprep.mubr.msk.f32.mxu1 %vm12657_vm0, %v12656_v1 }
0x1066   :  { %12059 = vmatprep.subr.mxu1 %v12656_v1 }
0x1068   :  { %12052 = vmatmul.mubr.msk.f32.vlgmr.msra.gmra.mrb[126].mxu1 %vm110_vm2, %v11018_v3 }
0x1069   :  { %12060 = vmatpush3.msk.msra.mxu1 %vm114_vm1, %v13784_v10  ;;  %12061 = vmatprep.mubr.msk.f32.mxu1 %vm12657_vm0, %v12656_v1 }
0x106a   :  { %12075 = vmatprep.subr.mxu1 %v12656_v1 }
0x106c   :  { %12062 = vmatmul.mubr.msk.f32.vlgmr.msra.gmra.mrb[128].mxu1 %vm110_vm2, %v11018_v3 }
0x106d   :  { %12076 = vmatpush3.msra.mxu1 %v13491_v62  ;;  %12077 = vmatprep.mubr.msk.f32.mxu1 %vm12657_vm0, %v12656_v1 }
0x106e   :  { %12080 = vmatprep.subr.mxu1 %v12656_v1 }
0x111f   :  { %v7619_v17 = vpop.f32.mrb[112].mxu1 }
0x1120   :  { %v7620_v6 = vadd.f32 %v7619_v17, %v7546_v21  ;;  %v11982_v8 = vpop.f32.mrb[113].mxu1  ;;  %v13830_v21 = vld [vmem:[%s14122_s2 + $0x18] sm:$0xff] }
0x1122   :  { %v7623_v54 = vadd.f32 %v13500_v32, %v7620_v6  ;;  %v13854_v6 = vld [vmem:[%s14125_s5] sm:$0xff] }
0x1123   :  { %v7766_v52 = vpop.f32.mrb[114].mxu1 }
0x1124   :  { %v11008_v23 = vmul.f32 -1.442695, %v7623_v54  ;;  %v7767_v26 = vadd.f32 %v7766_v52, %v7696_v61  ;;  %v11992_v20 = vpop.f32.mrb[115].mxu1 }
0x1126   :  { %12504 = vpow2.f32 %v11008_v23  ;;  %v7770_v2 = vadd.f32 %v13506_v43, %v7767_v26  ;;  %v13863_v26 = vld [vmem:[%s14123_s3 + $0x1] ss:$0 sm:$0xff] }
0x1127   :  { %v7913_v46 = vpop.f32.mrb[116].mxu1 }
0x1128   :  { %v11011_v9 = vmul.f32 -1.442695, %v7770_v2  ;;  %v7914_v62 = vadd.f32 %v7913_v46, %v7843_v4  ;;  %v12002_v28 = vpop.f32.mrb[117].mxu1 }
0x112a   :  { %12506 = vpow2.f32 %v11011_v9  ;;  %v7917_v34 = vadd.f32 %v13512_v53, %v7914_v62 }
0x112b   :  { %v8055_v12 = vpop.f32.mrb[118].mxu1 }
0x112c   :  { %v8056_v30 = vadd.f32 %v8055_v12, %v7985_v19  ;;  %v12012_v33 = vpop.f32.mrb[119].mxu1  ;;  %12508 = vtanh.f32 %v7917_v34  ;;  %v13869_v12 = vld [vmem:[%s14123_s3 + $0x2] ss:$0 sm:$0xff] }
0x112e   :  { %v8059_v35 = vadd.f32 %v13518_v29, %v8056_v30 }
0x112f   :  { %v8212_v32 = vpop.f32.mrb[120].mxu1 }
0x1130   :  { %v12505_v36 = vpop.eup %12504  ;;  %v11016_v7 = vmul.f32 -1.442695, %v8059_v35  ;;  %v12028_v38 = vpop.f32.mrb[121].mxu1 }
0x1131   :  { %v7627_v40 = vadd.f32 1.0, %v12505_v36 }
0x1133   :  { %12510 = vrcp.f32 %v7627_v40  ;;  %v8285_v43 = vpop.f32.mrb[122].mxu1 }
0x1134   :  { %v12507_v63 = vpop.eup %12506  ;;  %12512 = vpow2.f32 %v11016_v7  ;;  %v8286_v45 = vadd.f32 %v8285_v43, %v8212_v32  ;;  %v12033_v47 = vpop.f32.mrb[123].mxu1  ;;  %v13875_v32 = vld [vmem:[%s14123_s3 + $0x3] ss:$0 sm:$0xff] }
0x1135   :  { %v7774_v49 = vadd.f32 1.0, %v12507_v63 }
0x1136   :  { %v12509_v31 = vpop.eup %12508 }
0x1137   :  { %12514 = vrcp.f32 %v7774_v49  ;;  %v8432_v60 = vpop.f32.mrb[124].mxu1 }
0x1138   :  { %v12043_v18 = vpop.f32.mrb[125].mxu1 }
0x113b   :  { %v8579_v61 = vpop.f32.mrb[126].mxu1 }
0x113c   :  { %v12053_v59 = vpop.f32.mrb[127].mxu1 }
0x113d   :  { %v12511_v50 = vpop.eup %12510 }
0x113e   :  { %v12513_v48 = vpop.eup %12512  ;;  %v8067_v53 = vmul.f32 %v12511_v50, %v12509_v31 }
0x113f   :  { %v8063_v29 = vadd.f32 1.0, %v12513_v48  ;;  %v8721_v4 = vpop.f32.mrb[128].mxu1 }
0x1140   :  { %v12063_v24 = vpop.f32.mrb[129].mxu1 }
0x1141   :  { %v12515_v58 = vpop.eup %12514  ;;  %12516 = vrcp.f32 %v8063_v29  ;;  %v13937_v24 = vld [vmem:[%s14125_s5 + $0x10] sm:$0xff] }
0x1142   :  { %v8066_v11 = vmul.f32 %v12515_v58, %v13649_v44  ;;  %v13819_v44 = vld [vmem:[%s14122_s2 + $0x10] sm:$0xff] }
0x1144   :  { %v13801_v55 = vadd.f32 %v8067_v53, %v8066_v11  ;;  %v13886_v11 = vld [vmem:[%s14126_s6 + $0x8] sm:$0xff] }
0x1146   :  { %12518 = vtanh.f32 %v13801_v55 }
0x114b   :  { %v12517_v22 = vpop.eup %12516 }
0x1150   :  { %v12519_v56 = vpop.eup %12518 }
0x1151   :  { %v8070_v41 = vmul.f32 %v12519_v56, %v12517_v22  ;;  %v13906_v22 = vld [vmem:[%s14126_s6 + $0x18] sm:$0xff] }
0x1153   :  { %12022 = vmatmul.mubr.msk.f32.vlgmr.msra.gmra.mrb[94].mxu0 %vm692_vm3, %v8070_v41 }
0x1154   :  { %12035 = vmatpush3.msra.mxu0 %v13808_v57  ;;  %12036 = vmatprep.mubr.msk.f32.mxu0 %vm12657_vm0, %v12656_v1 }
0x1155   :  { %12044 = vmatprep.subr.mxu0 %v12656_v1 }
0x1157   :  { %12037 = vmatmul.mubr.msk.f32.vlgmr.msra.gmra.mrb[96].mxu0 %vm36_vm4, %v13712_v42 }
0x1158   :  { %12045 = vmatpush3.msra.mxu0 %v13819_v44  ;;  %12046 = vmatprep.mubr.msk.f32.mxu0 %vm12657_vm0, %v12656_v1 }
0x1159   :  { %12054 = vmatprep.subr.mxu0 %v12656_v1 }
0x115b   :  { %12047 = vmatmul.mubr.msk.f32.vlgmr.msra.gmra.mrb[98].mxu0 %vm36_vm4, %v13712_v42 }
0x115c   :  { %12055 = vmatpush3.msra.mxu0 %v13830_v21  ;;  %12056 = vmatprep.mubr.msk.f32.mxu0 %vm12657_vm0, %v12656_v1 }
0x115d   :  { %12300 = vmatprep.subr.bf16.mxu0 %v12658_v13 }
0x115f   :  { %12057 = vmatmul.mubr.msk.f32.vlgmr.msra.gmra.mrb[100].mxu0 %vm36_vm4, %v13712_v42  ;;  %v13847_v42 = vld [vmem:[%s14123_s3] ss:$0 sm:$0xff] }
0x1160   :  { %12302 = vmatpush3.bf16.msra.mxu0 %v12812_v14  ;;  %12072 = vmatprep.mubr.msk.f32.mxu0 %vm12657_vm0, %v12656_v1  ;;  %v8289_v19 = vadd.f32 %v13847_v42, %v8286_v45 }
0x1161   :  { %12303 = vmatprep.subr.bf16.mxu0 %v12658_v13 }
0x1162   :  { %v11022_v25 = vmul.f32 -1.442695, %v8289_v19 }
0x1164   :  { %12305 = vmatpush3.bf16.msra.mxu0 %v12818_v16  ;;  %12520 = vpow2.f32 %v11022_v25 }
0x1165   :  { %12085 = vmatprep.subr.mxu0 %v12656_v1 }
0x116e   :  { %v12521_v54 = vpop.eup %12520 }
0x116f   :  { %v8293_v2 = vadd.f32 1.0, %v12521_v54  ;;  %v11047_v54 = vld [vmem:[%s14120_s0 + $0x38] sm:$0xff] }
0x1226   :  { %v8140_v3 = vpop.f32.mrb[94].mxu0 }
0x1227   :  { %v12023_v17 = vpop.f32.mrb[95].mxu0  ;;  %12078 = vmatmul.mubr.msk.f32.vlgmr.msra.gmra.mrb[130].mxu1 %vm36_vm4, %v8140_v3 }
0x1228   :  { %12081 = vmatpush3.msra.mxu1 %v13854_v6  ;;  %12082 = vmatprep.mubr.msk.f32.mxu1 %vm12657_vm0, %v12656_v1 }
0x1229   :  { %12090 = vmatprep.subr.mxu1 %v12656_v1 }
0x122a   :  { %v8362_v8 = vpop.f32.mrb[96].mxu0 }
0x122b   :  { %v8433_v52 = vadd.f32 %v8432_v60, %v8362_v8  ;;  %v12038_v23 = vpop.f32.mrb[97].mxu0 }
0x122d   :  { %v8436_v20 = vadd.f32 %v13863_v26, %v8433_v52 }
0x122e   :  { %v8509_v46 = vpop.f32.mrb[98].mxu0 }
0x122f   :  { %v11026_v9 = vmul.f32 -1.442695, %v8436_v20  ;;  %v8580_v62 = vadd.f32 %v8579_v61, %v8509_v46  ;;  %v12048_v28 = vpop.f32.mrb[99].mxu0  ;;  %v13926_v61 = vld [vmem:[%s14125_s5 + $0x8] sm:$0xff] }
0x1231   :  { %12522 = vpow2.f32 %v11026_v9  ;;  %v8583_v30 = vadd.f32 %v13869_v12, %v8580_v62  ;;  %v14004_v9 = vld [vmem:[%s14127_s7 + $0x1] ss:$0 sm:$0xff] }
0x1232   :  { %12524 = vrcp.f32 %v8293_v2  ;;  %v8651_v33 = vpop.f32.mrb[100].mxu0 }
0x1233   :  { %12526 = vtanh.f32 %v8583_v30  ;;  %v8722_v34 = vadd.f32 %v8721_v4, %v8651_v33  ;;  %v12058_v35 = vpop.f32.mrb[101].mxu0 }
0x1235   :  { %v8725_v36 = vadd.f32 %v13875_v32, %v8722_v34 }
0x1237   :  { %v11033_v7 = vmul.f32 -1.442695, %v8725_v36 }
0x1239   :  { %12528 = vpow2.f32 %v11033_v7 }
0x123b   :  { %v12523_v38 = vpop.eup %12522 }
0x123c   :  { %v12525_v40 = vpop.eup %12524  ;;  %v8440_v43 = vadd.f32 1.0, %v12523_v38  ;;  %v14010_v38 = vld [vmem:[%s14127_s7 + $0x2] ss:$0 sm:$0xff] }
0x123d   :  { %v12527_v63 = vpop.eup %12526 }
0x123e   :  { %12530 = vrcp.f32 %v8440_v43  ;;  %v8733_v45 = vmul.f32 %v12527_v63, %v12525_v40  ;;  %v14016_v43 = vld [vmem:[%s14127_s7 + $0x3] ss:$0 sm:$0xff] }
0x1243   :  { %v12529_v47 = vpop.eup %12528 }
0x1244   :  { %v8729_v31 = vadd.f32 1.0, %v12529_v47 }
0x1246   :  { %12532 = vrcp.f32 %v8729_v31 }
0x1248   :  { %v12531_v49 = vpop.eup %12530 }
0x1249   :  { %v8732_v50 = vmul.f32 %v12531_v49, %v13687_v51  ;;  %v13896_v51 = vld [vmem:[%s14126_s6 + $0x10] sm:$0xff] }
0x124b   :  { %v13879_v48 = vadd.f32 %v8733_v45, %v8732_v50 }
0x124d   :  { %12534 = vtanh.f32 %v13879_v48 }
0x1250   :  { %v12533_v53 = vpop.eup %12532 }
0x1257   :  { %v12535_v58 = vpop.eup %12534 }
0x1258   :  { %v8736_v29 = vmul.f32 %v12535_v58, %v12533_v53 }
0x125a   :  { %12073 = vmatmul.mubr.msk.f32.vlgmr.msra.gmra.mrb[102].mxu0 %vm692_vm3, %v8736_v29 }
0x125b   :  { %12086 = vmatpush3.msra.mxu0 %v13886_v11  ;;  %12087 = vmatprep.mubr.msk.f32.mxu0 %vm12657_vm0, %v12656_v1 }
0x125c   :  { %12095 = vmatprep.subr.mxu0 %v12656_v1 }
0x125e   :  { %12088 = vmatmul.mubr.msk.f32.vlgmr.msra.gmra.mrb[104].mxu0 %vm36_vm4, %v8140_v3 }
0x125f   :  { %12096 = vmatpush3.msra.mxu0 %v13896_v51  ;;  %12097 = vmatprep.mubr.msk.f32.mxu0 %vm12657_vm0, %v12656_v1 }
0x1260   :  { %12105 = vmatprep.subr.mxu0 %v12656_v1 }
0x1262   :  { %12098 = vmatmul.mubr.msk.f32.vlgmr.msra.gmra.mrb[106].mxu0 %vm36_vm4, %v8140_v3 }
0x1263   :  { %12106 = vmatpush3.msra.mxu0 %v13906_v22  ;;  %12107 = vmatprep.mubr.msk.f32.mxu0 %vm12657_vm0, %v12656_v1 }
0x1264   :  { %12306 = vmatprep.subr.bf16.mxu0 %v12658_v13 }
0x1266   :  { %12108 = vmatmul.mubr.msk.f32.vlgmr.msra.gmra.mrb[108].mxu0 %vm36_vm4, %v8140_v3  ;;  %v13948_v3 = vld [vmem:[%s14125_s5 + $0x18] sm:$0xff] }
0x1267   :  { %12308 = vmatpush3.bf16.msra.mxu0 %v12985_v37  ;;  %12123 = vmatprep.mubr.msk.f32.mxu0 %vm12657_vm0, %v12656_v1 }
0x1268   :  { %12309 = vmatprep.subr.bf16.mxu0 %v12658_v13 }
0x126b   :  { %12311 = vmatpush3.bf16.msra.mxu0 %v12991_v39 }
0x126c   :  { %12136 = vmatprep.subr.mxu0 %v12656_v1 }
0x12fa   :  { %v8879_v56 = vpop.f32.mrb[130].mxu1 }
0x12fb   :  { %v12079_v41 = vpop.f32.mrb[131].mxu1 }
0x132d   :  { %v13919_v60 = vpop.f32.mrb[102].mxu0 }
0x132e   :  { %v12074_v18 = vpop.f32.mrb[103].mxu0  ;;  %12083 = vmatmul.mubr.msk.f32.vlgmr.msra.gmra.mrb[132].mxu1 %vm36_vm4, %v13919_v60 }
0x132f   :  { %12091 = vmatpush3.msra.mxu1 %v13926_v61  ;;  %12092 = vmatprep.mubr.msk.f32.mxu1 %vm12657_vm0, %v12656_v1 }
0x1330   :  { %12100 = vmatprep.subr.mxu1 %v12656_v1 }
0x1331   :  { %v9029_v59 = vpop.f32.mrb[104].mxu0 }
0x1332   :  { %v12089_v4 = vpop.f32.mrb[105].mxu0  ;;  %12093 = vmatmul.mubr.msk.f32.vlgmr.msra.gmra.mrb[134].mxu1 %vm36_vm4, %v13919_v60 }
0x1333   :  { %12101 = vmatpush3.msra.mxu1 %v13937_v24  ;;  %12102 = vmatprep.mubr.msk.f32.mxu1 %vm12657_vm0, %v12656_v1 }
0x1334   :  { %12110 = vmatprep.subr.mxu1 %v12656_v1 }
0x1335   :  { %v9176_v19 = vpop.f32.mrb[106].mxu0 }
0x1336   :  { %v12099_v25 = vpop.f32.mrb[107].mxu0  ;;  %12103 = vmatmul.mubr.msk.f32.vlgmr.msra.gmra.mrb[136].mxu1 %vm36_vm4, %v13919_v60 }
0x1337   :  { %12111 = vmatpush3.msra.mxu1 %v13948_v3  ;;  %12112 = vmatprep.mubr.msk.f32.mxu1 %vm12657_vm0, %v12656_v1 }
0x1338   :  { %12126 = vmatprep.subr.mxu1 %v12656_v1 }
0x1339   :  { %v9318_v17 = vpop.f32.mrb[108].mxu0 }
0x133a   :  { %v12109_v8 = vpop.f32.mrb[109].mxu0  ;;  %12113 = vmatmul.mubr.msk.f32.vlgmr.msra.gmra.mrb[138].mxu1 %vm36_vm4, %v13919_v60 }
0x133b   :  { %12127 = vmatpush3.msra.mxu1 %v13737_v0  ;;  %12128 = vmatprep.mubr.msk.f32.mxu1 %vm12657_vm0, %v12656_v1  ;;  %v12627_v0 = vld [vmem:[%s14126_s6] sm:$0xff] }
0x133c   :  { %12131 = vmatprep.subr.mxu1 %v12656_v1 }
0x133e   :  { %12129 = vmatmul.mubr.msk.f32.vlgmr.msra.gmra.mrb[140].mxu1 %vm36_vm4, %v13919_v60 }
0x133f   :  { %12132 = vmatpush3.msk.msra.mxu1 %vm114_vm1, %v13748_v5  ;;  %12133 = vmatprep.mubr.msk.f32.mxu1 %vm12657_vm0, %v12656_v1 }
0x1340   :  { %12141 = vmatprep.subr.mxu1 %v12656_v1 }
0x1342   :  { %12134 = vmatmul.mubr.msk.f32.vlgmr.msra.gmra.mrb[142].mxu1 %vm110_vm2, %v11047_v54 }
0x1343   :  { %12142 = vmatpush3.msk.msra.mxu1 %vm114_vm1, %v13762_v15  ;;  %12143 = vmatprep.mubr.msk.f32.mxu1 %vm12657_vm0, %v12656_v1 }
0x1344   :  { %12151 = vmatprep.subr.mxu1 %v12656_v1 }
0x1346   :  { %12144 = vmatmul.mubr.msk.f32.vlgmr.msra.gmra.mrb[144].mxu1 %vm110_vm2, %v11047_v54 }
0x1347   :  { %12152 = vmatpush3.msk.msra.mxu1 %vm114_vm1, %v13773_v27  ;;  %12153 = vmatprep.mubr.msk.f32.mxu1 %vm12657_vm0, %v12656_v1 }
0x1348   :  { %12161 = vmatprep.subr.mxu1 %v12656_v1 }
0x134a   :  { %12154 = vmatmul.mubr.msk.f32.vlgmr.msra.gmra.mrb[146].mxu1 %vm110_vm2, %v11047_v54 }
0x134b   :  { %12162 = vmatpush3.msk.msra.mxu1 %vm114_vm1, %v13784_v10  ;;  %12163 = vmatprep.mubr.msk.f32.mxu1 %vm12657_vm0, %v12656_v1  ;;  %v13998_v10 = vld [vmem:[%s14127_s7] ss:$0 sm:$0xff]  ;;  %s12659_s7 = smov [#allocation2]  }
0x134c   :  { %12177 = vmatprep.subr.mxu1 %v12656_v1  ;;  %s10819_s18 = sshll.u32 %s12659_s7, 4  ;;  %s10820_s18 = int_to_ptr.vmem [resolvable:$true] %s10819_s18 }
0x134d   :  { %s12632_s19 = scalar_lea.vmem %s10820_s18, 128  ;;  %p12637_p1 = scmp.lt.s32.totalorder %s10820_s18, %s10820_s18 }
0x134e   :  { %12164 = vmatmul.mubr.msk.f32.vlgmr.msra.gmra.mrb[148].mxu1 %vm110_vm2, %v11047_v54  ;;  %p12633_p0 = scmp.ne.s32.totalorder %s10820_s18, %s12632_s19  ;;  %p12638_p2 = scmp.lt.s32.totalorder %s12632_s19, %s12632_s19 }
0x134f   :  { %12178 = vmatpush3.msra.mxu1 %v12627_v0  ;;  %12179 = vmatprep.mubr.msk.f32.mxu1 %vm12657_vm0, %v12656_v1 }
0x1350   :  { %12182 = vmatprep.subr.mxu1 %v12656_v1  ;;  %p12639_p3 = por %p12638_p2, %p12637_p1 }
0x1352   :  { %p12640_p4 = pnand %p12639_p3, %p12633_p0 }
0x1401   :  { %v8952_v5 = vpop.f32.mrb[132].mxu1 }
0x1402   :  { %v8953_v15 = vadd.f32 %v8952_v5, %v8879_v56  ;;  %v12084_v27 = vpop.f32.mrb[133].mxu1 }
0x1404   :  { %v8956_v52 = vadd.f32 %v13998_v10, %v8953_v15 }
0x1405   :  { %v9099_v23 = vpop.f32.mrb[134].mxu1 }
0x1406   :  { %v11037_v20 = vmul.f32 -1.442695, %v8956_v52  ;;  %v9100_v2 = vadd.f32 %v9099_v23, %v9029_v59  ;;  %v12094_v46 = vpop.f32.mrb[135].mxu1 }
0x1408   :  { %12536 = vpow2.f32 %v11037_v20  ;;  %v9103_v62 = vadd.f32 %v14004_v9, %v9100_v2 }
0x1409   :  { %v9246_v28 = vpop.f32.mrb[136].mxu1 }
0x140a   :  { %v11040_v30 = vmul.f32 -1.442695, %v9103_v62  ;;  %v9247_v33 = vadd.f32 %v9246_v28, %v9176_v19  ;;  %v12104_v34 = vpop.f32.mrb[137].mxu1 }
0x140c   :  { %12538 = vpow2.f32 %v11040_v30  ;;  %v9250_v40 = vadd.f32 %v14010_v38, %v9247_v33 }
0x140d   :  { %v9388_v35 = vpop.f32.mrb[138].mxu1 }
0x140e   :  { %v9389_v36 = vadd.f32 %v9388_v35, %v9318_v17  ;;  %v12114_v7 = vpop.f32.mrb[139].mxu1  ;;  %12540 = vtanh.f32 %v9250_v40 }
0x1410   :  { %v9392_v63 = vadd.f32 %v14016_v43, %v9389_v36 }
0x1411   :  { %v9545_v45 = vpop.f32.mrb[140].mxu1 }
0x1412   :  { %v12537_v47 = vpop.eup %12536  ;;  %v11045_v49 = vmul.f32 -1.442695, %v9392_v63  ;;  %v12130_v31 = vpop.f32.mrb[141].mxu1 }
0x1413   :  { %v8960_v50 = vadd.f32 1.0, %v12537_v47 }
0x1415   :  { %12542 = vrcp.f32 %v8960_v50  ;;  %v9618_v53 = vpop.f32.mrb[142].mxu1 }
0x1416   :  { %v12539_v58 = vpop.eup %12538  ;;  %12544 = vpow2.f32 %v11045_v49  ;;  %v9619_v29 = vadd.f32 %v9618_v53, %v9545_v45  ;;  %v12135_v56 = vpop.f32.mrb[143].mxu1 }
0x1417   :  { %v9107_v41 = vadd.f32 1.0, %v12539_v58 }
0x1418   :  { %v12541_v18 = vpop.eup %12540  ;;  %v9622_v23 = vadd.f32 %v13847_v42, %v9619_v29 }
0x1419   :  { %12546 = vrcp.f32 %v9107_v41 }
0x141f   :  { %v12543_v59 = vpop.eup %12542 }
0x1420   :  { %v12545_v4 = vpop.eup %12544  ;;  %v9400_v19 = vmul.f32 %v12543_v59, %v12541_v18 }
0x1421   :  { %v9396_v17 = vadd.f32 1.0, %v12545_v4 }
0x1423   :  { %v12547_v25 = vpop.eup %12546  ;;  %12548 = vrcp.f32 %v9396_v17 }
0x1424   :  { %v9399_v8 = vmul.f32 %v12547_v25, %v13801_v55  ;;  %v9765_v55 = vpop.f32.mrb[144].mxu1 }
0x1426   :  { %v14020_v54 = vadd.f32 %v9400_v19, %v9399_v8 }
0x1428   :  { %12550 = vtanh.f32 %v14020_v54 }
0x142d   :  { %v12549_v0 = vpop.eup %12548 }
0x1432   :  { %v12551_v5 = vpop.eup %12550 }
0x1433   :  { %v9403_v15 = vmul.f32 %v12551_v5, %v12549_v0 }
0x1435   :  { %12124 = vmatmul.mubr.msk.f32.vlgmr.msra.gmra.mrb[110].mxu0 %vm692_vm3, %v9403_v15 }
0x1436   :  { %12137 = vmatpush3.msra.mxu0 %v13808_v57  ;;  %12138 = vmatprep.mubr.msk.f32.mxu0 %vm12657_vm0, %v12656_v1  ;;  %v12145_v57 = vpop.f32.mrb[145].mxu1 }
0x1437   :  { %12146 = vmatprep.subr.mxu0 %v12656_v1 }
0x1439   :  { %12139 = vmatmul.mubr.msk.f32.vlgmr.msra.gmra.mrb[112].mxu0 %vm36_vm4, %v13919_v60 }
0x143a   :  { %12147 = vmatpush3.msra.mxu0 %v13819_v44  ;;  %12148 = vmatprep.mubr.msk.f32.mxu0 %vm12657_vm0, %v12656_v1  ;;  %v9912_v44 = vpop.f32.mrb[146].mxu1 }
0x143b   :  { %12156 = vmatprep.subr.mxu0 %v12656_v1 }
0x143d   :  { %12149 = vmatmul.mubr.msk.f32.vlgmr.msra.gmra.mrb[114].mxu0 %vm36_vm4, %v13919_v60 }
0x143e   :  { %12157 = vmatpush3.msra.mxu0 %v13830_v21  ;;  %12158 = vmatprep.mubr.msk.f32.mxu0 %vm12657_vm0, %v12656_v1  ;;  %v12155_v21 = vpop.f32.mrb[147].mxu1 }
0x143f   :  { %12312 = vmatprep.subr.bf16.mxu0 %v12658_v13  ;;  %v10054_v27 = vpop.f32.mrb[148].mxu1 }
0x1440   :  { %v12165_v52 = vpop.f32.mrb[149].mxu1 }
0x1441   :  { %12159 = vmatmul.mubr.msk.f32.vlgmr.msra.gmra.mrb[116].mxu0 %vm36_vm4, %v13919_v60  ;;  %v11051_v60 = vmul.f32 -1.442695, %v9622_v23 }
0x1442   :  { %12314 = vmatpush3.bf16.msra.mxu0 %v12812_v14  ;;  %12174 = vmatprep.mubr.msk.f32.mxu0 %vm12657_vm0, %v12656_v1 }
0x1443   :  { %12315 = vmatprep.subr.bf16.mxu0 %v12658_v13  ;;  %12552 = vpow2.f32 %v11051_v60 }
0x1446   :  { %12317 = vmatpush3.bf16.msra.mxu0 %v12818_v16 }
0x1447   :  { %12187 = vmatprep.subr.mxu0 %v12656_v1 }
0x144d   :  { %v12553_v2 = vpop.eup %12552 }
0x144e   :  { %v9626_v42 = vadd.f32 1.0, %v12553_v2 }
0x1508   :  { %v9473_v14 = vpop.f32.mrb[110].mxu0 }
0x1509   :  { %v12125_v20 = vpop.f32.mrb[111].mxu0  ;;  %12180 = vmatmul.mubr.msk.f32.vlgmr.msra.gmra.mrb[150].mxu1 %vm36_vm4, %v9473_v14 }
0x150a   :  { %12183 = vmatpush3.msra.mxu1 %v13854_v6  ;;  %12184 = vmatprep.mubr.msk.f32.mxu1 %vm12657_vm0, %v12656_v1 }
0x150b   :  { %12192 = vmatprep.subr.mxu1 %v12656_v1 }
0x150c   :  { %v9695_v16 = vpop.f32.mrb[112].mxu0 }
0x150d   :  { %v9766_v46 = vadd.f32 %v9765_v55, %v9695_v16  ;;  %v12140_v62 = vpop.f32.mrb[113].mxu0 }
0x150f   :  { %v9769_v28 = vadd.f32 %v13863_v26, %v9766_v46 }
0x1510   :  { %v9842_v30 = vpop.f32.mrb[114].mxu0 }
0x1511   :  { %v11055_v33 = vmul.f32 -1.442695, %v9769_v28  ;;  %v9913_v34 = vadd.f32 %v9912_v44, %v9842_v30  ;;  %v12150_v35 = vpop.f32.mrb[115].mxu0 }
0x1513   :  { %12554 = vpow2.f32 %v11055_v33  ;;  %v9916_v36 = vadd.f32 %v13869_v12, %v9913_v34 }
0x1514   :  { %12556 = vrcp.f32 %v9626_v42  ;;  %v9984_v6 = vpop.f32.mrb[116].mxu0 }
0x1515   :  { %12558 = vtanh.f32 %v9916_v36  ;;  %v10055_v7 = vadd.f32 %v10054_v27, %v9984_v6  ;;  %v12160_v40 = vpop.f32.mrb[117].mxu0 }
0x1517   :  { %v10058_v63 = vadd.f32 %v13875_v32, %v10055_v7 }
0x1519   :  { %v11062_v45 = vmul.f32 -1.442695, %v10058_v63 }
0x151b   :  { %12560 = vpow2.f32 %v11062_v45 }
0x151d   :  { %v12555_v47 = vpop.eup %12554 }
0x151e   :  { %v12557_v49 = vpop.eup %12556  ;;  %v9773_v26 = vadd.f32 1.0, %v12555_v47 }
0x151f   :  { %v12559_v31 = vpop.eup %12558 }
0x1520   :  { %12562 = vrcp.f32 %v9773_v26  ;;  %v10066_v50 = vmul.f32 %v12559_v31, %v12557_v49 }
0x1525   :  { %v12561_v53 = vpop.eup %12560 }
0x1526   :  { %v10062_v29 = vadd.f32 1.0, %v12561_v53 }
0x1528   :  { %12564 = vrcp.f32 %v10062_v29 }
0x152a   :  { %v12563_v58 = vpop.eup %12562 }
0x152b   :  { %v10065_v12 = vmul.f32 %v12563_v58, %v13879_v48 }
0x152d   :  { %v10067_v56 = vadd.f32 %v10066_v50, %v10065_v12 }
0x152f   :  { %12566 = vtanh.f32 %v10067_v56 }
0x1532   :  { %v12565_v41 = vpop.eup %12564 }
0x1539   :  { %v12567_v18 = vpop.eup %12566 }
0x153a   :  { %v10069_v59 = vmul.f32 %v12567_v18, %v12565_v41 }
0x153c   :  { %12175 = vmatmul.mubr.msk.f32.vlgmr.msra.gmra.mrb[118].mxu0 %vm692_vm3, %v10069_v59 }
0x153d   :  { %12188 = vmatpush3.msra.mxu0 %v13886_v11  ;;  %12189 = vmatprep.mubr.msk.f32.mxu0 %vm12657_vm0, %v12656_v1 }
0x153e   :  { %12197 = vmatprep.subr.mxu0 %v12656_v1 }
0x1540   :  { %12190 = vmatmul.mubr.msk.f32.vlgmr.msra.gmra.mrb[120].mxu0 %vm36_vm4, %v9473_v14 }
0x1541   :  { %12198 = vmatpush3.msra.mxu0 %v13896_v51  ;;  %12199 = vmatprep.mubr.msk.f32.mxu0 %vm12657_vm0, %v12656_v1 }
0x1542   :  { %12207 = vmatprep.subr.mxu0 %v12656_v1 }
0x1544   :  { %12200 = vmatmul.mubr.msk.f32.vlgmr.msra.gmra.mrb[122].mxu0 %vm36_vm4, %v9473_v14 }
0x1545   :  { %12208 = vmatpush3.msra.mxu0 %v13906_v22  ;;  %12209 = vmatprep.mubr.msk.f32.mxu0 %vm12657_vm0, %v12656_v1 }
0x1546   :  { %12318 = vmatprep.subr.bf16.mxu0 %v12658_v13 }
0x1548   :  { %12210 = vmatmul.mubr.msk.f32.vlgmr.msra.gmra.mrb[124].mxu0 %vm36_vm4, %v9473_v14 }
0x1549   :  { %12320 = vmatpush3.bf16.msra.mxu0 %v12985_v37  ;;  %12225 = vmatprep.mubr.msk.f32.mxu0 %vm12657_vm0, %v12656_v1 }
0x154a   :  { %12321 = vmatprep.subr.bf16.mxu0 %v12658_v13 }
0x154d   :  { %12323 = vmatpush3.bf16.msra.mxu0 %v12991_v39 }
0x15dc   :  { %v10212_v32 = vpop.f32.mrb[150].mxu1 }
0x15dd   :  { %v12181_v48 = vpop.f32.mrb[151].mxu1 }
0x160f   :  { %v14079_v11 = vpop.f32.mrb[118].mxu0 }
0x1610   :  { %v12176_v51 = vpop.f32.mrb[119].mxu0  ;;  %12185 = vmatmul.mubr.msk.f32.vlgmr.msra.gmra.mrb[152].mxu1 %vm36_vm4, %v14079_v11 }
0x1611   :  { %12193 = vmatpush3.msra.mxu1 %v13926_v61  ;;  %12194 = vmatprep.mubr.msk.f32.mxu1 %vm12657_vm0, %v12656_v1 }
0x1612   :  { %12202 = vmatprep.subr.mxu1 %v12656_v1 }
0x1613   :  { %v10362_v37 = vpop.f32.mrb[120].mxu0 }
0x1614   :  { %v12191_v22 = vpop.f32.mrb[121].mxu0  ;;  %12195 = vmatmul.mubr.msk.f32.vlgmr.msra.gmra.mrb[154].mxu1 %vm36_vm4, %v14079_v11 }
0x1615   :  { %12203 = vmatpush3.msra.mxu1 %v13937_v24  ;;  %12204 = vmatprep.mubr.msk.f32.mxu1 %vm12657_vm0, %v12656_v1 }
0x1616   :  { %12212 = vmatprep.subr.mxu1 %v12656_v1 }
0x1617   :  { %v10509_v13 = vpop.f32.mrb[122].mxu0 }
0x1618   :  { %v12201_v39 = vpop.f32.mrb[123].mxu0  ;;  %12205 = vmatmul.mubr.msk.f32.vlgmr.msra.gmra.mrb[156].mxu1 %vm36_vm4, %v14079_v11 }
0x1619   :  { %12213 = vmatpush3.msra.mxu1 %v13948_v3  ;;  %12214 = vmatprep.mubr.msk.f32.mxu1 %vm12657_vm0, %v12656_v1 }
0x161b   :  { %v10651_v61 = vpop.f32.mrb[124].mxu0 }
0x161c   :  { %v12211_v4 = vpop.f32.mrb[125].mxu0  ;;  %12215 = vmatmul.mubr.msk.f32.vlgmr.msra.gmra.mrb[158].mxu1 %vm36_vm4, %v14079_v11 }
0x16e3   :  { %v10285_v24 = vpop.f32.mrb[152].mxu1 }
0x16e4   :  { %v10286_v19 = vadd.f32 %v10285_v24, %v10212_v32  ;;  %v12186_v25 = vpop.f32.mrb[153].mxu1 }
0x16e6   :  { %v10289_v17 = vadd.f32 %v13998_v10, %v10286_v19 }
0x16e7   :  { %v10432_v8 = vpop.f32.mrb[154].mxu1 }
0x16e8   :  { %v11066_v0 = vmul.f32 -1.442695, %v10289_v17  ;;  %v10433_v5 = vadd.f32 %v10432_v8, %v10362_v37  ;;  %v12196_v15 = vpop.f32.mrb[155].mxu1 }
0x16ea   :  { %12568 = vpow2.f32 %v11066_v0  ;;  %v10436_v3 = vadd.f32 %v14004_v9, %v10433_v5 }
0x16eb   :  { %v10579_v55 = vpop.f32.mrb[156].mxu1 }
0x16ec   :  { %v11069_v57 = vmul.f32 -1.442695, %v10436_v3  ;;  %v10580_v1 = vadd.f32 %v10579_v55, %v10509_v13  ;;  %v12206_v44 = vpop.f32.mrb[157].mxu1 }
0x16ee   :  { %12570 = vpow2.f32 %v11069_v57  ;;  %v10583_v23 = vadd.f32 %v14010_v38, %v10580_v1 }
0x16ef   :  { %v10721_v21 = vpop.f32.mrb[158].mxu1 }
0x16f0   :  { %v10722_v27 = vadd.f32 %v10721_v21, %v10651_v61  ;;  %v12216_v52 = vpop.f32.mrb[159].mxu1  ;;  %12572 = vtanh.f32 %v10583_v23 }
0x16f2   :  { %v10725_v60 = vadd.f32 %v14016_v43, %v10722_v27 }
0x16f4   :  { %v12569_v10 = vpop.eup %12568  ;;  %v11074_v14 = vmul.f32 -1.442695, %v10725_v60 }
0x16f5   :  { %v10293_v20 = vadd.f32 1.0, %v12569_v10 }
0x16f7   :  { %12574 = vrcp.f32 %v10293_v20 }
0x16f8   :  { %v12571_v16 = vpop.eup %12570  ;;  %12576 = vpow2.f32 %v11074_v14 }
0x16f9   :  { %v10440_v9 = vadd.f32 1.0, %v12571_v16 }
0x16fa   :  { %v12573_v2 = vpop.eup %12572 }
0x16fb   :  { %12578 = vrcp.f32 %v10440_v9 }
0x1701   :  { %v12575_v46 = vpop.eup %12574 }
0x1702   :  { %v12577_v62 = vpop.eup %12576  ;;  %v10733_v28 = vmul.f32 %v12575_v46, %v12573_v2 }
0x1703   :  { %v10729_v30 = vadd.f32 1.0, %v12577_v62 }
0x1705   :  { %v12579_v42 = vpop.eup %12578  ;;  %12580 = vrcp.f32 %v10729_v30 }
0x1706   :  { %v10732_v33 = vmul.f32 %v12579_v42, %v14020_v54 }
0x1708   :  { %v10734_v38 = vadd.f32 %v10733_v28, %v10732_v33 }
0x170a   :  { %12582 = vtanh.f32 %v10734_v38 }
0x170f   :  { %v12581_v43 = vpop.eup %12580 }
0x1714   :  { %v12583_v34 = vpop.eup %12582 }
0x1715   :  { %v10736_v35 = vmul.f32 %v12583_v34, %v12581_v43 }
0x1717   :  { %12226 = vmatmul.mubr.msk.f32.vlgmr.msra.gmra.mrb[126].mxu0 %vm692_vm3, %v10736_v35 }
0x17ea   :  { %v10806_v36 = vpop.f32.mrb[126].mxu0 }
0x17eb   :  { %v10810_v6 = vadd.f32 %v10806_v36, %v14079_v11  ;;  %v12227_v7 = vpop.f32.mrb[127].mxu0 }
0x17ed   :  { %v10811_v40 = vmul.f32 0.5, %v10810_v6 }
0x17ef   :  { %10812 = vst.msk [vmem:[#allocation2] sm:$0xff] %vm36_vm4, %v10811_v40 }
0x17f0   :  { %12643 = shalt.err (!%p12640_p4)
}
0x17f1   :  { %s12644_s22 = scalar_lea.hbm %s14129_s9, 128 }
0x17f2   :  { %p12645_p5 = scmp.ne.s32.totalorder %s14129_s9, %s12644_s22  ;;  %p12648_p6 = scmp.lt.u32.totalorder %s12644_s22, %s14129_s9 }
0x17f4   :  { %p12650_p7 = pnand %p12648_p6, %p12645_p5 }
0x17f6   :  { %12653 = shalt.err (!%p12650_p7)
}
0x17f7   :  { %10822 = dma.vmem_to_hbm [thread:$0]  %s10820_s18, 128, %s14129_s9, [#allocation3]  }
0x17f8   :  { %12654 = dma.done.wait [#allocation3], 128  }
0x17f9   :  { %12655 = vsyncadd [#allocation3], 4294967168 }
0x17fa   :  { %10826 = vsyncpa [#allocation3], 1 }

</bundles_post_ra>
